<compile_context>
chip_gen: v7x
topology: tpu7x:2x2x1
jax: 0.10.0
libtpu: 0.0.40
codegen_flags: <defaults>
</compile_context>

<pallas_src>
import jax
import jax.numpy as jnp
from jax import lax
from jax.experimental import pallas as pl
from jax.experimental.pallas import tpu as pltpu


# ----------------------- tile-size helper ----------------------------------- #
def _pick_tile(dim, pref, align):
    """Largest power-of-two tile <= pref that divides dim and respects align,
    else the full dim (always a legal block)."""
    t = pref
    while t >= align:
        if dim % t == 0 and t % align == 0:
            return t
        t //= 2
    return dim


# ----------------------- tiled matmul + bias kernel ------------------------- #
def _matmul_bias_kernel(x_ref, w_ref, b_ref, o_ref):
    acc = jnp.dot(x_ref[...], w_ref[...], preferred_element_type=jnp.float32)
    o_ref[...] = (acc + b_ref[...]).astype(o_ref.dtype)


def matmul_bias(x, w, b, *, out_dtype=jnp.float32, tn_pref=256, to_pref=512):
    """x:(N,K) bf16 @ w:(K,O) bf16 + b:(1,O) f32 -> (N,O) out_dtype.

    Grid is (O tiles, N tiles) with N innermost so the (K, to) weight panel is
    DMA'd from HBM exactly once and reused across every N tile (the weight is
    by far the largest array for a large vocab)."""
    # TODO(synk): add a K-reduction grid axis (f32 acc scratch + pl.when
    # init/finalize) once K is large enough that K-resident bf16 blocks no
    # longer fit the scoped VMEM budget (not needed at these sizes).
    N, K = x.shape
    O = w.shape[1]
    tn = _pick_tile(N, tn_pref, 8)
    to = _pick_tile(O, to_pref, 128)
    grid = (O // to, N // tn)                       # N innermost: weight reused
    return pl.pallas_call(
        _matmul_bias_kernel,
        out_shape=jax.ShapeDtypeStruct((N, O), out_dtype),
        grid_spec=pltpu.PrefetchScalarGridSpec(
            num_scalar_prefetch=0,
            grid=grid,
            in_specs=[
                pl.BlockSpec((tn, K), lambda j, i: (i, 0)),
                pl.BlockSpec((K, to), lambda j, i: (0, j)),
                pl.BlockSpec((1, to), lambda j, i: (0, j)),
            ],
            out_specs=pl.BlockSpec((tn, to), lambda j, i: (i, j)),
        ),
        compiler_params=pltpu.CompilerParams(
            dimension_semantics=("parallel", "parallel")),
    )(x, w, b)


# ----------------------- recurrent LSTM kernel ------------------------------ #
def _fast_sigmoid(x):
    # sigmoid(x) == 0.5 * tanh(0.5 * x) + 0.5 : 1 EUP push instead of exp+divide,
    # shortening the serial per-timestep dependency chain.
    return 0.5 * jnp.tanh(0.5 * x) + 0.5


def _lstm_chunk_kernel(xe_ref, wih_ref, bias_ref, h0_ref, c0_ref, whh_ref,
                       out_ref, hN_ref, cN_ref, gx_sc, hout_sc, h_sc, c_sc):
    # xe_ref : (tt, B, E)  bf16, time-major embedded inputs for this chunk
    # out_ref: (tt, B, H)  bf16, time-major hidden states
    tt, B, E = xe_ref.shape
    H = h0_ref.shape[1]

    @pl.when(pl.program_id(0) == 0)
    def _():
        h_sc[...] = h0_ref[...]
        c_sc[...] = c0_ref[...]

    # Fused input projection for the whole chunk: one bf16 MXU matmul with f32
    # accumulation, staged in VMEM scratch (off the serial recurrence).
    xe = xe_ref[...].reshape(tt * B, E)
    gx = jnp.dot(xe, wih_ref[...], preferred_element_type=jnp.float32)
    gx_sc[...] = (gx + bias_ref[...]).reshape(tt, B, 4 * H)

    whh = whh_ref[...]

    def step(k, carry):
        h, c = carry
        # TODO(synk): stage W_hh in the MXU once per chunk via
        # pltpu.matmul_push_rhs / matmul_acc_lhs / matmul_pop if the compiler
        # does not already hoist the RHS push out of the unrolled loop.
        gates = gx_sc[k] + jnp.dot(h.astype(jnp.bfloat16), whh,
                                   preferred_element_type=jnp.float32)
        i_g = _fast_sigmoid(gates[:, 0 * H:1 * H])
        f_g = _fast_sigmoid(gates[:, 1 * H:2 * H])
        g_g = jnp.tanh(gates[:, 2 * H:3 * H])
        o_g = _fast_sigmoid(gates[:, 3 * H:4 * H])
        c = f_g * c + i_g * g_g
        h = o_g * jnp.tanh(c)
        hout_sc[k] = h                  # full (B, H) f32 tile, lane/sublane dense
        return (h, c)

    h, c = lax.fori_loop(0, tt, step, (h_sc[...], c_sc[...]), unroll=True)
    h_sc[...] = h
    c_sc[...] = c

    # One full-block, unmasked store of the chunk's hidden states (bf16 halves
    # the HBM writeback and feeds the bf16 vocab matmul directly).
    out_ref[...] = hout_sc[...].astype(out_ref.dtype)
    hN_ref[...] = h                     # resident constant-index outputs,
    cN_ref[...] = c                     # written back to HBM only at grid end


def lstm_chunked(x_emb, wih_t, lstm_bias, h0, c0, whh_t, *, tt=None):
    """x_emb: (T, B, E) bf16 time-major.
    Returns out (T, B, H) bf16 time-major, final h (B, H) f32, final c (B, H) f32."""
    T, B, E = x_emb.shape
    H = whh_t.shape[0]
    G = 4 * H
    if tt is None:
        tt = next((c for c in (16, 8) if T % c == 0), T)
    assert T % tt == 0

    grid_spec = pltpu.PrefetchScalarGridSpec(
        num_scalar_prefetch=0,
        grid=(T // tt,),
        in_specs=[
            pl.BlockSpec((tt, B, E), lambda i: (i, 0, 0)),   # x_emb chunk
            pl.BlockSpec((E, G), lambda i: (0, 0)),          # W_ih^T (resident)
            pl.BlockSpec((1, G), lambda i: (0, 0)),          # b_ih + b_hh
            pl.BlockSpec((B, H), lambda i: (0, 0)),          # h0
            pl.BlockSpec((B, H), lambda i: (0, 0)),          # c0
            pl.BlockSpec((H, G), lambda i: (0, 0)),          # W_hh^T (resident)
        ],
        out_specs=[
            pl.BlockSpec((tt, B, H), lambda i: (i, 0, 0)),   # hidden states
            pl.BlockSpec((B, H), lambda i: (0, 0)),          # final h
            pl.BlockSpec((B, H), lambda i: (0, 0)),          # final c
        ],
        scratch_shapes=[
            pltpu.VMEM((tt, B, G), jnp.float32),             # projected gates
            pltpu.VMEM((tt, B, H), jnp.float32),             # time-major h staging
            pltpu.VMEM((B, H), jnp.float32),                 # h carry
            pltpu.VMEM((B, H), jnp.float32),                 # c carry
        ],
    )
    out_shapes = (
        jax.ShapeDtypeStruct((T, B, H), jnp.bfloat16),
        jax.ShapeDtypeStruct((B, H), jnp.float32),
        jax.ShapeDtypeStruct((B, H), jnp.float32),
    )
    return pl.pallas_call(
        _lstm_chunk_kernel,
        out_shape=out_shapes,
        grid_spec=grid_spec,
        compiler_params=pltpu.CompilerParams(
            dimension_semantics=("arbitrary",)),      # time recurrence is sequential
    )(x_emb, wih_t, lstm_bias, h0, c0, whh_t)


# ----------------------------- RNNLM forward -------------------------------- #
def rnnlm_forward(x_ids, h0, c0, params):
    """x_ids: (B, T) int32; h0/c0: (1, B, H). Returns (logits (B*T, V) f32, (h, c))."""
    embed_table, wih_t, whh_t, lstm_bias, lin_w_t, lin_b = params
    B, T = x_ids.shape
    H = whh_t.shape[0]
    E = wih_t.shape[0]

    # Embedding gather (glue), produced directly in TIME-MAJOR order, bf16.
    # TODO(synk): fuse the gather into the LSTM kernel via scalar-prefetched ids
    # + pl.Element row index_map to avoid the (T*B, E) HBM round trip.
    ids_tm = x_ids.T.reshape(-1)                                      # (T*B,)
    x_emb = jnp.take(embed_table, ids_tm, axis=0).astype(jnp.bfloat16)
    x_emb = x_emb.reshape(T, B, E)

    out_tbh, hN, cN = lstm_chunked(
        x_emb,
        wih_t.astype(jnp.bfloat16),
        lstm_bias,
        h0[0], c0[0],
        whh_t.astype(jnp.bfloat16),
    )                                                                 # (T, B, H) bf16

    # Time-major -> batch-first flatten (matches PyTorch's out.reshape(B*T, H)).
    out_flat = jnp.transpose(out_tbh, (1, 0, 2)).reshape(B * T, H)
    # TODO(synk): on v7x, lin_w_t could be fp8 to halve the vocab weight's HBM
    # traffic if accuracy allows.
    logits = matmul_bias(out_flat, lin_w_t.astype(jnp.bfloat16), lin_b)  # (B*T, V) f32
    return logits, (hN[None], cN[None])


# ----------------------------- pure-JAX reference --------------------------- #
def rnnlm_reference(x_ids, h0, c0, params):
    embed_table, wih_t, whh_t, lstm_bias, lin_w_t, lin_b = params
    B, T = x_ids.shape
    H = whh_t.shape[0]
    x_emb = jnp.take(embed_table, x_ids, axis=0)                      # (B, T, E)

    def step(carry, x_t):
        h, c = carry
        gates = x_t @ wih_t + h @ whh_t + lstm_bias
        i_g = jax.nn.sigmoid(gates[:, 0 * H:1 * H])
        f_g = jax.nn.sigmoid(gates[:, 1 * H:2 * H])
        g_g = jnp.tanh(gates[:, 2 * H:3 * H])
        o_g = jax.nn.sigmoid(gates[:, 3 * H:4 * H])
        c = f_g * c + i_g * g_g
        h = o_g * jnp.tanh(c)
        return (h, c), h

    (hN, cN), out_tbh = jax.lax.scan(step, (h0[0], c0[0]),
                                     jnp.transpose(x_emb, (1, 0, 2)))
    out_flat = jnp.transpose(out_tbh, (1, 0, 2)).reshape(B * T, H)
    logits = out_flat @ lin_w_t + lin_b
    return logits, (hN[None], cN[None])


# ----------------------------- parameter init ------------------------------- #
def init_params(key, vocab_size, embed_size, hidden_size):
    k = jax.random.split(key, 7)
    scale = 0.1
    embed_table = scale * jax.random.normal(k[0], (vocab_size, embed_size), jnp.float32)
    wih_t = scale * jax.random.normal(k[1], (embed_size, 4 * hidden_size), jnp.float32)
    whh_t = scale * jax.random.normal(k[2], (hidden_size, 4 * hidden_size), jnp.float32)
    b_ih = scale * jax.random.normal(k[3], (1, 4 * hidden_size), jnp.float32)
    b_hh = scale * jax.random.normal(k[4], (1, 4 * hidden_size), jnp.float32)
    lstm_bias = b_ih + b_hh                          # PyTorch adds both biases
    lin_w_t = scale * jax.random.normal(k[5], (hidden_size, vocab_size), jnp.float32)
    lin_b = scale * jax.random.normal(k[6], (1, vocab_size), jnp.float32)
    return (embed_table, wih_t, whh_t, lstm_bias, lin_w_t, lin_b)


if __name__ == "__main__":
    # Small but TPU-friendly shapes (B >= 8 sublanes, E/H multiples of 128,
    # T a multiple of the chunk size so the cross-chunk carry is exercised).
    vocab_size, embed_size, hidden_size = 256, 128, 128
    batch_size, seq_length = 8, 32

    key = jax.random.PRNGKey(0)
    k_ids, k_params = jax.random.split(key)

    x_ids = jax.random.randint(k_ids, (batch_size, seq_length), 0, vocab_size,
                               dtype=jnp.int32)
    h0 = jnp.zeros((1, batch_size, hidden_size), jnp.float32)
    c0 = jnp.zeros((1, batch_size, hidden_size), jnp.float32)
    params = init_params(k_params, vocab_size, embed_size, hidden_size)

    logits, (hN, cN) = jax.jit(rnnlm_forward)(x_ids, h0, c0, params)
    jax.block_until_ready((logits, hN, cN))

    assert logits.shape == (batch_size * seq_length, vocab_size)
    assert hN.shape == (1, batch_size, hidden_size)
    assert cN.shape == (1, batch_size, hidden_size)

    # Numerical check against a pure-JAX f32 reference (tolerance absorbs the
    # bf16 MXU operands / accumulation-order differences).
    ref_logits, (ref_h, ref_c) = jax.jit(rnnlm_reference)(x_ids, h0, c0, params)

    def rel_err(a, b):
        return float(jnp.max(jnp.abs(a.astype(jnp.float32) - b)) /
                     (jnp.max(jnp.abs(b)) + 1e-6))

    assert rel_err(logits, ref_logits) < 5e-2, rel_err(logits, ref_logits)
    assert rel_err(hN, ref_h) < 5e-2, rel_err(hN, ref_h)
    assert rel_err(cN, ref_c) < 5e-2, rel_err(cN, ref_c)

    print("KERNEL_OK")
</pallas_src>

<mosaic_0001>
module attributes {stable_mosaic.version = 11 : i64} {
  func.func @_lstm_chunk_kernel(%arg0: i32, %arg1: memref<16x8x128xbf16, #tpu.memory_space<vmem>>, %arg2: memref<128x512xbf16, #tpu.memory_space<vmem>>, %arg3: memref<1x512xf32, #tpu.memory_space<vmem>>, %arg4: memref<8x128xf32, #tpu.memory_space<vmem>>, %arg5: memref<8x128xf32, #tpu.memory_space<vmem>>, %arg6: memref<128x512xbf16, #tpu.memory_space<vmem>>, %arg7: memref<16x8x128xbf16, #tpu.memory_space<vmem>>, %arg8: memref<8x128xf32, #tpu.memory_space<vmem>>, %arg9: memref<8x128xf32, #tpu.memory_space<vmem>>, %arg10: memref<16x8x512xf32, #tpu.memory_space<vmem>>, %arg11: memref<16x8x128xf32, #tpu.memory_space<vmem>>, %arg12: memref<8x128xf32, #tpu.memory_space<vmem>>, %arg13: memref<8x128xf32, #tpu.memory_space<vmem>>) attributes {dimension_semantics = [#tpu.dimension_semantics<arbitrary>], iteration_bounds = array<i64: 2>, scalar_prefetch = 0 : i64, scratch_operands = 4 : i64, tpu.core_type = #tpu.core_type<tc>, window_params = [{transform_indices = @transform_0, window_bounds = array<i64: 16, 8, 128>}, {pipeline_mode = #tpu.pipeline_mode<synchronous>, transform_indices = @transform_1, window_bounds = array<i64: 128, 512>}, {pipeline_mode = #tpu.pipeline_mode<synchronous>, transform_indices = @transform_2, window_bounds = array<i64: 1, 512>}, {pipeline_mode = #tpu.pipeline_mode<synchronous>, transform_indices = @transform_3, window_bounds = array<i64: 8, 128>}, {pipeline_mode = #tpu.pipeline_mode<synchronous>, transform_indices = @transform_4, window_bounds = array<i64: 8, 128>}, {pipeline_mode = #tpu.pipeline_mode<synchronous>, transform_indices = @transform_5, window_bounds = array<i64: 128, 512>}, {transform_indices = @transform_6, window_bounds = array<i64: 16, 8, 128>}, {pipeline_mode = #tpu.pipeline_mode<synchronous>, transform_indices = @transform_7, window_bounds = array<i64: 8, 128>}, {pipeline_mode = #tpu.pipeline_mode<synchronous>, transform_indices = @transform_8, window_bounds = array<i64: 8, 128>}]} {
    %c0_i32 = arith.constant 0 : i32
    %0 = arith.cmpi eq, %arg0, %c0_i32 : i32
    %1 = arith.extui %0 : i1 to i32
    %c0_i32_0 = arith.constant 0 : i32
    %2 = arith.cmpi ne, %1, %c0_i32_0 : i32
    scf.if %2 {
      %c0_255 = arith.constant 0 : index
      %c0_256 = arith.constant 0 : index
      %678 = vector.load %arg4[%c0_255, %c0_256] : memref<8x128xf32, #tpu.memory_space<vmem>>, vector<8x128xf32>
      %c0_257 = arith.constant 0 : index
      %c0_258 = arith.constant 0 : index
      %679 = vector.load %arg12[%c0_257, %c0_258] : memref<8x128xf32, #tpu.memory_space<vmem>>, vector<8x128xf32>
      tpu.vector_store %arg12[%c0_257, %c0_258], %678 {strides = array<i32>} : memref<8x128xf32, #tpu.memory_space<vmem>>, vector<8x128xf32>,
      %c0_259 = arith.constant 0 : index
      %c0_260 = arith.constant 0 : index
      %680 = vector.load %arg5[%c0_259, %c0_260] : memref<8x128xf32, #tpu.memory_space<vmem>>, vector<8x128xf32>
      %c0_261 = arith.constant 0 : index
      %c0_262 = arith.constant 0 : index
      %681 = vector.load %arg13[%c0_261, %c0_262] : memref<8x128xf32, #tpu.memory_space<vmem>>, vector<8x128xf32>
      tpu.vector_store %arg13[%c0_261, %c0_262], %680 {strides = array<i32>} : memref<8x128xf32, #tpu.memory_space<vmem>>, vector<8x128xf32>,
    } else {
    }
    %c0 = arith.constant 0 : index
    %c0_1 = arith.constant 0 : index
    %c0_2 = arith.constant 0 : index
    %3 = vector.load %arg1[%c0, %c0_1, %c0_2] : memref<16x8x128xbf16, #tpu.memory_space<vmem>>, vector<16x8x128xbf16>
    %4 = vector.shape_cast %3 : vector<16x8x128xbf16> to vector<128x128xbf16>
    %c0_3 = arith.constant 0 : index
    %c0_4 = arith.constant 0 : index
    %5 = vector.load %arg2[%c0_3, %c0_4] : memref<128x512xbf16, #tpu.memory_space<vmem>>, vector<128x512xbf16>
    %cst = arith.constant dense<0.000000e+00> : vector<128x512xf32>
    %6 = tpu.matmul %4, %5, %cst {dimension_numbers = #tpu.dot_dimension_numbers<[1], [0], [0], [1], [0, 0, 1, 1], [], []>} : vector<128x128xbf16>, vector<128x512xbf16>, vector<128x512xf32> -> vector<128x512xf32>
    %c0_5 = arith.constant 0 : index
    %c0_6 = arith.constant 0 : index
    %7 = vector.load %arg3[%c0_5, %c0_6] : memref<1x512xf32, #tpu.memory_space<vmem>>, vector<1x512xf32>
    %8 = vector.broadcast %7 : vector<1x512xf32> to vector<128x512xf32>
    %9 = arith.addf %6, %8 : vector<128x512xf32>
    %10 = vector.shape_cast %9 : vector<128x512xf32> to vector<16x8x512xf32>
    %c0_7 = arith.constant 0 : index
    %c0_8 = arith.constant 0 : index
    %c0_9 = arith.constant 0 : index
    %11 = vector.load %arg10[%c0_7, %c0_8, %c0_9] : memref<16x8x512xf32, #tpu.memory_space<vmem>>, vector<16x8x512xf32>
    tpu.vector_store %arg10[%c0_7, %c0_8, %c0_9], %10 {strides = array<i32>} : memref<16x8x512xf32, #tpu.memory_space<vmem>>, vector<16x8x512xf32>,
    %c0_10 = arith.constant 0 : index
    %c0_11 = arith.constant 0 : index
    %12 = vector.load %arg6[%c0_10, %c0_11] : memref<128x512xbf16, #tpu.memory_space<vmem>>, vector<128x512xbf16>
    %c0_12 = arith.constant 0 : index
    %c0_13 = arith.constant 0 : index
    %13 = vector.load %arg12[%c0_12, %c0_13] : memref<8x128xf32, #tpu.memory_space<vmem>>, vector<8x128xf32>
    %c0_14 = arith.constant 0 : index
    %c0_15 = arith.constant 0 : index
    %14 = vector.load %arg13[%c0_14, %c0_15] : memref<8x128xf32, #tpu.memory_space<vmem>>, vector<8x128xf32>
    %c0_i32_16 = arith.constant 0 : i32
    %15 = arith.index_cast %c0_i32_16 : i32 to index
    %c0_17 = arith.constant 0 : index
    %c0_18 = arith.constant 0 : index
    %16 = vector.load %arg10[%15, %c0_17, %c0_18] : memref<16x8x512xf32, #tpu.memory_space<vmem>>, vector<1x8x512xf32>
    %17 = vector.shape_cast %16 : vector<1x8x512xf32> to vector<8x512xf32>
    %18 = arith.truncf %13 : vector<8x128xf32> to vector<8x128xbf16>
    %cst_19 = arith.constant dense<0.000000e+00> : vector<8x512xf32>
    %19 = tpu.matmul %18, %12, %cst_19 {dimension_numbers = #tpu.dot_dimension_numbers<[1], [0], [0], [1], [0, 0, 1, 1], [], []>} : vector<8x128xbf16>, vector<128x512xbf16>, vector<8x512xf32> -> vector<8x512xf32>
    %20 = arith.addf %17, %19 : vector<8x512xf32>
    %21 = vector.extract_strided_slice %20 {offsets = [0, 0], sizes = [8, 128], strides = [1, 1]} : vector<8x512xf32> to vector<8x128xf32>
    %cst_20 = arith.constant 5.000000e-01 : f32
    %22 = vector.broadcast %cst_20 : f32 to vector<8x128xf32>
    %23 = arith.mulf %22, %21 : vector<8x128xf32>
    %24 = math.tanh %23 : vector<8x128xf32>
    %cst_21 = arith.constant 5.000000e-01 : f32
    %25 = vector.broadcast %cst_21 : f32 to vector<8x128xf32>
    %26 = arith.mulf %25, %24 : vector<8x128xf32>
    %cst_22 = arith.constant 5.000000e-01 : f32
    %27 = vector.broadcast %cst_22 : f32 to vector<8x128xf32>
    %28 = arith.addf %26, %27 : vector<8x128xf32>
    %29 = vector.extract_strided_slice %20 {offsets = [0, 128], sizes = [8, 128], strides = [1, 1]} : vector<8x512xf32> to vector<8x128xf32>
    %cst_23 = arith.constant 5.000000e-01 : f32
    %30 = vector.broadcast %cst_23 : f32 to vector<8x128xf32>
    %31 = arith.mulf %30, %29 : vector<8x128xf32>
    %32 = math.tanh %31 : vector<8x128xf32>
    %cst_24 = arith.constant 5.000000e-01 : f32
    %33 = vector.broadcast %cst_24 : f32 to vector<8x128xf32>
    %34 = arith.mulf %33, %32 : vector<8x128xf32>
    %cst_25 = arith.constant 5.000000e-01 : f32
    %35 = vector.broadcast %cst_25 : f32 to vector<8x128xf32>
    %36 = arith.addf %34, %35 : vector<8x128xf32>
    %37 = vector.extract_strided_slice %20 {offsets = [0, 256], sizes = [8, 128], strides = [1, 1]} : vector<8x512xf32> to vector<8x128xf32>
    %38 = math.tanh %37 : vector<8x128xf32>
    %39 = vector.extract_strided_slice %20 {offsets = [0, 384], sizes = [8, 128], strides = [1, 1]} : vector<8x512xf32> to vector<8x128xf32>
    %cst_26 = arith.constant 5.000000e-01 : f32
    %40 = vector.broadcast %cst_26 : f32 to vector<8x128xf32>
    %41 = arith.mulf %40, %39 : vector<8x128xf32>
    %42 = math.tanh %41 : vector<8x128xf32>
    %cst_27 = arith.constant 5.000000e-01 : f32
    %43 = vector.broadcast %cst_27 : f32 to vector<8x128xf32>
    %44 = arith.mulf %43, %42 : vector<8x128xf32>
    %cst_28 = arith.constant 5.000000e-01 : f32
    %45 = vector.broadcast %cst_28 : f32 to vector<8x128xf32>
    %46 = arith.addf %44, %45 : vector<8x128xf32>
    %47 = arith.mulf %36, %14 : vector<8x128xf32>
    %48 = arith.mulf %28, %38 : vector<8x128xf32>
    %49 = arith.addf %47, %48 : vector<8x128xf32>
    %50 = math.tanh %49 : vector<8x128xf32>
    %51 = arith.mulf %46, %50 : vector<8x128xf32>
    %52 = arith.index_cast %c0_i32_16 : i32 to index
    %c0_29 = arith.constant 0 : index
    %c0_30 = arith.constant 0 : index
    %53 = vector.load %arg11[%52, %c0_29, %c0_30] : memref<16x8x128xf32, #tpu.memory_space<vmem>>, vector<1x8x128xf32>
    %54 = vector.shape_cast %53 : vector<1x8x128xf32> to vector<8x128xf32>
    %55 = vector.shape_cast %51 : vector<8x128xf32> to vector<1x8x128xf32>
    tpu.vector_store %arg11[%52, %c0_29, %c0_30], %55 {strides = array<i32>} : memref<16x8x128xf32, #tpu.memory_space<vmem>>, vector<1x8x128xf32>,
    %c1_i32 = arith.constant 1 : i32
    %56 = arith.index_cast %c1_i32 : i32 to index
    %c0_31 = arith.constant 0 : index
    %c0_32 = arith.constant 0 : index
    %57 = vector.load %arg10[%56, %c0_31, %c0_32] : memref<16x8x512xf32, #tpu.memory_space<vmem>>, vector<1x8x512xf32>
    %58 = vector.shape_cast %57 : vector<1x8x512xf32> to vector<8x512xf32>
    %59 = arith.truncf %51 : vector<8x128xf32> to vector<8x128xbf16>
    %cst_33 = arith.constant dense<0.000000e+00> : vector<8x512xf32>
    %60 = tpu.matmul %59, %12, %cst_33 {dimension_numbers = #tpu.dot_dimension_numbers<[1], [0], [0], [1], [0, 0, 1, 1], [], []>} : vector<8x128xbf16>, vector<128x512xbf16>, vector<8x512xf32> -> vector<8x512xf32>
    %61 = arith.addf %58, %60 : vector<8x512xf32>
    %62 = vector.extract_strided_slice %61 {offsets = [0, 0], sizes = [8, 128], strides = [1, 1]} : vector<8x512xf32> to vector<8x128xf32>
    %cst_34 = arith.constant 5.000000e-01 : f32
    %63 = vector.broadcast %cst_34 : f32 to vector<8x128xf32>
    %64 = arith.mulf %63, %62 : vector<8x128xf32>
    %65 = math.tanh %64 : vector<8x128xf32>
    %cst_35 = arith.constant 5.000000e-01 : f32
    %66 = vector.broadcast %cst_35 : f32 to vector<8x128xf32>
    %67 = arith.mulf %66, %65 : vector<8x128xf32>
    %cst_36 = arith.constant 5.000000e-01 : f32
    %68 = vector.broadcast %cst_36 : f32 to vector<8x128xf32>
    %69 = arith.addf %67, %68 : vector<8x128xf32>
    %70 = vector.extract_strided_slice %61 {offsets = [0, 128], sizes = [8, 128], strides = [1, 1]} : vector<8x512xf32> to vector<8x128xf32>
    %cst_37 = arith.constant 5.000000e-01 : f32
    %71 = vector.broadcast %cst_37 : f32 to vector<8x128xf32>
    %72 = arith.mulf %71, %70 : vector<8x128xf32>
    %73 = math.tanh %72 : vector<8x128xf32>
    %cst_38 = arith.constant 5.000000e-01 : f32
    %74 = vector.broadcast %cst_38 : f32 to vector<8x128xf32>
    %75 = arith.mulf %74, %73 : vector<8x128xf32>
    %cst_39 = arith.constant 5.000000e-01 : f32
    %76 = vector.broadcast %cst_39 : f32 to vector<8x128xf32>
    %77 = arith.addf %75, %76 : vector<8x128xf32>
    %78 = vector.extract_strided_slice %61 {offsets = [0, 256], sizes = [8, 128], strides = [1, 1]} : vector<8x512xf32> to vector<8x128xf32>
    %79 = math.tanh %78 : vector<8x128xf32>
    %80 = vector.extract_strided_slice %61 {offsets = [0, 384], sizes = [8, 128], strides = [1, 1]} : vector<8x512xf32> to vector<8x128xf32>
    %cst_40 = arith.constant 5.000000e-01 : f32
    %81 = vector.broadcast %cst_40 : f32 to vector<8x128xf32>
    %82 = arith.mulf %81, %80 : vector<8x128xf32>
    %83 = math.tanh %82 : vector<8x128xf32>
    %cst_41 = arith.constant 5.000000e-01 : f32
    %84 = vector.broadcast %cst_41 : f32 to vector<8x128xf32>
    %85 = arith.mulf %84, %83 : vector<8x128xf32>
    %cst_42 = arith.constant 5.000000e-01 : f32
    %86 = vector.broadcast %cst_42 : f32 to vector<8x128xf32>
    %87 = arith.addf %85, %86 : vector<8x128xf32>
    %88 = arith.mulf %77, %49 : vector<8x128xf32>
    %89 = arith.mulf %69, %79 : vector<8x128xf32>
    %90 = arith.addf %88, %89 : vector<8x128xf32>
    %91 = math.tanh %90 : vector<8x128xf32>
    %92 = arith.mulf %87, %91 : vector<8x128xf32>
    %93 = arith.index_cast %c1_i32 : i32 to index
    %c0_43 = arith.constant 0 : index
    %c0_44 = arith.constant 0 : index
    %94 = vector.load %arg11[%93, %c0_43, %c0_44] : memref<16x8x128xf32, #tpu.memory_space<vmem>>, vector<1x8x128xf32>
    %95 = vector.shape_cast %94 : vector<1x8x128xf32> to vector<8x128xf32>
    %96 = vector.shape_cast %92 : vector<8x128xf32> to vector<1x8x128xf32>
    tpu.vector_store %arg11[%93, %c0_43, %c0_44], %96 {strides = array<i32>} : memref<16x8x128xf32, #tpu.memory_space<vmem>>, vector<1x8x128xf32>,
    %c2_i32 = arith.constant 2 : i32
    %97 = arith.index_cast %c2_i32 : i32 to index
    %c0_45 = arith.constant 0 : index
    %c0_46 = arith.constant 0 : index
    %98 = vector.load %arg10[%97, %c0_45, %c0_46] : memref<16x8x512xf32, #tpu.memory_space<vmem>>, vector<1x8x512xf32>
    %99 = vector.shape_cast %98 : vector<1x8x512xf32> to vector<8x512xf32>
    %100 = arith.truncf %92 : vector<8x128xf32> to vector<8x128xbf16>
    %cst_47 = arith.constant dense<0.000000e+00> : vector<8x512xf32>
    %101 = tpu.matmul %100, %12, %cst_47 {dimension_numbers = #tpu.dot_dimension_numbers<[1], [0], [0], [1], [0, 0, 1, 1], [], []>} : vector<8x128xbf16>, vector<128x512xbf16>, vector<8x512xf32> -> vector<8x512xf32>
    %102 = arith.addf %99, %101 : vector<8x512xf32>
    %103 = vector.extract_strided_slice %102 {offsets = [0, 0], sizes = [8, 128], strides = [1, 1]} : vector<8x512xf32> to vector<8x128xf32>
    %cst_48 = arith.constant 5.000000e-01 : f32
    %104 = vector.broadcast %cst_48 : f32 to vector<8x128xf32>
    %105 = arith.mulf %104, %103 : vector<8x128xf32>
    %106 = math.tanh %105 : vector<8x128xf32>
    %cst_49 = arith.constant 5.000000e-01 : f32
    %107 = vector.broadcast %cst_49 : f32 to vector<8x128xf32>
    %108 = arith.mulf %107, %106 : vector<8x128xf32>
    %cst_50 = arith.constant 5.000000e-01 : f32
    %109 = vector.broadcast %cst_50 : f32 to vector<8x128xf32>
    %110 = arith.addf %108, %109 : vector<8x128xf32>
    %111 = vector.extract_strided_slice %102 {offsets = [0, 128], sizes = [8, 128], strides = [1, 1]} : vector<8x512xf32> to vector<8x128xf32>
    %cst_51 = arith.constant 5.000000e-01 : f32
    %112 = vector.broadcast %cst_51 : f32 to vector<8x128xf32>
    %113 = arith.mulf %112, %111 : vector<8x128xf32>
    %114 = math.tanh %113 : vector<8x128xf32>
    %cst_52 = arith.constant 5.000000e-01 : f32
    %115 = vector.broadcast %cst_52 : f32 to vector<8x128xf32>
    %116 = arith.mulf %115, %114 : vector<8x128xf32>
    %cst_53 = arith.constant 5.000000e-01 : f32
    %117 = vector.broadcast %cst_53 : f32 to vector<8x128xf32>
    %118 = arith.addf %116, %117 : vector<8x128xf32>
    %119 = vector.extract_strided_slice %102 {offsets = [0, 256], sizes = [8, 128], strides = [1, 1]} : vector<8x512xf32> to vector<8x128xf32>
    %120 = math.tanh %119 : vector<8x128xf32>
    %121 = vector.extract_strided_slice %102 {offsets = [0, 384], sizes = [8, 128], strides = [1, 1]} : vector<8x512xf32> to vector<8x128xf32>
    %cst_54 = arith.constant 5.000000e-01 : f32
    %122 = vector.broadcast %cst_54 : f32 to vector<8x128xf32>
    %123 = arith.mulf %122, %121 : vector<8x128xf32>
    %124 = math.tanh %123 : vector<8x128xf32>
    %cst_55 = arith.constant 5.000000e-01 : f32
    %125 = vector.broadcast %cst_55 : f32 to vector<8x128xf32>
    %126 = arith.mulf %125, %124 : vector<8x128xf32>
    %cst_56 = arith.constant 5.000000e-01 : f32
    %127 = vector.broadcast %cst_56 : f32 to vector<8x128xf32>
    %128 = arith.addf %126, %127 : vector<8x128xf32>
    %129 = arith.mulf %118, %90 : vector<8x128xf32>
    %130 = arith.mulf %110, %120 : vector<8x128xf32>
    %131 = arith.addf %129, %130 : vector<8x128xf32>
    %132 = math.tanh %131 : vector<8x128xf32>
    %133 = arith.mulf %128, %132 : vector<8x128xf32>
    %134 = arith.index_cast %c2_i32 : i32 to index
    %c0_57 = arith.constant 0 : index
    %c0_58 = arith.constant 0 : index
    %135 = vector.load %arg11[%134, %c0_57, %c0_58] : memref<16x8x128xf32, #tpu.memory_space<vmem>>, vector<1x8x128xf32>
    %136 = vector.shape_cast %135 : vector<1x8x128xf32> to vector<8x128xf32>
    %137 = vector.shape_cast %133 : vector<8x128xf32> to vector<1x8x128xf32>
    tpu.vector_store %arg11[%134, %c0_57, %c0_58], %137 {strides = array<i32>} : memref<16x8x128xf32, #tpu.memory_space<vmem>>, vector<1x8x128xf32>,
    %c3_i32 = arith.constant 3 : i32
    %138 = arith.index_cast %c3_i32 : i32 to index
    %c0_59 = arith.constant 0 : index
    %c0_60 = arith.constant 0 : index
    %139 = vector.load %arg10[%138, %c0_59, %c0_60] : memref<16x8x512xf32, #tpu.memory_space<vmem>>, vector<1x8x512xf32>
    %140 = vector.shape_cast %139 : vector<1x8x512xf32> to vector<8x512xf32>
    %141 = arith.truncf %133 : vector<8x128xf32> to vector<8x128xbf16>
    %cst_61 = arith.constant dense<0.000000e+00> : vector<8x512xf32>
    %142 = tpu.matmul %141, %12, %cst_61 {dimension_numbers = #tpu.dot_dimension_numbers<[1], [0], [0], [1], [0, 0, 1, 1], [], []>} : vector<8x128xbf16>, vector<128x512xbf16>, vector<8x512xf32> -> vector<8x512xf32>
    %143 = arith.addf %140, %142 : vector<8x512xf32>
    %144 = vector.extract_strided_slice %143 {offsets = [0, 0], sizes = [8, 128], strides = [1, 1]} : vector<8x512xf32> to vector<8x128xf32>
    %cst_62 = arith.constant 5.000000e-01 : f32
    %145 = vector.broadcast %cst_62 : f32 to vector<8x128xf32>
    %146 = arith.mulf %145, %144 : vector<8x128xf32>
    %147 = math.tanh %146 : vector<8x128xf32>
    %cst_63 = arith.constant 5.000000e-01 : f32
    %148 = vector.broadcast %cst_63 : f32 to vector<8x128xf32>
    %149 = arith.mulf %148, %147 : vector<8x128xf32>
    %cst_64 = arith.constant 5.000000e-01 : f32
    %150 = vector.broadcast %cst_64 : f32 to vector<8x128xf32>
    %151 = arith.addf %149, %150 : vector<8x128xf32>
    %152 = vector.extract_strided_slice %143 {offsets = [0, 128], sizes = [8, 128], strides = [1, 1]} : vector<8x512xf32> to vector<8x128xf32>
    %cst_65 = arith.constant 5.000000e-01 : f32
    %153 = vector.broadcast %cst_65 : f32 to vector<8x128xf32>
    %154 = arith.mulf %153, %152 : vector<8x128xf32>
    %155 = math.tanh %154 : vector<8x128xf32>
    %cst_66 = arith.constant 5.000000e-01 : f32
    %156 = vector.broadcast %cst_66 : f32 to vector<8x128xf32>
    %157 = arith.mulf %156, %155 : vector<8x128xf32>
    %cst_67 = arith.constant 5.000000e-01 : f32
    %158 = vector.broadcast %cst_67 : f32 to vector<8x128xf32>
    %159 = arith.addf %157, %158 : vector<8x128xf32>
    %160 = vector.extract_strided_slice %143 {offsets = [0, 256], sizes = [8, 128], strides = [1, 1]} : vector<8x512xf32> to vector<8x128xf32>
    %161 = math.tanh %160 : vector<8x128xf32>
    %162 = vector.extract_strided_slice %143 {offsets = [0, 384], sizes = [8, 128], strides = [1, 1]} : vector<8x512xf32> to vector<8x128xf32>
    %cst_68 = arith.constant 5.000000e-01 : f32
    %163 = vector.broadcast %cst_68 : f32 to vector<8x128xf32>
    %164 = arith.mulf %163, %162 : vector<8x128xf32>
    %165 = math.tanh %164 : vector<8x128xf32>
    %cst_69 = arith.constant 5.000000e-01 : f32
    %166 = vector.broadcast %cst_69 : f32 to vector<8x128xf32>
    %167 = arith.mulf %166, %165 : vector<8x128xf32>
    %cst_70 = arith.constant 5.000000e-01 : f32
    %168 = vector.broadcast %cst_70 : f32 to vector<8x128xf32>
    %169 = arith.addf %167, %168 : vector<8x128xf32>
    %170 = arith.mulf %159, %131 : vector<8x128xf32>
    %171 = arith.mulf %151, %161 : vector<8x128xf32>
    %172 = arith.addf %170, %171 : vector<8x128xf32>
    %173 = math.tanh %172 : vector<8x128xf32>
    %174 = arith.mulf %169, %173 : vector<8x128xf32>
    %175 = arith.index_cast %c3_i32 : i32 to index
    %c0_71 = arith.constant 0 : index
    %c0_72 = arith.constant 0 : index
    %176 = vector.load %arg11[%175, %c0_71, %c0_72] : memref<16x8x128xf32, #tpu.memory_space<vmem>>, vector<1x8x128xf32>
    %177 = vector.shape_cast %176 : vector<1x8x128xf32> to vector<8x128xf32>
    %178 = vector.shape_cast %174 : vector<8x128xf32> to vector<1x8x128xf32>
    tpu.vector_store %arg11[%175, %c0_71, %c0_72], %178 {strides = array<i32>} : memref<16x8x128xf32, #tpu.memory_space<vmem>>, vector<1x8x128xf32>,
    %c4_i32 = arith.constant 4 : i32
    %179 = arith.index_cast %c4_i32 : i32 to index
    %c0_73 = arith.constant 0 : index
    %c0_74 = arith.constant 0 : index
    %180 = vector.load %arg10[%179, %c0_73, %c0_74] : memref<16x8x512xf32, #tpu.memory_space<vmem>>, vector<1x8x512xf32>
    %181 = vector.shape_cast %180 : vector<1x8x512xf32> to vector<8x512xf32>
    %182 = arith.truncf %174 : vector<8x128xf32> to vector<8x128xbf16>
    %cst_75 = arith.constant dense<0.000000e+00> : vector<8x512xf32>
    %183 = tpu.matmul %182, %12, %cst_75 {dimension_numbers = #tpu.dot_dimension_numbers<[1], [0], [0], [1], [0, 0, 1, 1], [], []>} : vector<8x128xbf16>, vector<128x512xbf16>, vector<8x512xf32> -> vector<8x512xf32>
    %184 = arith.addf %181, %183 : vector<8x512xf32>
    %185 = vector.extract_strided_slice %184 {offsets = [0, 0], sizes = [8, 128], strides = [1, 1]} : vector<8x512xf32> to vector<8x128xf32>
    %cst_76 = arith.constant 5.000000e-01 : f32
    %186 = vector.broadcast %cst_76 : f32 to vector<8x128xf32>
    %187 = arith.mulf %186, %185 : vector<8x128xf32>
    %188 = math.tanh %187 : vector<8x128xf32>
    %cst_77 = arith.constant 5.000000e-01 : f32
    %189 = vector.broadcast %cst_77 : f32 to vector<8x128xf32>
    %190 = arith.mulf %189, %188 : vector<8x128xf32>
    %cst_78 = arith.constant 5.000000e-01 : f32
    %191 = vector.broadcast %cst_78 : f32 to vector<8x128xf32>
    %192 = arith.addf %190, %191 : vector<8x128xf32>
    %193 = vector.extract_strided_slice %184 {offsets = [0, 128], sizes = [8, 128], strides = [1, 1]} : vector<8x512xf32> to vector<8x128xf32>
    %cst_79 = arith.constant 5.000000e-01 : f32
    %194 = vector.broadcast %cst_79 : f32 to vector<8x128xf32>
    %195 = arith.mulf %194, %193 : vector<8x128xf32>
    %196 = math.tanh %195 : vector<8x128xf32>
    %cst_80 = arith.constant 5.000000e-01 : f32
    %197 = vector.broadcast %cst_80 : f32 to vector<8x128xf32>
    %198 = arith.mulf %197, %196 : vector<8x128xf32>
    %cst_81 = arith.constant 5.000000e-01 : f32
    %199 = vector.broadcast %cst_81 : f32 to vector<8x128xf32>
    %200 = arith.addf %198, %199 : vector<8x128xf32>
    %201 = vector.extract_strided_slice %184 {offsets = [0, 256], sizes = [8, 128], strides = [1, 1]} : vector<8x512xf32> to vector<8x128xf32>
    %202 = math.tanh %201 : vector<8x128xf32>
    %203 = vector.extract_strided_slice %184 {offsets = [0, 384], sizes = [8, 128], strides = [1, 1]} : vector<8x512xf32> to vector<8x128xf32>
    %cst_82 = arith.constant 5.000000e-01 : f32
    %204 = vector.broadcast %cst_82 : f32 to vector<8x128xf32>
    %205 = arith.mulf %204, %203 : vector<8x128xf32>
    %206 = math.tanh %205 : vector<8x128xf32>
    %cst_83 = arith.constant 5.000000e-01 : f32
    %207 = vector.broadcast %cst_83 : f32 to vector<8x128xf32>
    %208 = arith.mulf %207, %206 : vector<8x128xf32>
    %cst_84 = arith.constant 5.000000e-01 : f32
    %209 = vector.broadcast %cst_84 : f32 to vector<8x128xf32>
    %210 = arith.addf %208, %209 : vector<8x128xf32>
    %211 = arith.mulf %200, %172 : vector<8x128xf32>
    %212 = arith.mulf %192, %202 : vector<8x128xf32>
    %213 = arith.addf %211, %212 : vector<8x128xf32>
    %214 = math.tanh %213 : vector<8x128xf32>
    %215 = arith.mulf %210, %214 : vector<8x128xf32>
    %216 = arith.index_cast %c4_i32 : i32 to index
    %c0_85 = arith.constant 0 : index
    %c0_86 = arith.constant 0 : index
    %217 = vector.load %arg11[%216, %c0_85, %c0_86] : memref<16x8x128xf32, #tpu.memory_space<vmem>>, vector<1x8x128xf32>
    %218 = vector.shape_cast %217 : vector<1x8x128xf32> to vector<8x128xf32>
    %219 = vector.shape_cast %215 : vector<8x128xf32> to vector<1x8x128xf32>
    tpu.vector_store %arg11[%216, %c0_85, %c0_86], %219 {strides = array<i32>} : memref<16x8x128xf32, #tpu.memory_space<vmem>>, vector<1x8x128xf32>,
    %c5_i32 = arith.constant 5 : i32
    %220 = arith.index_cast %c5_i32 : i32 to index
    %c0_87 = arith.constant 0 : index
    %c0_88 = arith.constant 0 : index
    %221 = vector.load %arg10[%220, %c0_87, %c0_88] : memref<16x8x512xf32, #tpu.memory_space<vmem>>, vector<1x8x512xf32>
    %222 = vector.shape_cast %221 : vector<1x8x512xf32> to vector<8x512xf32>
    %223 = arith.truncf %215 : vector<8x128xf32> to vector<8x128xbf16>
    %cst_89 = arith.constant dense<0.000000e+00> : vector<8x512xf32>
    %224 = tpu.matmul %223, %12, %cst_89 {dimension_numbers = #tpu.dot_dimension_numbers<[1], [0], [0], [1], [0, 0, 1, 1], [], []>} : vector<8x128xbf16>, vector<128x512xbf16>, vector<8x512xf32> -> vector<8x512xf32>
    %225 = arith.addf %222, %224 : vector<8x512xf32>
    %226 = vector.extract_strided_slice %225 {offsets = [0, 0], sizes = [8, 128], strides = [1, 1]} : vector<8x512xf32> to vector<8x128xf32>
    %cst_90 = arith.constant 5.000000e-01 : f32
    %227 = vector.broadcast %cst_90 : f32 to vector<8x128xf32>
    %228 = arith.mulf %227, %226 : vector<8x128xf32>
    %229 = math.tanh %228 : vector<8x128xf32>
    %cst_91 = arith.constant 5.000000e-01 : f32
    %230 = vector.broadcast %cst_91 : f32 to vector<8x128xf32>
    %231 = arith.mulf %230, %229 : vector<8x128xf32>
    %cst_92 = arith.constant 5.000000e-01 : f32
    %232 = vector.broadcast %cst_92 : f32 to vector<8x128xf32>
    %233 = arith.addf %231, %232 : vector<8x128xf32>
    %234 = vector.extract_strided_slice %225 {offsets = [0, 128], sizes = [8, 128], strides = [1, 1]} : vector<8x512xf32> to vector<8x128xf32>
    %cst_93 = arith.constant 5.000000e-01 : f32
    %235 = vector.broadcast %cst_93 : f32 to vector<8x128xf32>
    %236 = arith.mulf %235, %234 : vector<8x128xf32>
    %237 = math.tanh %236 : vector<8x128xf32>
    %cst_94 = arith.constant 5.000000e-01 : f32
    %238 = vector.broadcast %cst_94 : f32 to vector<8x128xf32>
    %239 = arith.mulf %238, %237 : vector<8x128xf32>
    %cst_95 = arith.constant 5.000000e-01 : f32
    %240 = vector.broadcast %cst_95 : f32 to vector<8x128xf32>
    %241 = arith.addf %239, %240 : vector<8x128xf32>
    %242 = vector.extract_strided_slice %225 {offsets = [0, 256], sizes = [8, 128], strides = [1, 1]} : vector<8x512xf32> to vector<8x128xf32>
    %243 = math.tanh %242 : vector<8x128xf32>
    %244 = vector.extract_strided_slice %225 {offsets = [0, 384], sizes = [8, 128], strides = [1, 1]} : vector<8x512xf32> to vector<8x128xf32>
    %cst_96 = arith.constant 5.000000e-01 : f32
    %245 = vector.broadcast %cst_96 : f32 to vector<8x128xf32>
    %246 = arith.mulf %245, %244 : vector<8x128xf32>
    %247 = math.tanh %246 : vector<8x128xf32>
    %cst_97 = arith.constant 5.000000e-01 : f32
    %248 = vector.broadcast %cst_97 : f32 to vector<8x128xf32>
    %249 = arith.mulf %248, %247 : vector<8x128xf32>
    %cst_98 = arith.constant 5.000000e-01 : f32
    %250 = vector.broadcast %cst_98 : f32 to vector<8x128xf32>
    %251 = arith.addf %249, %250 : vector<8x128xf32>
    %252 = arith.mulf %241, %213 : vector<8x128xf32>
    %253 = arith.mulf %233, %243 : vector<8x128xf32>
    %254 = arith.addf %252, %253 : vector<8x128xf32>
    %255 = math.tanh %254 : vector<8x128xf32>
    %256 = arith.mulf %251, %255 : vector<8x128xf32>
    %257 = arith.index_cast %c5_i32 : i32 to index
    %c0_99 = arith.constant 0 : index
    %c0_100 = arith.constant 0 : index
    %258 = vector.load %arg11[%257, %c0_99, %c0_100] : memref<16x8x128xf32, #tpu.memory_space<vmem>>, vector<1x8x128xf32>
    %259 = vector.shape_cast %258 : vector<1x8x128xf32> to vector<8x128xf32>
    %260 = vector.shape_cast %256 : vector<8x128xf32> to vector<1x8x128xf32>
    tpu.vector_store %arg11[%257, %c0_99, %c0_100], %260 {strides = array<i32>} : memref<16x8x128xf32, #tpu.memory_space<vmem>>, vector<1x8x128xf32>,
    %c6_i32 = arith.constant 6 : i32
    %261 = arith.index_cast %c6_i32 : i32 to index
    %c0_101 = arith.constant 0 : index
    %c0_102 = arith.constant 0 : index
    %262 = vector.load %arg10[%261, %c0_101, %c0_102] : memref<16x8x512xf32, #tpu.memory_space<vmem>>, vector<1x8x512xf32>
    %263 = vector.shape_cast %262 : vector<1x8x512xf32> to vector<8x512xf32>
    %264 = arith.truncf %256 : vector<8x128xf32> to vector<8x128xbf16>
    %cst_103 = arith.constant dense<0.000000e+00> : vector<8x512xf32>
    %265 = tpu.matmul %264, %12, %cst_103 {dimension_numbers = #tpu.dot_dimension_numbers<[1], [0], [0], [1], [0, 0, 1, 1], [], []>} : vector<8x128xbf16>, vector<128x512xbf16>, vector<8x512xf32> -> vector<8x512xf32>
    %266 = arith.addf %263, %265 : vector<8x512xf32>
    %267 = vector.extract_strided_slice %266 {offsets = [0, 0], sizes = [8, 128], strides = [1, 1]} : vector<8x512xf32> to vector<8x128xf32>
    %cst_104 = arith.constant 5.000000e-01 : f32
    %268 = vector.broadcast %cst_104 : f32 to vector<8x128xf32>
    %269 = arith.mulf %268, %267 : vector<8x128xf32>
    %270 = math.tanh %269 : vector<8x128xf32>
    %cst_105 = arith.constant 5.000000e-01 : f32
    %271 = vector.broadcast %cst_105 : f32 to vector<8x128xf32>
    %272 = arith.mulf %271, %270 : vector<8x128xf32>
    %cst_106 = arith.constant 5.000000e-01 : f32
    %273 = vector.broadcast %cst_106 : f32 to vector<8x128xf32>
    %274 = arith.addf %272, %273 : vector<8x128xf32>
    %275 = vector.extract_strided_slice %266 {offsets = [0, 128], sizes = [8, 128], strides = [1, 1]} : vector<8x512xf32> to vector<8x128xf32>
    %cst_107 = arith.constant 5.000000e-01 : f32
    %276 = vector.broadcast %cst_107 : f32 to vector<8x128xf32>
    %277 = arith.mulf %276, %275 : vector<8x128xf32>
    %278 = math.tanh %277 : vector<8x128xf32>
    %cst_108 = arith.constant 5.000000e-01 : f32
    %279 = vector.broadcast %cst_108 : f32 to vector<8x128xf32>
    %280 = arith.mulf %279, %278 : vector<8x128xf32>
    %cst_109 = arith.constant 5.000000e-01 : f32
    %281 = vector.broadcast %cst_109 : f32 to vector<8x128xf32>
    %282 = arith.addf %280, %281 : vector<8x128xf32>
    %283 = vector.extract_strided_slice %266 {offsets = [0, 256], sizes = [8, 128], strides = [1, 1]} : vector<8x512xf32> to vector<8x128xf32>
    %284 = math.tanh %283 : vector<8x128xf32>
    %285 = vector.extract_strided_slice %266 {offsets = [0, 384], sizes = [8, 128], strides = [1, 1]} : vector<8x512xf32> to vector<8x128xf32>
    %cst_110 = arith.constant 5.000000e-01 : f32
    %286 = vector.broadcast %cst_110 : f32 to vector<8x128xf32>
    %287 = arith.mulf %286, %285 : vector<8x128xf32>
    %288 = math.tanh %287 : vector<8x128xf32>
    %cst_111 = arith.constant 5.000000e-01 : f32
    %289 = vector.broadcast %cst_111 : f32 to vector<8x128xf32>
    %290 = arith.mulf %289, %288 : vector<8x128xf32>
    %cst_112 = arith.constant 5.000000e-01 : f32
    %291 = vector.broadcast %cst_112 : f32 to vector<8x128xf32>
    %292 = arith.addf %290, %291 : vector<8x128xf32>
    %293 = arith.mulf %282, %254 : vector<8x128xf32>
    %294 = arith.mulf %274, %284 : vector<8x128xf32>
    %295 = arith.addf %293, %294 : vector<8x128xf32>
    %296 = math.tanh %295 : vector<8x128xf32>
    %297 = arith.mulf %292, %296 : vector<8x128xf32>
    %298 = arith.index_cast %c6_i32 : i32 to index
    %c0_113 = arith.constant 0 : index
    %c0_114 = arith.constant 0 : index
    %299 = vector.load %arg11[%298, %c0_113, %c0_114] : memref<16x8x128xf32, #tpu.memory_space<vmem>>, vector<1x8x128xf32>
    %300 = vector.shape_cast %299 : vector<1x8x128xf32> to vector<8x128xf32>
    %301 = vector.shape_cast %297 : vector<8x128xf32> to vector<1x8x128xf32>
    tpu.vector_store %arg11[%298, %c0_113, %c0_114], %301 {strides = array<i32>} : memref<16x8x128xf32, #tpu.memory_space<vmem>>, vector<1x8x128xf32>,
    %c7_i32 = arith.constant 7 : i32
    %302 = arith.index_cast %c7_i32 : i32 to index
    %c0_115 = arith.constant 0 : index
    %c0_116 = arith.constant 0 : index
    %303 = vector.load %arg10[%302, %c0_115, %c0_116] : memref<16x8x512xf32, #tpu.memory_space<vmem>>, vector<1x8x512xf32>
    %304 = vector.shape_cast %303 : vector<1x8x512xf32> to vector<8x512xf32>
    %305 = arith.truncf %297 : vector<8x128xf32> to vector<8x128xbf16>
    %cst_117 = arith.constant dense<0.000000e+00> : vector<8x512xf32>
    %306 = tpu.matmul %305, %12, %cst_117 {dimension_numbers = #tpu.dot_dimension_numbers<[1], [0], [0], [1], [0, 0, 1, 1], [], []>} : vector<8x128xbf16>, vector<128x512xbf16>, vector<8x512xf32> -> vector<8x512xf32>
    %307 = arith.addf %304, %306 : vector<8x512xf32>
    %308 = vector.extract_strided_slice %307 {offsets = [0, 0], sizes = [8, 128], strides = [1, 1]} : vector<8x512xf32> to vector<8x128xf32>
    %cst_118 = arith.constant 5.000000e-01 : f32
    %309 = vector.broadcast %cst_118 : f32 to vector<8x128xf32>
    %310 = arith.mulf %309, %308 : vector<8x128xf32>
    %311 = math.tanh %310 : vector<8x128xf32>
    %cst_119 = arith.constant 5.000000e-01 : f32
    %312 = vector.broadcast %cst_119 : f32 to vector<8x128xf32>
    %313 = arith.mulf %312, %311 : vector<8x128xf32>
    %cst_120 = arith.constant 5.000000e-01 : f32
    %314 = vector.broadcast %cst_120 : f32 to vector<8x128xf32>
    %315 = arith.addf %313, %314 : vector<8x128xf32>
    %316 = vector.extract_strided_slice %307 {offsets = [0, 128], sizes = [8, 128], strides = [1, 1]} : vector<8x512xf32> to vector<8x128xf32>
    %cst_121 = arith.constant 5.000000e-01 : f32
    %317 = vector.broadcast %cst_121 : f32 to vector<8x128xf32>
    %318 = arith.mulf %317, %316 : vector<8x128xf32>
    %319 = math.tanh %318 : vector<8x128xf32>
    %cst_122 = arith.constant 5.000000e-01 : f32
    %320 = vector.broadcast %cst_122 : f32 to vector<8x128xf32>
    %321 = arith.mulf %320, %319 : vector<8x128xf32>
    %cst_123 = arith.constant 5.000000e-01 : f32
    %322 = vector.broadcast %cst_123 : f32 to vector<8x128xf32>
    %323 = arith.addf %321, %322 : vector<8x128xf32>
    %324 = vector.extract_strided_slice %307 {offsets = [0, 256], sizes = [8, 128], strides = [1, 1]} : vector<8x512xf32> to vector<8x128xf32>
    %325 = math.tanh %324 : vector<8x128xf32>
    %326 = vector.extract_strided_slice %307 {offsets = [0, 384], sizes = [8, 128], strides = [1, 1]} : vector<8x512xf32> to vector<8x128xf32>
    %cst_124 = arith.constant 5.000000e-01 : f32
    %327 = vector.broadcast %cst_124 : f32 to vector<8x128xf32>
    %328 = arith.mulf %327, %326 : vector<8x128xf32>
    %329 = math.tanh %328 : vector<8x128xf32>
    %cst_125 = arith.constant 5.000000e-01 : f32
    %330 = vector.broadcast %cst_125 : f32 to vector<8x128xf32>
    %331 = arith.mulf %330, %329 : vector<8x128xf32>
    %cst_126 = arith.constant 5.000000e-01 : f32
    %332 = vector.broadcast %cst_126 : f32 to vector<8x128xf32>
    %333 = arith.addf %331, %332 : vector<8x128xf32>
    %334 = arith.mulf %323, %295 : vector<8x128xf32>
    %335 = arith.mulf %315, %325 : vector<8x128xf32>
    %336 = arith.addf %334, %335 : vector<8x128xf32>
    %337 = math.tanh %336 : vector<8x128xf32>
    %338 = arith.mulf %333, %337 : vector<8x128xf32>
    %339 = arith.index_cast %c7_i32 : i32 to index
    %c0_127 = arith.constant 0 : index
    %c0_128 = arith.constant 0 : index
    %340 = vector.load %arg11[%339, %c0_127, %c0_128] : memref<16x8x128xf32, #tpu.memory_space<vmem>>, vector<1x8x128xf32>
    %341 = vector.shape_cast %340 : vector<1x8x128xf32> to vector<8x128xf32>
    %342 = vector.shape_cast %338 : vector<8x128xf32> to vector<1x8x128xf32>
    tpu.vector_store %arg11[%339, %c0_127, %c0_128], %342 {strides = array<i32>} : memref<16x8x128xf32, #tpu.memory_space<vmem>>, vector<1x8x128xf32>,
    %c8_i32 = arith.constant 8 : i32
    %343 = arith.index_cast %c8_i32 : i32 to index
    %c0_129 = arith.constant 0 : index
    %c0_130 = arith.constant 0 : index
    %344 = vector.load %arg10[%343, %c0_129, %c0_130] : memref<16x8x512xf32, #tpu.memory_space<vmem>>, vector<1x8x512xf32>
    %345 = vector.shape_cast %344 : vector<1x8x512xf32> to vector<8x512xf32>
    %346 = arith.truncf %338 : vector<8x128xf32> to vector<8x128xbf16>
    %cst_131 = arith.constant dense<0.000000e+00> : vector<8x512xf32>
    %347 = tpu.matmul %346, %12, %cst_131 {dimension_numbers = #tpu.dot_dimension_numbers<[1], [0], [0], [1], [0, 0, 1, 1], [], []>} : vector<8x128xbf16>, vector<128x512xbf16>, vector<8x512xf32> -> vector<8x512xf32>
    %348 = arith.addf %345, %347 : vector<8x512xf32>
    %349 = vector.extract_strided_slice %348 {offsets = [0, 0], sizes = [8, 128], strides = [1, 1]} : vector<8x512xf32> to vector<8x128xf32>
    %cst_132 = arith.constant 5.000000e-01 : f32
    %350 = vector.broadcast %cst_132 : f32 to vector<8x128xf32>
    %351 = arith.mulf %350, %349 : vector<8x128xf32>
    %352 = math.tanh %351 : vector<8x128xf32>
    %cst_133 = arith.constant 5.000000e-01 : f32
    %353 = vector.broadcast %cst_133 : f32 to vector<8x128xf32>
    %354 = arith.mulf %353, %352 : vector<8x128xf32>
    %cst_134 = arith.constant 5.000000e-01 : f32
    %355 = vector.broadcast %cst_134 : f32 to vector<8x128xf32>
    %356 = arith.addf %354, %355 : vector<8x128xf32>
    %357 = vector.extract_strided_slice %348 {offsets = [0, 128], sizes = [8, 128], strides = [1, 1]} : vector<8x512xf32> to vector<8x128xf32>
    %cst_135 = arith.constant 5.000000e-01 : f32
    %358 = vector.broadcast %cst_135 : f32 to vector<8x128xf32>
    %359 = arith.mulf %358, %357 : vector<8x128xf32>
    %360 = math.tanh %359 : vector<8x128xf32>
    %cst_136 = arith.constant 5.000000e-01 : f32
    %361 = vector.broadcast %cst_136 : f32 to vector<8x128xf32>
    %362 = arith.mulf %361, %360 : vector<8x128xf32>
    %cst_137 = arith.constant 5.000000e-01 : f32
    %363 = vector.broadcast %cst_137 : f32 to vector<8x128xf32>
    %364 = arith.addf %362, %363 : vector<8x128xf32>
    %365 = vector.extract_strided_slice %348 {offsets = [0, 256], sizes = [8, 128], strides = [1, 1]} : vector<8x512xf32> to vector<8x128xf32>
    %366 = math.tanh %365 : vector<8x128xf32>
    %367 = vector.extract_strided_slice %348 {offsets = [0, 384], sizes = [8, 128], strides = [1, 1]} : vector<8x512xf32> to vector<8x128xf32>
    %cst_138 = arith.constant 5.000000e-01 : f32
    %368 = vector.broadcast %cst_138 : f32 to vector<8x128xf32>
    %369 = arith.mulf %368, %367 : vector<8x128xf32>
    %370 = math.tanh %369 : vector<8x128xf32>
    %cst_139 = arith.constant 5.000000e-01 : f32
    %371 = vector.broadcast %cst_139 : f32 to vector<8x128xf32>
    %372 = arith.mulf %371, %370 : vector<8x128xf32>
    %cst_140 = arith.constant 5.000000e-01 : f32
    %373 = vector.broadcast %cst_140 : f32 to vector<8x128xf32>
    %374 = arith.addf %372, %373 : vector<8x128xf32>
    %375 = arith.mulf %364, %336 : vector<8x128xf32>
    %376 = arith.mulf %356, %366 : vector<8x128xf32>
    %377 = arith.addf %375, %376 : vector<8x128xf32>
    %378 = math.tanh %377 : vector<8x128xf32>
    %379 = arith.mulf %374, %378 : vector<8x128xf32>
    %380 = arith.index_cast %c8_i32 : i32 to index
    %c0_141 = arith.constant 0 : index
    %c0_142 = arith.constant 0 : index
    %381 = vector.load %arg11[%380, %c0_141, %c0_142] : memref<16x8x128xf32, #tpu.memory_space<vmem>>, vector<1x8x128xf32>
    %382 = vector.shape_cast %381 : vector<1x8x128xf32> to vector<8x128xf32>
    %383 = vector.shape_cast %379 : vector<8x128xf32> to vector<1x8x128xf32>
    tpu.vector_store %arg11[%380, %c0_141, %c0_142], %383 {strides = array<i32>} : memref<16x8x128xf32, #tpu.memory_space<vmem>>, vector<1x8x128xf32>,
    %c9_i32 = arith.constant 9 : i32
    %384 = arith.index_cast %c9_i32 : i32 to index
    %c0_143 = arith.constant 0 : index
    %c0_144 = arith.constant 0 : index
    %385 = vector.load %arg10[%384, %c0_143, %c0_144] : memref<16x8x512xf32, #tpu.memory_space<vmem>>, vector<1x8x512xf32>
    %386 = vector.shape_cast %385 : vector<1x8x512xf32> to vector<8x512xf32>
    %387 = arith.truncf %379 : vector<8x128xf32> to vector<8x128xbf16>
    %cst_145 = arith.constant dense<0.000000e+00> : vector<8x512xf32>
    %388 = tpu.matmul %387, %12, %cst_145 {dimension_numbers = #tpu.dot_dimension_numbers<[1], [0], [0], [1], [0, 0, 1, 1], [], []>} : vector<8x128xbf16>, vector<128x512xbf16>, vector<8x512xf32> -> vector<8x512xf32>
    %389 = arith.addf %386, %388 : vector<8x512xf32>
    %390 = vector.extract_strided_slice %389 {offsets = [0, 0], sizes = [8, 128], strides = [1, 1]} : vector<8x512xf32> to vector<8x128xf32>
    %cst_146 = arith.constant 5.000000e-01 : f32
    %391 = vector.broadcast %cst_146 : f32 to vector<8x128xf32>
    %392 = arith.mulf %391, %390 : vector<8x128xf32>
    %393 = math.tanh %392 : vector<8x128xf32>
    %cst_147 = arith.constant 5.000000e-01 : f32
    %394 = vector.broadcast %cst_147 : f32 to vector<8x128xf32>
    %395 = arith.mulf %394, %393 : vector<8x128xf32>
    %cst_148 = arith.constant 5.000000e-01 : f32
    %396 = vector.broadcast %cst_148 : f32 to vector<8x128xf32>
    %397 = arith.addf %395, %396 : vector<8x128xf32>
    %398 = vector.extract_strided_slice %389 {offsets = [0, 128], sizes = [8, 128], strides = [1, 1]} : vector<8x512xf32> to vector<8x128xf32>
    %cst_149 = arith.constant 5.000000e-01 : f32
    %399 = vector.broadcast %cst_149 : f32 to vector<8x128xf32>
    %400 = arith.mulf %399, %398 : vector<8x128xf32>
    %401 = math.tanh %400 : vector<8x128xf32>
    %cst_150 = arith.constant 5.000000e-01 : f32
    %402 = vector.broadcast %cst_150 : f32 to vector<8x128xf32>
    %403 = arith.mulf %402, %401 : vector<8x128xf32>
    %cst_151 = arith.constant 5.000000e-01 : f32
    %404 = vector.broadcast %cst_151 : f32 to vector<8x128xf32>
    %405 = arith.addf %403, %404 : vector<8x128xf32>
    %406 = vector.extract_strided_slice %389 {offsets = [0, 256], sizes = [8, 128], strides = [1, 1]} : vector<8x512xf32> to vector<8x128xf32>
    %407 = math.tanh %406 : vector<8x128xf32>
    %408 = vector.extract_strided_slice %389 {offsets = [0, 384], sizes = [8, 128], strides = [1, 1]} : vector<8x512xf32> to vector<8x128xf32>
    %cst_152 = arith.constant 5.000000e-01 : f32
    %409 = vector.broadcast %cst_152 : f32 to vector<8x128xf32>
    %410 = arith.mulf %409, %408 : vector<8x128xf32>
    %411 = math.tanh %410 : vector<8x128xf32>
    %cst_153 = arith.constant 5.000000e-01 : f32
    %412 = vector.broadcast %cst_153 : f32 to vector<8x128xf32>
    %413 = arith.mulf %412, %411 : vector<8x128xf32>
    %cst_154 = arith.constant 5.000000e-01 : f32
    %414 = vector.broadcast %cst_154 : f32 to vector<8x128xf32>
    %415 = arith.addf %413, %414 : vector<8x128xf32>
    %416 = arith.mulf %405, %377 : vector<8x128xf32>
    %417 = arith.mulf %397, %407 : vector<8x128xf32>
    %418 = arith.addf %416, %417 : vector<8x128xf32>
    %419 = math.tanh %418 : vector<8x128xf32>
    %420 = arith.mulf %415, %419 : vector<8x128xf32>
    %421 = arith.index_cast %c9_i32 : i32 to index
    %c0_155 = arith.constant 0 : index
    %c0_156 = arith.constant 0 : index
    %422 = vector.load %arg11[%421, %c0_155, %c0_156] : memref<16x8x128xf32, #tpu.memory_space<vmem>>, vector<1x8x128xf32>
    %423 = vector.shape_cast %422 : vector<1x8x128xf32> to vector<8x128xf32>
    %424 = vector.shape_cast %420 : vector<8x128xf32> to vector<1x8x128xf32>
    tpu.vector_store %arg11[%421, %c0_155, %c0_156], %424 {strides = array<i32>} : memref<16x8x128xf32, #tpu.memory_space<vmem>>, vector<1x8x128xf32>,
    %c10_i32 = arith.constant 10 : i32
    %425 = arith.index_cast %c10_i32 : i32 to index
    %c0_157 = arith.constant 0 : index
    %c0_158 = arith.constant 0 : index
    %426 = vector.load %arg10[%425, %c0_157, %c0_158] : memref<16x8x512xf32, #tpu.memory_space<vmem>>, vector<1x8x512xf32>
    %427 = vector.shape_cast %426 : vector<1x8x512xf32> to vector<8x512xf32>
    %428 = arith.truncf %420 : vector<8x128xf32> to vector<8x128xbf16>
    %cst_159 = arith.constant dense<0.000000e+00> : vector<8x512xf32>
    %429 = tpu.matmul %428, %12, %cst_159 {dimension_numbers = #tpu.dot_dimension_numbers<[1], [0], [0], [1], [0, 0, 1, 1], [], []>} : vector<8x128xbf16>, vector<128x512xbf16>, vector<8x512xf32> -> vector<8x512xf32>
    %430 = arith.addf %427, %429 : vector<8x512xf32>
    %431 = vector.extract_strided_slice %430 {offsets = [0, 0], sizes = [8, 128], strides = [1, 1]} : vector<8x512xf32> to vector<8x128xf32>
    %cst_160 = arith.constant 5.000000e-01 : f32
    %432 = vector.broadcast %cst_160 : f32 to vector<8x128xf32>
    %433 = arith.mulf %432, %431 : vector<8x128xf32>
    %434 = math.tanh %433 : vector<8x128xf32>
    %cst_161 = arith.constant 5.000000e-01 : f32
    %435 = vector.broadcast %cst_161 : f32 to vector<8x128xf32>
    %436 = arith.mulf %435, %434 : vector<8x128xf32>
    %cst_162 = arith.constant 5.000000e-01 : f32
    %437 = vector.broadcast %cst_162 : f32 to vector<8x128xf32>
    %438 = arith.addf %436, %437 : vector<8x128xf32>
    %439 = vector.extract_strided_slice %430 {offsets = [0, 128], sizes = [8, 128], strides = [1, 1]} : vector<8x512xf32> to vector<8x128xf32>
    %cst_163 = arith.constant 5.000000e-01 : f32
    %440 = vector.broadcast %cst_163 : f32 to vector<8x128xf32>
    %441 = arith.mulf %440, %439 : vector<8x128xf32>
    %442 = math.tanh %441 : vector<8x128xf32>
    %cst_164 = arith.constant 5.000000e-01 : f32
    %443 = vector.broadcast %cst_164 : f32 to vector<8x128xf32>
    %444 = arith.mulf %443, %442 : vector<8x128xf32>
    %cst_165 = arith.constant 5.000000e-01 : f32
    %445 = vector.broadcast %cst_165 : f32 to vector<8x128xf32>
    %446 = arith.addf %444, %445 : vector<8x128xf32>
    %447 = vector.extract_strided_slice %430 {offsets = [0, 256], sizes = [8, 128], strides = [1, 1]} : vector<8x512xf32> to vector<8x128xf32>
    %448 = math.tanh %447 : vector<8x128xf32>
    %449 = vector.extract_strided_slice %430 {offsets = [0, 384], sizes = [8, 128], strides = [1, 1]} : vector<8x512xf32> to vector<8x128xf32>
    %cst_166 = arith.constant 5.000000e-01 : f32
    %450 = vector.broadcast %cst_166 : f32 to vector<8x128xf32>
    %451 = arith.mulf %450, %449 : vector<8x128xf32>
    %452 = math.tanh %451 : vector<8x128xf32>
    %cst_167 = arith.constant 5.000000e-01 : f32
    %453 = vector.broadcast %cst_167 : f32 to vector<8x128xf32>
    %454 = arith.mulf %453, %452 : vector<8x128xf32>
    %cst_168 = arith.constant 5.000000e-01 : f32
    %455 = vector.broadcast %cst_168 : f32 to vector<8x128xf32>
    %456 = arith.addf %454, %455 : vector<8x128xf32>
    %457 = arith.mulf %446, %418 : vector<8x128xf32>
    %458 = arith.mulf %438, %448 : vector<8x128xf32>
    %459 = arith.addf %457, %458 : vector<8x128xf32>
    %460 = math.tanh %459 : vector<8x128xf32>
    %461 = arith.mulf %456, %460 : vector<8x128xf32>
    %462 = arith.index_cast %c10_i32 : i32 to index
    %c0_169 = arith.constant 0 : index
    %c0_170 = arith.constant 0 : index
    %463 = vector.load %arg11[%462, %c0_169, %c0_170] : memref<16x8x128xf32, #tpu.memory_space<vmem>>, vector<1x8x128xf32>
    %464 = vector.shape_cast %463 : vector<1x8x128xf32> to vector<8x128xf32>
    %465 = vector.shape_cast %461 : vector<8x128xf32> to vector<1x8x128xf32>
    tpu.vector_store %arg11[%462, %c0_169, %c0_170], %465 {strides = array<i32>} : memref<16x8x128xf32, #tpu.memory_space<vmem>>, vector<1x8x128xf32>,
    %c11_i32 = arith.constant 11 : i32
    %466 = arith.index_cast %c11_i32 : i32 to index
    %c0_171 = arith.constant 0 : index
    %c0_172 = arith.constant 0 : index
    %467 = vector.load %arg10[%466, %c0_171, %c0_172] : memref<16x8x512xf32, #tpu.memory_space<vmem>>, vector<1x8x512xf32>
    %468 = vector.shape_cast %467 : vector<1x8x512xf32> to vector<8x512xf32>
    %469 = arith.truncf %461 : vector<8x128xf32> to vector<8x128xbf16>
    %cst_173 = arith.constant dense<0.000000e+00> : vector<8x512xf32>
    %470 = tpu.matmul %469, %12, %cst_173 {dimension_numbers = #tpu.dot_dimension_numbers<[1], [0], [0], [1], [0, 0, 1, 1], [], []>} : vector<8x128xbf16>, vector<128x512xbf16>, vector<8x512xf32> -> vector<8x512xf32>
    %471 = arith.addf %468, %470 : vector<8x512xf32>
    %472 = vector.extract_strided_slice %471 {offsets = [0, 0], sizes = [8, 128], strides = [1, 1]} : vector<8x512xf32> to vector<8x128xf32>
    %cst_174 = arith.constant 5.000000e-01 : f32
    %473 = vector.broadcast %cst_174 : f32 to vector<8x128xf32>
    %474 = arith.mulf %473, %472 : vector<8x128xf32>
    %475 = math.tanh %474 : vector<8x128xf32>
    %cst_175 = arith.constant 5.000000e-01 : f32
    %476 = vector.broadcast %cst_175 : f32 to vector<8x128xf32>
    %477 = arith.mulf %476, %475 : vector<8x128xf32>
    %cst_176 = arith.constant 5.000000e-01 : f32
    %478 = vector.broadcast %cst_176 : f32 to vector<8x128xf32>
    %479 = arith.addf %477, %478 : vector<8x128xf32>
    %480 = vector.extract_strided_slice %471 {offsets = [0, 128], sizes = [8, 128], strides = [1, 1]} : vector<8x512xf32> to vector<8x128xf32>
    %cst_177 = arith.constant 5.000000e-01 : f32
    %481 = vector.broadcast %cst_177 : f32 to vector<8x128xf32>
    %482 = arith.mulf %481, %480 : vector<8x128xf32>
    %483 = math.tanh %482 : vector<8x128xf32>
    %cst_178 = arith.constant 5.000000e-01 : f32
    %484 = vector.broadcast %cst_178 : f32 to vector<8x128xf32>
    %485 = arith.mulf %484, %483 : vector<8x128xf32>
    %cst_179 = arith.constant 5.000000e-01 : f32
    %486 = vector.broadcast %cst_179 : f32 to vector<8x128xf32>
    %487 = arith.addf %485, %486 : vector<8x128xf32>
    %488 = vector.extract_strided_slice %471 {offsets = [0, 256], sizes = [8, 128], strides = [1, 1]} : vector<8x512xf32> to vector<8x128xf32>
    %489 = math.tanh %488 : vector<8x128xf32>
    %490 = vector.extract_strided_slice %471 {offsets = [0, 384], sizes = [8, 128], strides = [1, 1]} : vector<8x512xf32> to vector<8x128xf32>
    %cst_180 = arith.constant 5.000000e-01 : f32
    %491 = vector.broadcast %cst_180 : f32 to vector<8x128xf32>
    %492 = arith.mulf %491, %490 : vector<8x128xf32>
    %493 = math.tanh %492 : vector<8x128xf32>
    %cst_181 = arith.constant 5.000000e-01 : f32
    %494 = vector.broadcast %cst_181 : f32 to vector<8x128xf32>
    %495 = arith.mulf %494, %493 : vector<8x128xf32>
    %cst_182 = arith.constant 5.000000e-01 : f32
    %496 = vector.broadcast %cst_182 : f32 to vector<8x128xf32>
    %497 = arith.addf %495, %496 : vector<8x128xf32>
    %498 = arith.mulf %487, %459 : vector<8x128xf32>
    %499 = arith.mulf %479, %489 : vector<8x128xf32>
    %500 = arith.addf %498, %499 : vector<8x128xf32>
    %501 = math.tanh %500 : vector<8x128xf32>
    %502 = arith.mulf %497, %501 : vector<8x128xf32>
    %503 = arith.index_cast %c11_i32 : i32 to index
    %c0_183 = arith.constant 0 : index
    %c0_184 = arith.constant 0 : index
    %504 = vector.load %arg11[%503, %c0_183, %c0_184] : memref<16x8x128xf32, #tpu.memory_space<vmem>>, vector<1x8x128xf32>
    %505 = vector.shape_cast %504 : vector<1x8x128xf32> to vector<8x128xf32>
    %506 = vector.shape_cast %502 : vector<8x128xf32> to vector<1x8x128xf32>
    tpu.vector_store %arg11[%503, %c0_183, %c0_184], %506 {strides = array<i32>} : memref<16x8x128xf32, #tpu.memory_space<vmem>>, vector<1x8x128xf32>,
    %c12_i32 = arith.constant 12 : i32
    %507 = arith.index_cast %c12_i32 : i32 to index
    %c0_185 = arith.constant 0 : index
    %c0_186 = arith.constant 0 : index
    %508 = vector.load %arg10[%507, %c0_185, %c0_186] : memref<16x8x512xf32, #tpu.memory_space<vmem>>, vector<1x8x512xf32>
    %509 = vector.shape_cast %508 : vector<1x8x512xf32> to vector<8x512xf32>
    %510 = arith.truncf %502 : vector<8x128xf32> to vector<8x128xbf16>
    %cst_187 = arith.constant dense<0.000000e+00> : vector<8x512xf32>
    %511 = tpu.matmul %510, %12, %cst_187 {dimension_numbers = #tpu.dot_dimension_numbers<[1], [0], [0], [1], [0, 0, 1, 1], [], []>} : vector<8x128xbf16>, vector<128x512xbf16>, vector<8x512xf32> -> vector<8x512xf32>
    %512 = arith.addf %509, %511 : vector<8x512xf32>
    %513 = vector.extract_strided_slice %512 {offsets = [0, 0], sizes = [8, 128], strides = [1, 1]} : vector<8x512xf32> to vector<8x128xf32>
    %cst_188 = arith.constant 5.000000e-01 : f32
    %514 = vector.broadcast %cst_188 : f32 to vector<8x128xf32>
    %515 = arith.mulf %514, %513 : vector<8x128xf32>
    %516 = math.tanh %515 : vector<8x128xf32>
    %cst_189 = arith.constant 5.000000e-01 : f32
    %517 = vector.broadcast %cst_189 : f32 to vector<8x128xf32>
    %518 = arith.mulf %517, %516 : vector<8x128xf32>
    %cst_190 = arith.constant 5.000000e-01 : f32
    %519 = vector.broadcast %cst_190 : f32 to vector<8x128xf32>
    %520 = arith.addf %518, %519 : vector<8x128xf32>
    %521 = vector.extract_strided_slice %512 {offsets = [0, 128], sizes = [8, 128], strides = [1, 1]} : vector<8x512xf32> to vector<8x128xf32>
    %cst_191 = arith.constant 5.000000e-01 : f32
    %522 = vector.broadcast %cst_191 : f32 to vector<8x128xf32>
    %523 = arith.mulf %522, %521 : vector<8x128xf32>
    %524 = math.tanh %523 : vector<8x128xf32>
    %cst_192 = arith.constant 5.000000e-01 : f32
    %525 = vector.broadcast %cst_192 : f32 to vector<8x128xf32>
    %526 = arith.mulf %525, %524 : vector<8x128xf32>
    %cst_193 = arith.constant 5.000000e-01 : f32
    %527 = vector.broadcast %cst_193 : f32 to vector<8x128xf32>
    %528 = arith.addf %526, %527 : vector<8x128xf32>
    %529 = vector.extract_strided_slice %512 {offsets = [0, 256], sizes = [8, 128], strides = [1, 1]} : vector<8x512xf32> to vector<8x128xf32>
    %530 = math.tanh %529 : vector<8x128xf32>
    %531 = vector.extract_strided_slice %512 {offsets = [0, 384], sizes = [8, 128], strides = [1, 1]} : vector<8x512xf32> to vector<8x128xf32>
    %cst_194 = arith.constant 5.000000e-01 : f32
    %532 = vector.broadcast %cst_194 : f32 to vector<8x128xf32>
    %533 = arith.mulf %532, %531 : vector<8x128xf32>
    %534 = math.tanh %533 : vector<8x128xf32>
    %cst_195 = arith.constant 5.000000e-01 : f32
    %535 = vector.broadcast %cst_195 : f32 to vector<8x128xf32>
    %536 = arith.mulf %535, %534 : vector<8x128xf32>
    %cst_196 = arith.constant 5.000000e-01 : f32
    %537 = vector.broadcast %cst_196 : f32 to vector<8x128xf32>
    %538 = arith.addf %536, %537 : vector<8x128xf32>
    %539 = arith.mulf %528, %500 : vector<8x128xf32>
    %540 = arith.mulf %520, %530 : vector<8x128xf32>
    %541 = arith.addf %539, %540 : vector<8x128xf32>
    %542 = math.tanh %541 : vector<8x128xf32>
    %543 = arith.mulf %538, %542 : vector<8x128xf32>
    %544 = arith.index_cast %c12_i32 : i32 to index
    %c0_197 = arith.constant 0 : index
    %c0_198 = arith.constant 0 : index
    %545 = vector.load %arg11[%544, %c0_197, %c0_198] : memref<16x8x128xf32, #tpu.memory_space<vmem>>, vector<1x8x128xf32>
    %546 = vector.shape_cast %545 : vector<1x8x128xf32> to vector<8x128xf32>
    %547 = vector.shape_cast %543 : vector<8x128xf32> to vector<1x8x128xf32>
    tpu.vector_store %arg11[%544, %c0_197, %c0_198], %547 {strides = array<i32>} : memref<16x8x128xf32, #tpu.memory_space<vmem>>, vector<1x8x128xf32>,
    %c13_i32 = arith.constant 13 : i32
    %548 = arith.index_cast %c13_i32 : i32 to index
    %c0_199 = arith.constant 0 : index
    %c0_200 = arith.constant 0 : index
    %549 = vector.load %arg10[%548, %c0_199, %c0_200] : memref<16x8x512xf32, #tpu.memory_space<vmem>>, vector<1x8x512xf32>
    %550 = vector.shape_cast %549 : vector<1x8x512xf32> to vector<8x512xf32>
    %551 = arith.truncf %543 : vector<8x128xf32> to vector<8x128xbf16>
    %cst_201 = arith.constant dense<0.000000e+00> : vector<8x512xf32>
    %552 = tpu.matmul %551, %12, %cst_201 {dimension_numbers = #tpu.dot_dimension_numbers<[1], [0], [0], [1], [0, 0, 1, 1], [], []>} : vector<8x128xbf16>, vector<128x512xbf16>, vector<8x512xf32> -> vector<8x512xf32>
    %553 = arith.addf %550, %552 : vector<8x512xf32>
    %554 = vector.extract_strided_slice %553 {offsets = [0, 0], sizes = [8, 128], strides = [1, 1]} : vector<8x512xf32> to vector<8x128xf32>
    %cst_202 = arith.constant 5.000000e-01 : f32
    %555 = vector.broadcast %cst_202 : f32 to vector<8x128xf32>
    %556 = arith.mulf %555, %554 : vector<8x128xf32>
    %557 = math.tanh %556 : vector<8x128xf32>
    %cst_203 = arith.constant 5.000000e-01 : f32
    %558 = vector.broadcast %cst_203 : f32 to vector<8x128xf32>
    %559 = arith.mulf %558, %557 : vector<8x128xf32>
    %cst_204 = arith.constant 5.000000e-01 : f32
    %560 = vector.broadcast %cst_204 : f32 to vector<8x128xf32>
    %561 = arith.addf %559, %560 : vector<8x128xf32>
    %562 = vector.extract_strided_slice %553 {offsets = [0, 128], sizes = [8, 128], strides = [1, 1]} : vector<8x512xf32> to vector<8x128xf32>
    %cst_205 = arith.constant 5.000000e-01 : f32
    %563 = vector.broadcast %cst_205 : f32 to vector<8x128xf32>
    %564 = arith.mulf %563, %562 : vector<8x128xf32>
    %565 = math.tanh %564 : vector<8x128xf32>
    %cst_206 = arith.constant 5.000000e-01 : f32
    %566 = vector.broadcast %cst_206 : f32 to vector<8x128xf32>
    %567 = arith.mulf %566, %565 : vector<8x128xf32>
    %cst_207 = arith.constant 5.000000e-01 : f32
    %568 = vector.broadcast %cst_207 : f32 to vector<8x128xf32>
    %569 = arith.addf %567, %568 : vector<8x128xf32>
    %570 = vector.extract_strided_slice %553 {offsets = [0, 256], sizes = [8, 128], strides = [1, 1]} : vector<8x512xf32> to vector<8x128xf32>
    %571 = math.tanh %570 : vector<8x128xf32>
    %572 = vector.extract_strided_slice %553 {offsets = [0, 384], sizes = [8, 128], strides = [1, 1]} : vector<8x512xf32> to vector<8x128xf32>
    %cst_208 = arith.constant 5.000000e-01 : f32
    %573 = vector.broadcast %cst_208 : f32 to vector<8x128xf32>
    %574 = arith.mulf %573, %572 : vector<8x128xf32>
    %575 = math.tanh %574 : vector<8x128xf32>
    %cst_209 = arith.constant 5.000000e-01 : f32
    %576 = vector.broadcast %cst_209 : f32 to vector<8x128xf32>
    %577 = arith.mulf %576, %575 : vector<8x128xf32>
    %cst_210 = arith.constant 5.000000e-01 : f32
    %578 = vector.broadcast %cst_210 : f32 to vector<8x128xf32>
    %579 = arith.addf %577, %578 : vector<8x128xf32>
    %580 = arith.mulf %569, %541 : vector<8x128xf32>
    %581 = arith.mulf %561, %571 : vector<8x128xf32>
    %582 = arith.addf %580, %581 : vector<8x128xf32>
    %583 = math.tanh %582 : vector<8x128xf32>
    %584 = arith.mulf %579, %583 : vector<8x128xf32>
    %585 = arith.index_cast %c13_i32 : i32 to index
    %c0_211 = arith.constant 0 : index
    %c0_212 = arith.constant 0 : index
    %586 = vector.load %arg11[%585, %c0_211, %c0_212] : memref<16x8x128xf32, #tpu.memory_space<vmem>>, vector<1x8x128xf32>
    %587 = vector.shape_cast %586 : vector<1x8x128xf32> to vector<8x128xf32>
    %588 = vector.shape_cast %584 : vector<8x128xf32> to vector<1x8x128xf32>
    tpu.vector_store %arg11[%585, %c0_211, %c0_212], %588 {strides = array<i32>} : memref<16x8x128xf32, #tpu.memory_space<vmem>>, vector<1x8x128xf32>,
    %c14_i32 = arith.constant 14 : i32
    %589 = arith.index_cast %c14_i32 : i32 to index
    %c0_213 = arith.constant 0 : index
    %c0_214 = arith.constant 0 : index
    %590 = vector.load %arg10[%589, %c0_213, %c0_214] : memref<16x8x512xf32, #tpu.memory_space<vmem>>, vector<1x8x512xf32>
    %591 = vector.shape_cast %590 : vector<1x8x512xf32> to vector<8x512xf32>
    %592 = arith.truncf %584 : vector<8x128xf32> to vector<8x128xbf16>
    %cst_215 = arith.constant dense<0.000000e+00> : vector<8x512xf32>
    %593 = tpu.matmul %592, %12, %cst_215 {dimension_numbers = #tpu.dot_dimension_numbers<[1], [0], [0], [1], [0, 0, 1, 1], [], []>} : vector<8x128xbf16>, vector<128x512xbf16>, vector<8x512xf32> -> vector<8x512xf32>
    %594 = arith.addf %591, %593 : vector<8x512xf32>
    %595 = vector.extract_strided_slice %594 {offsets = [0, 0], sizes = [8, 128], strides = [1, 1]} : vector<8x512xf32> to vector<8x128xf32>
    %cst_216 = arith.constant 5.000000e-01 : f32
    %596 = vector.broadcast %cst_216 : f32 to vector<8x128xf32>
    %597 = arith.mulf %596, %595 : vector<8x128xf32>
    %598 = math.tanh %597 : vector<8x128xf32>
    %cst_217 = arith.constant 5.000000e-01 : f32
    %599 = vector.broadcast %cst_217 : f32 to vector<8x128xf32>
    %600 = arith.mulf %599, %598 : vector<8x128xf32>
    %cst_218 = arith.constant 5.000000e-01 : f32
    %601 = vector.broadcast %cst_218 : f32 to vector<8x128xf32>
    %602 = arith.addf %600, %601 : vector<8x128xf32>
    %603 = vector.extract_strided_slice %594 {offsets = [0, 128], sizes = [8, 128], strides = [1, 1]} : vector<8x512xf32> to vector<8x128xf32>
    %cst_219 = arith.constant 5.000000e-01 : f32
    %604 = vector.broadcast %cst_219 : f32 to vector<8x128xf32>
    %605 = arith.mulf %604, %603 : vector<8x128xf32>
    %606 = math.tanh %605 : vector<8x128xf32>
    %cst_220 = arith.constant 5.000000e-01 : f32
    %607 = vector.broadcast %cst_220 : f32 to vector<8x128xf32>
    %608 = arith.mulf %607, %606 : vector<8x128xf32>
    %cst_221 = arith.constant 5.000000e-01 : f32
    %609 = vector.broadcast %cst_221 : f32 to vector<8x128xf32>
    %610 = arith.addf %608, %609 : vector<8x128xf32>
    %611 = vector.extract_strided_slice %594 {offsets = [0, 256], sizes = [8, 128], strides = [1, 1]} : vector<8x512xf32> to vector<8x128xf32>
    %612 = math.tanh %611 : vector<8x128xf32>
    %613 = vector.extract_strided_slice %594 {offsets = [0, 384], sizes = [8, 128], strides = [1, 1]} : vector<8x512xf32> to vector<8x128xf32>
    %cst_222 = arith.constant 5.000000e-01 : f32
    %614 = vector.broadcast %cst_222 : f32 to vector<8x128xf32>
    %615 = arith.mulf %614, %613 : vector<8x128xf32>
    %616 = math.tanh %615 : vector<8x128xf32>
    %cst_223 = arith.constant 5.000000e-01 : f32
    %617 = vector.broadcast %cst_223 : f32 to vector<8x128xf32>
    %618 = arith.mulf %617, %616 : vector<8x128xf32>
    %cst_224 = arith.constant 5.000000e-01 : f32
    %619 = vector.broadcast %cst_224 : f32 to vector<8x128xf32>
    %620 = arith.addf %618, %619 : vector<8x128xf32>
    %621 = arith.mulf %610, %582 : vector<8x128xf32>
    %622 = arith.mulf %602, %612 : vector<8x128xf32>
    %623 = arith.addf %621, %622 : vector<8x128xf32>
    %624 = math.tanh %623 : vector<8x128xf32>
    %625 = arith.mulf %620, %624 : vector<8x128xf32>
    %626 = arith.index_cast %c14_i32 : i32 to index
    %c0_225 = arith.constant 0 : index
    %c0_226 = arith.constant 0 : index
    %627 = vector.load %arg11[%626, %c0_225, %c0_226] : memref<16x8x128xf32, #tpu.memory_space<vmem>>, vector<1x8x128xf32>
    %628 = vector.shape_cast %627 : vector<1x8x128xf32> to vector<8x128xf32>
    %629 = vector.shape_cast %625 : vector<8x128xf32> to vector<1x8x128xf32>
    tpu.vector_store %arg11[%626, %c0_225, %c0_226], %629 {strides = array<i32>} : memref<16x8x128xf32, #tpu.memory_space<vmem>>, vector<1x8x128xf32>,
    %c15_i32 = arith.constant 15 : i32
    %630 = arith.index_cast %c15_i32 : i32 to index
    %c0_227 = arith.constant 0 : index
    %c0_228 = arith.constant 0 : index
    %631 = vector.load %arg10[%630, %c0_227, %c0_228] : memref<16x8x512xf32, #tpu.memory_space<vmem>>, vector<1x8x512xf32>
    %632 = vector.shape_cast %631 : vector<1x8x512xf32> to vector<8x512xf32>
    %633 = arith.truncf %625 : vector<8x128xf32> to vector<8x128xbf16>
    %cst_229 = arith.constant dense<0.000000e+00> : vector<8x512xf32>
    %634 = tpu.matmul %633, %12, %cst_229 {dimension_numbers = #tpu.dot_dimension_numbers<[1], [0], [0], [1], [0, 0, 1, 1], [], []>} : vector<8x128xbf16>, vector<128x512xbf16>, vector<8x512xf32> -> vector<8x512xf32>
    %635 = arith.addf %632, %634 : vector<8x512xf32>
    %636 = vector.extract_strided_slice %635 {offsets = [0, 0], sizes = [8, 128], strides = [1, 1]} : vector<8x512xf32> to vector<8x128xf32>
    %cst_230 = arith.constant 5.000000e-01 : f32
    %637 = vector.broadcast %cst_230 : f32 to vector<8x128xf32>
    %638 = arith.mulf %637, %636 : vector<8x128xf32>
    %639 = math.tanh %638 : vector<8x128xf32>
    %cst_231 = arith.constant 5.000000e-01 : f32
    %640 = vector.broadcast %cst_231 : f32 to vector<8x128xf32>
    %641 = arith.mulf %640, %639 : vector<8x128xf32>
    %cst_232 = arith.constant 5.000000e-01 : f32
    %642 = vector.broadcast %cst_232 : f32 to vector<8x128xf32>
    %643 = arith.addf %641, %642 : vector<8x128xf32>
    %644 = vector.extract_strided_slice %635 {offsets = [0, 128], sizes = [8, 128], strides = [1, 1]} : vector<8x512xf32> to vector<8x128xf32>
    %cst_233 = arith.constant 5.000000e-01 : f32
    %645 = vector.broadcast %cst_233 : f32 to vector<8x128xf32>
    %646 = arith.mulf %645, %644 : vector<8x128xf32>
    %647 = math.tanh %646 : vector<8x128xf32>
    %cst_234 = arith.constant 5.000000e-01 : f32
    %648 = vector.broadcast %cst_234 : f32 to vector<8x128xf32>
    %649 = arith.mulf %648, %647 : vector<8x128xf32>
    %cst_235 = arith.constant 5.000000e-01 : f32
    %650 = vector.broadcast %cst_235 : f32 to vector<8x128xf32>
    %651 = arith.addf %649, %650 : vector<8x128xf32>
    %652 = vector.extract_strided_slice %635 {offsets = [0, 256], sizes = [8, 128], strides = [1, 1]} : vector<8x512xf32> to vector<8x128xf32>
    %653 = math.tanh %652 : vector<8x128xf32>
    %654 = vector.extract_strided_slice %635 {offsets = [0, 384], sizes = [8, 128], strides = [1, 1]} : vector<8x512xf32> to vector<8x128xf32>
    %cst_236 = arith.constant 5.000000e-01 : f32
    %655 = vector.broadcast %cst_236 : f32 to vector<8x128xf32>
    %656 = arith.mulf %655, %654 : vector<8x128xf32>
    %657 = math.tanh %656 : vector<8x128xf32>
    %cst_237 = arith.constant 5.000000e-01 : f32
    %658 = vector.broadcast %cst_237 : f32 to vector<8x128xf32>
    %659 = arith.mulf %658, %657 : vector<8x128xf32>
    %cst_238 = arith.constant 5.000000e-01 : f32
    %660 = vector.broadcast %cst_238 : f32 to vector<8x128xf32>
    %661 = arith.addf %659, %660 : vector<8x128xf32>
    %662 = arith.mulf %651, %623 : vector<8x128xf32>
    %663 = arith.mulf %643, %653 : vector<8x128xf32>
    %664 = arith.addf %662, %663 : vector<8x128xf32>
    %665 = math.tanh %664 : vector<8x128xf32>
    %666 = arith.mulf %661, %665 : vector<8x128xf32>
    %667 = arith.index_cast %c15_i32 : i32 to index
    %c0_239 = arith.constant 0 : index
    %c0_240 = arith.constant 0 : index
    %668 = vector.load %arg11[%667, %c0_239, %c0_240] : memref<16x8x128xf32, #tpu.memory_space<vmem>>, vector<1x8x128xf32>
    %669 = vector.shape_cast %668 : vector<1x8x128xf32> to vector<8x128xf32>
    %670 = vector.shape_cast %666 : vector<8x128xf32> to vector<1x8x128xf32>
    tpu.vector_store %arg11[%667, %c0_239, %c0_240], %670 {strides = array<i32>} : memref<16x8x128xf32, #tpu.memory_space<vmem>>, vector<1x8x128xf32>,
    %c16_i32 = arith.constant 16 : i32
    %c0_241 = arith.constant 0 : index
    %c0_242 = arith.constant 0 : index
    %671 = vector.load %arg12[%c0_241, %c0_242] : memref<8x128xf32, #tpu.memory_space<vmem>>, vector<8x128xf32>
    tpu.vector_store %arg12[%c0_241, %c0_242], %666 {strides = array<i32>} : memref<8x128xf32, #tpu.memory_space<vmem>>, vector<8x128xf32>,
    %c0_243 = arith.constant 0 : index
    %c0_244 = arith.constant 0 : index
    %672 = vector.load %arg13[%c0_243, %c0_244] : memref<8x128xf32, #tpu.memory_space<vmem>>, vector<8x128xf32>
    tpu.vector_store %arg13[%c0_243, %c0_244], %664 {strides = array<i32>} : memref<8x128xf32, #tpu.memory_space<vmem>>, vector<8x128xf32>,
    %c0_245 = arith.constant 0 : index
    %c0_246 = arith.constant 0 : index
    %c0_247 = arith.constant 0 : index
    %673 = vector.load %arg11[%c0_245, %c0_246, %c0_247] : memref<16x8x128xf32, #tpu.memory_space<vmem>>, vector<16x8x128xf32>
    %674 = arith.truncf %673 : vector<16x8x128xf32> to vector<16x8x128xbf16>
    %c0_248 = arith.constant 0 : index
    %c0_249 = arith.constant 0 : index
    %c0_250 = arith.constant 0 : index
    %675 = vector.load %arg7[%c0_248, %c0_249, %c0_250] : memref<16x8x128xbf16, #tpu.memory_space<vmem>>, vector<16x8x128xbf16>
    tpu.vector_store %arg7[%c0_248, %c0_249, %c0_250], %674 {strides = array<i32>} : memref<16x8x128xbf16, #tpu.memory_space<vmem>>, vector<16x8x128xbf16>,
    %c0_251 = arith.constant 0 : index
    %c0_252 = arith.constant 0 : index
    %676 = vector.load %arg8[%c0_251, %c0_252] : memref<8x128xf32, #tpu.memory_space<vmem>>, vector<8x128xf32>
    tpu.vector_store %arg8[%c0_251, %c0_252], %666 {strides = array<i32>} : memref<8x128xf32, #tpu.memory_space<vmem>>, vector<8x128xf32>,
    %c0_253 = arith.constant 0 : index
    %c0_254 = arith.constant 0 : index
    %677 = vector.load %arg9[%c0_253, %c0_254] : memref<8x128xf32, #tpu.memory_space<vmem>>, vector<8x128xf32>
    tpu.vector_store %arg9[%c0_253, %c0_254], %664 {strides = array<i32>} : memref<8x128xf32, #tpu.memory_space<vmem>>, vector<8x128xf32>,
    return
  }
  func.func @transform_0(%arg0: i32) -> (i32, i32, i32) {
    %c0_i32 = arith.constant 0 : i32
    %c0_i32_0 = arith.constant 0 : i32
    %c0_i32_1 = arith.constant 0 : i32
    return %arg0, %c0_i32, %c0_i32_0 : i32, i32, i32
  }
  func.func @transform_1(%arg0: i32) -> (i32, i32) {
    %c0_i32 = arith.constant 0 : i32
    %c0_i32_0 = arith.constant 0 : i32
    %c0_i32_1 = arith.constant 0 : i32
    return %c0_i32, %c0_i32_0 : i32, i32
  }
  func.func @transform_2(%arg0: i32) -> (i32, i32) {
    %c0_i32 = arith.constant 0 : i32
    %c0_i32_0 = arith.constant 0 : i32
    %c0_i32_1 = arith.constant 0 : i32
    return %c0_i32, %c0_i32_0 : i32, i32
  }
  func.func @transform_3(%arg0: i32) -> (i32, i32) {
    %c0_i32 = arith.constant 0 : i32
    %c0_i32_0 = arith.constant 0 : i32
    %c0_i32_1 = arith.constant 0 : i32
    return %c0_i32, %c0_i32_0 : i32, i32
  }
  func.func @transform_4(%arg0: i32) -> (i32, i32) {
    %c0_i32 = arith.constant 0 : i32
    %c0_i32_0 = arith.constant 0 : i32
    %c0_i32_1 = arith.constant 0 : i32
    return %c0_i32, %c0_i32_0 : i32, i32
  }
  func.func @transform_5(%arg0: i32) -> (i32, i32) {
    %c0_i32 = arith.constant 0 : i32
    %c0_i32_0 = arith.constant 0 : i32
    %c0_i32_1 = arith.constant 0 : i32
    return %c0_i32, %c0_i32_0 : i32, i32
  }
  func.func @transform_6(%arg0: i32) -> (i32, i32, i32) {
    %c0_i32 = arith.constant 0 : i32
    %c0_i32_0 = arith.constant 0 : i32
    %c0_i32_1 = arith.constant 0 : i32
    return %arg0, %c0_i32, %c0_i32_0 : i32, i32, i32
  }
  func.func @transform_7(%arg0: i32) -> (i32, i32) {
    %c0_i32 = arith.constant 0 : i32
    %c0_i32_0 = arith.constant 0 : i32
    %c0_i32_1 = arith.constant 0 : i32
    return %c0_i32, %c0_i32_0 : i32, i32
  }
  func.func @transform_8(%arg0: i32) -> (i32, i32) {
    %c0_i32 = arith.constant 0 : i32
    %c0_i32_0 = arith.constant 0 : i32
    %c0_i32_1 = arith.constant 0 : i32
    return %c0_i32, %c0_i32_0 : i32, i32
  }
}

module attributes {stable_mosaic.version = 11 : i64} {
  func.func @_matmul_bias_kernel(%arg0: i32, %arg1: i32, %arg2: memref<256x128xbf16, #tpu.memory_space<vmem>>, %arg3: memref<128x256xbf16, #tpu.memory_space<vmem>>, %arg4: memref<1x256xf32, #tpu.memory_space<vmem>>, %arg5: memref<256x256xf32, #tpu.memory_space<vmem>>) attributes {dimension_semantics = [#tpu.dimension_semantics<parallel>, #tpu.dimension_semantics<parallel>], iteration_bounds = array<i64: 1, 1>, scalar_prefetch = 0 : i64, scratch_operands = 0 : i64, tpu.core_type = #tpu.core_type<tc>, window_params = [{transform_indices = @transform_0, window_bounds = array<i64: 256, 128>}, {transform_indices = @transform_1, window_bounds = array<i64: 128, 256>}, {transform_indices = @transform_2, window_bounds = array<i64: 1, 256>}, {transform_indices = @transform_3, window_bounds = array<i64: 256, 256>}]} {
    %c0 = arith.constant 0 : index
    %c0_0 = arith.constant 0 : index
    %0 = vector.load %arg2[%c0, %c0_0] : memref<256x128xbf16, #tpu.memory_space<vmem>>, vector<256x128xbf16>
    %c0_1 = arith.constant 0 : index
    %c0_2 = arith.constant 0 : index
    %1 = vector.load %arg3[%c0_1, %c0_2] : memref<128x256xbf16, #tpu.memory_space<vmem>>, vector<128x256xbf16>
    %cst = arith.constant dense<0.000000e+00> : vector<256x256xf32>
    %2 = tpu.matmul %0, %1, %cst {dimension_numbers = #tpu.dot_dimension_numbers<[1], [0], [0], [1], [0, 0, 1, 1], [], []>} : vector<256x128xbf16>, vector<128x256xbf16>, vector<256x256xf32> -> vector<256x256xf32>
    %c0_3 = arith.constant 0 : index
    %c0_4 = arith.constant 0 : index
    %3 = vector.load %arg4[%c0_3, %c0_4] : memref<1x256xf32, #tpu.memory_space<vmem>>, vector<1x256xf32>
    %4 = vector.broadcast %3 : vector<1x256xf32> to vector<256x256xf32>
    %5 = arith.addf %2, %4 : vector<256x256xf32>
    %c0_5 = arith.constant 0 : index
    %c0_6 = arith.constant 0 : index
    %6 = vector.load %arg5[%c0_5, %c0_6] : memref<256x256xf32, #tpu.memory_space<vmem>>, vector<256x256xf32>
    tpu.vector_store %arg5[%c0_5, %c0_6], %5 {strides = array<i32>} : memref<256x256xf32, #tpu.memory_space<vmem>>, vector<256x256xf32>,
    return
  }
  func.func @transform_0(%arg0: i32, %arg1: i32) -> (i32, i32) {
    %c0_i32 = arith.constant 0 : i32
    %c0_i32_0 = arith.constant 0 : i32
    return %arg1, %c0_i32 : i32, i32
  }
  func.func @transform_1(%arg0: i32, %arg1: i32) -> (i32, i32) {
    %c0_i32 = arith.constant 0 : i32
    %c0_i32_0 = arith.constant 0 : i32
    return %c0_i32, %arg0 : i32, i32
  }
  func.func @transform_2(%arg0: i32, %arg1: i32) -> (i32, i32) {
    %c0_i32 = arith.constant 0 : i32
    %c0_i32_0 = arith.constant 0 : i32
    return %c0_i32, %arg0 : i32, i32
  }
  func.func @transform_3(%arg0: i32, %arg1: i32) -> (i32, i32) {
    %c0_i32 = arith.constant 0 : i32
    return %arg1, %arg0 : i32, i32
  }
}

</mosaic_0001>

<bundles_post_ra>
// kernel: rnnlm_forward.3
= control target key start
LH: loop header
LB: loop body
LE: loop exit
PB: predicated region body
PF: predicated region fallthrough
CT: control target
= control target key end

     0   :  { %v641_v2 = vmov 0   ;;  %s860_s0 = inlined_call_operand.vmem [shape: bf16[256,128], index: 0, kind: input, shape index: {}]   ;;  %s861_s1 = inlined_call_operand.vmem [shape: bf16[128,256], index: 1, kind: input, shape index: {}]   ;;  %s862_s2 = inlined_call_operand.vmem [shape: f32[1,256], index: 2, kind: input, shape index: {}]   ;;  %s863_s3 = inlined_call_operand.hbm [shape: f32[256,256], index: 3, kind: output, shape index: {}]  }
   0x1   :  { %v577_v0 = vld [vmem:[%s861_s1 + $0x4] ss:$8 sps:$4 sm:$0xff]   ;;  %v579_v1 = vld [vmem:[%s861_s1] ss:$8 sps:$4 sm:$0xff]   ;;  %284 = vmatprep.mubr.bf16.mxu0 %v641_v2  ;;  %364 = vmatprep.mubr.bf16.mxu1 %v641_v2  ;;  %v580_v3 = vld [vmem:[%s861_s1 + $0x14] ss:$8 sps:$4 sm:$0xff]  }
   0x2   :  { %252 = vmatprep.subr.bf16.mxu0 %v577_v0  ;;  %557 = vmatprep.subr.bf16.mxu1 %v577_v0  ;;  %v582_v4 = vld [vmem:[%s861_s1 + $0x10] ss:$8 sps:$4 sm:$0xff]   ;;  %v583_v5 = vld [vmem:[%s861_s1 + $0x24] ss:$8 sps:$4 sm:$0xff]   ;;  %v585_v6 = vld [vmem:[%s861_s1 + $0x20] ss:$8 sps:$4 sm:$0xff]  }
   0x3   :  { %253 = vmatpush1.bf16.msra.mxu0 %v579_v1  ;;  %565 = vmatpush1.bf16.msra.mxu1 %v579_v1  ;;  %v586_v7 = vld [vmem:[%s861_s1 + $0x34] ss:$8 sps:$4 sm:$0xff]   ;;  %v588_v8 = vld [vmem:[%s861_s1 + $0x30] ss:$8 sps:$4 sm:$0xff]   ;;  %v589_v9 = vld [vmem:[%s861_s1 + $0x44] ss:$8 sps:$4 sm:$0xff]  }
   0x4   :  { %254 = vmatprep.subr.bf16.mxu0 %v580_v3  ;;  %558 = vmatprep.subr.bf16.mxu1 %v580_v3  ;;  %v591_v10 = vld [vmem:[%s861_s1 + $0x40] ss:$8 sps:$4 sm:$0xff]   ;;  %v592_v11 = vld [vmem:[%s861_s1 + $0x54] ss:$8 sps:$4 sm:$0xff]   ;;  %v594_v12 = vld [vmem:[%s861_s1 + $0x50] ss:$8 sps:$4 sm:$0xff]  }
   0x5   :  { %v595_v13 = vld [vmem:[%s861_s1 + $0x64] ss:$8 sps:$4 sm:$0xff]   ;;  %v597_v14 = vld [vmem:[%s861_s1 + $0x60] ss:$8 sps:$4 sm:$0xff]   ;;  %v598_v15 = vld [vmem:[%s861_s1 + $0x74] ss:$8 sps:$4 sm:$0xff]  }
   0x6   :  { %v600_v16 = vld [vmem:[%s861_s1 + $0x70] ss:$8 sps:$4 sm:$0xff]  }
   0x7   :  { %255 = vmatpush1.bf16.msra.mxu0 %v582_v4  ;;  %566 = vmatpush1.bf16.msra.mxu1 %v582_v4 }
   0x8   :  { %256 = vmatprep.subr.bf16.mxu0 %v583_v5  ;;  %559 = vmatprep.subr.bf16.mxu1 %v583_v5 }
   0xb   :  { %257 = vmatpush1.bf16.msra.mxu0 %v585_v6  ;;  %567 = vmatpush1.bf16.msra.mxu1 %v585_v6 }
   0xc   :  { %258 = vmatprep.subr.bf16.mxu0 %v586_v7  ;;  %560 = vmatprep.subr.bf16.mxu1 %v586_v7 }
   0xf   :  { %259 = vmatpush1.bf16.msra.mxu0 %v588_v8  ;;  %568 = vmatpush1.bf16.msra.mxu1 %v588_v8 }
  0x10   :  { %260 = vmatprep.subr.bf16.mxu0 %v589_v9  ;;  %561 = vmatprep.subr.bf16.mxu1 %v589_v9 }
  0x13   :  { %261 = vmatpush1.bf16.msra.mxu0 %v591_v10  ;;  %569 = vmatpush1.bf16.msra.mxu1 %v591_v10 }
  0x14   :  { %262 = vmatprep.subr.bf16.mxu0 %v592_v11  ;;  %562 = vmatprep.subr.bf16.mxu1 %v592_v11 }
  0x17   :  { %263 = vmatpush1.bf16.msra.mxu0 %v594_v12  ;;  %570 = vmatpush1.bf16.msra.mxu1 %v594_v12 }
  0x18   :  { %264 = vmatprep.subr.bf16.mxu0 %v595_v13  ;;  %563 = vmatprep.subr.bf16.mxu1 %v595_v13 }
  0x1b   :  { %265 = vmatpush1.bf16.msra.mxu0 %v597_v14  ;;  %571 = vmatpush1.bf16.msra.mxu1 %v597_v14 }
  0x1c   :  { %8 = vsyncpa [#allocation3], 0  ;;  %266 = vmatprep.subr.bf16.mxu0 %v598_v15  ;;  %564 = vmatprep.subr.bf16.mxu1 %v598_v15  ;;  %v601_v17 = vld [vmem:[%s860_s0] sm:$0xff]   ;;  %v603_v19 = vld [vmem:[%s860_s0 + $0x8] sm:$0xff]   ;;  %v66_v33 = vlaneseq }
  0x1d   :  { %v602_v18 = vld [vmem:[%s860_s0 + $0x40] sm:$0xff]   ;;  %v604_v20 = vld [vmem:[%s860_s0 + $0x48] sm:$0xff]   ;;  %v605_v21 = vld [vmem:[%s860_s0 + $0x10] sm:$0xff]  }
  0x1e   :  { %v606_v22 = vld [vmem:[%s860_s0 + $0x50] sm:$0xff]   ;;  %v607_v23 = vld [vmem:[%s860_s0 + $0x18] sm:$0xff]   ;;  %v609_v25 = vld [vmem:[%s860_s0 + $0x20] sm:$0xff]   ;;  %v67_v34 = vshrl.u32 %v66_v33, 7 }
  0x1f   :  { %267 = vmatpush1.bf16.msra.mxu0 %v600_v16  ;;  %572 = vmatpush1.bf16.msra.mxu1 %v600_v16  ;;  %v608_v24 = vld [vmem:[%s860_s0 + $0x58] sm:$0xff]   ;;  %v610_v26 = vld [vmem:[%s860_s0 + $0x60] sm:$0xff]   ;;  %v611_v27 = vld [vmem:[%s860_s0 + $0x28] sm:$0xff]  }
  0x20   :  { %v612_v28 = vld [vmem:[%s860_s0 + $0x68] sm:$0xff]   ;;  %v613_v29 = vld [vmem:[%s860_s0 + $0x30] sm:$0xff]   ;;  %v615_v31 = vld [vmem:[%s860_s0 + $0x38] sm:$0xff]   ;;  %v68_v35 = vsub.s32 0, %v67_v34  ;;  %v72_v37 = vsub.s32 1, %v67_v34 }
  0x21   :  { %v614_v30 = vld [vmem:[%s860_s0 + $0x70] sm:$0xff]   ;;  %v616_v32 = vld [vmem:[%s860_s0 + $0x78] sm:$0xff]   ;;  %v64_v36 = vld [vmem:[%s862_s2] sm:$0x3]  ;;  %s642_s0 = smov [#allocation2]  }
  0x22   :  { %285 = vmatmul.mubr.bf16.vlgmr.msra.gmra.mrb[0].mxu0 %v601_v17  ;;  %365 = vmatmul.mubr.bf16.vlgmr.msra.gmra.mrb[0].mxu1 %v602_v18  ;;  %v780_v38 = vrot.slane %v64_v36, %v68_v35  ;;  %v782_v39 = vrot.slane %v64_v36, %v72_v37  ;;  %s514_s2 = sshll.u32 %s642_s0, 4  ;;  %s515_s2 = int_to_ptr.vmem [resolvable:$true] %s514_s2 }
  0x23   :  { %294 = vmatprep.mubr.bf16.mxu0 %v641_v2  ;;  %374 = vmatprep.mubr.bf16.mxu1 %v641_v2  ;;  %s617_s22 = scalar_lea.vmem %s515_s2, 8192  ;;  %p622_p1 = scmp.lt.s32.totalorder %s515_s2, %s515_s2 }
  0x24   :  { %p618_p0 = scmp.ne.s32.totalorder %s515_s2, %s617_s22  ;;  %p623_p2 = scmp.lt.s32.totalorder %s617_s22, %s617_s22 }
  0x26   :  { %p624_p3 = por %p623_p2, %p622_p1 }
  0x28   :  { %p625_p4 = pnand %p624_p3, %p618_p0 }
  0x2a   :  { %295 = vmatmul.mubr.bf16.gmra.mrb[4].mxu0 %v603_v19  ;;  %375 = vmatmul.mubr.bf16.gmra.mrb[4].mxu1 %v604_v20 }
  0x2b   :  { %304 = vmatprep.mubr.bf16.mxu0 %v641_v2  ;;  %384 = vmatprep.mubr.bf16.mxu1 %v641_v2 }
  0x32   :  { %305 = vmatmul.mubr.bf16.gmra.mrb[8].mxu0 %v605_v21  ;;  %385 = vmatmul.mubr.bf16.gmra.mrb[8].mxu1 %v606_v22 }
  0x33   :  { %314 = vmatprep.mubr.bf16.mxu0 %v641_v2  ;;  %394 = vmatprep.mubr.bf16.mxu1 %v641_v2 }
  0x3a   :  { %315 = vmatmul.mubr.bf16.gmra.mrb[12].mxu0 %v607_v23  ;;  %395 = vmatmul.mubr.bf16.gmra.mrb[12].mxu1 %v608_v24 }
  0x3b   :  { %324 = vmatprep.mubr.bf16.mxu0 %v641_v2  ;;  %404 = vmatprep.mubr.bf16.mxu1 %v641_v2 }
  0x42   :  { %325 = vmatmul.mubr.bf16.gmra.mrb[16].mxu0 %v609_v25  ;;  %405 = vmatmul.mubr.bf16.gmra.mrb[16].mxu1 %v610_v26 }
  0x43   :  { %334 = vmatprep.mubr.bf16.mxu0 %v641_v2  ;;  %414 = vmatprep.mubr.bf16.mxu1 %v641_v2 }
  0x4a   :  { %335 = vmatmul.mubr.bf16.gmra.mrb[20].mxu0 %v611_v27  ;;  %415 = vmatmul.mubr.bf16.gmra.mrb[20].mxu1 %v612_v28 }
  0x4b   :  { %344 = vmatprep.mubr.bf16.mxu0 %v641_v2  ;;  %424 = vmatprep.mubr.bf16.mxu1 %v641_v2 }
  0x52   :  { %345 = vmatmul.mubr.bf16.gmra.mrb[24].mxu0 %v613_v29  ;;  %425 = vmatmul.mubr.bf16.gmra.mrb[24].mxu1 %v614_v30 }
  0x53   :  { %354 = vmatprep.mubr.bf16.mxu0 %v641_v2  ;;  %434 = vmatprep.mubr.bf16.mxu1 %v641_v2 }
  0x5a   :  { %355 = vmatmul.mubr.bf16.gmra.mrb[28].mxu0 %v615_v31  ;;  %435 = vmatmul.mubr.bf16.gmra.mrb[28].mxu1 %v616_v32 }
  0xf5   :  { %v286_v40 = vpop.f32.mrb[0].mxu0  ;;  %v366_v41 = vpop.f32.mrb[0].mxu1 }
  0xf6   :  { %v287_v42 = vadd.f32 %v286_v40, %v780_v38  ;;  %v367_v43 = vadd.f32 %v366_v41, %v780_v38  ;;  %v288_v44 = vpop.f32.mrb[1].mxu0  ;;  %v368_v45 = vpop.f32.mrb[1].mxu1 }
  0xf7   :  { %v289_v46 = vadd.f32 %v288_v44, %v782_v39  ;;  %v369_v47 = vadd.f32 %v368_v45, %v782_v39  ;;  %v290_v48 = vpop.f32.mrb[2].mxu0  ;;  %v370_v49 = vpop.f32.mrb[2].mxu1 }
  0xf8   :  { %445 = vst [vmem:[#allocation2] sm:$0xff] %v287_v42  ;;  %477 = vst [vmem:[#allocation2 + $0x100] sm:$0xff] %v367_v43  ;;  %v291_v50 = vadd.f32 %v290_v48, %v780_v38  ;;  %v371_v51 = vadd.f32 %v370_v49, %v780_v38  ;;  %v292_v52 = vpop.f32.mrb[3].mxu0  ;;  %v372_v53 = vpop.f32.mrb[3].mxu1 }
  0xf9   :  { %446 = vst [vmem:[#allocation2 + $0x8] sm:$0xff] %v289_v46  ;;  %478 = vst [vmem:[#allocation2 + $0x108] sm:$0xff] %v369_v47  ;;  %v293_v54 = vadd.f32 %v292_v52, %v782_v39  ;;  %v373_v55 = vadd.f32 %v372_v53, %v782_v39 }
  0xfa   :  { %447 = vst [vmem:[#allocation2 + $0x10] sm:$0xff] %v291_v50  ;;  %479 = vst [vmem:[#allocation2 + $0x110] sm:$0xff] %v371_v51 }
  0xfb   :  { %448 = vst [vmem:[#allocation2 + $0x18] sm:$0xff] %v293_v54  ;;  %480 = vst [vmem:[#allocation2 + $0x118] sm:$0xff] %v373_v55 }
  0xfd   :  { %v296_v56 = vpop.f32.mrb[4].mxu0  ;;  %v376_v57 = vpop.f32.mrb[4].mxu1 }
  0xfe   :  { %v297_v58 = vadd.f32 %v296_v56, %v780_v38  ;;  %v377_v59 = vadd.f32 %v376_v57, %v780_v38  ;;  %v298_v60 = vpop.f32.mrb[5].mxu0  ;;  %v378_v61 = vpop.f32.mrb[5].mxu1 }
  0xff   :  { %v299_v62 = vadd.f32 %v298_v60, %v782_v39  ;;  %v379_v63 = vadd.f32 %v378_v61, %v782_v39  ;;  %v300_v0 = vpop.f32.mrb[6].mxu0  ;;  %v380_v1 = vpop.f32.mrb[6].mxu1 }
 0x100   :  { %449 = vst [vmem:[#allocation2 + $0x20] sm:$0xff] %v297_v58  ;;  %481 = vst [vmem:[#allocation2 + $0x120] sm:$0xff] %v377_v59  ;;  %v301_v2 = vadd.f32 %v300_v0, %v780_v38  ;;  %v381_v3 = vadd.f32 %v380_v1, %v780_v38  ;;  %v302_v4 = vpop.f32.mrb[7].mxu0  ;;  %v382_v5 = vpop.f32.mrb[7].mxu1 }
 0x101   :  { %450 = vst [vmem:[#allocation2 + $0x28] sm:$0xff] %v299_v62  ;;  %482 = vst [vmem:[#allocation2 + $0x128] sm:$0xff] %v379_v63  ;;  %v303_v6 = vadd.f32 %v302_v4, %v782_v39  ;;  %v383_v7 = vadd.f32 %v382_v5, %v782_v39 }
 0x102   :  { %451 = vst [vmem:[#allocation2 + $0x30] sm:$0xff] %v301_v2  ;;  %483 = vst [vmem:[#allocation2 + $0x130] sm:$0xff] %v381_v3 }
 0x103   :  { %452 = vst [vmem:[#allocation2 + $0x38] sm:$0xff] %v303_v6  ;;  %484 = vst [vmem:[#allocation2 + $0x138] sm:$0xff] %v383_v7 }
 0x105   :  { %v306_v8 = vpop.f32.mrb[8].mxu0  ;;  %v386_v9 = vpop.f32.mrb[8].mxu1 }
 0x106   :  { %v307_v10 = vadd.f32 %v306_v8, %v780_v38  ;;  %v387_v11 = vadd.f32 %v386_v9, %v780_v38  ;;  %v308_v12 = vpop.f32.mrb[9].mxu0  ;;  %v388_v13 = vpop.f32.mrb[9].mxu1 }
 0x107   :  { %v309_v14 = vadd.f32 %v308_v12, %v782_v39  ;;  %v389_v15 = vadd.f32 %v388_v13, %v782_v39  ;;  %v310_v16 = vpop.f32.mrb[10].mxu0  ;;  %v390_v17 = vpop.f32.mrb[10].mxu1 }
 0x108   :  { %453 = vst [vmem:[#allocation2 + $0x40] sm:$0xff] %v307_v10  ;;  %485 = vst [vmem:[#allocation2 + $0x140] sm:$0xff] %v387_v11  ;;  %v311_v18 = vadd.f32 %v310_v16, %v780_v38  ;;  %v391_v19 = vadd.f32 %v390_v17, %v780_v38  ;;  %v312_v20 = vpop.f32.mrb[11].mxu0  ;;  %v392_v21 = vpop.f32.mrb[11].mxu1 }
 0x109   :  { %454 = vst [vmem:[#allocation2 + $0x48] sm:$0xff] %v309_v14  ;;  %486 = vst [vmem:[#allocation2 + $0x148] sm:$0xff] %v389_v15  ;;  %v313_v22 = vadd.f32 %v312_v20, %v782_v39  ;;  %v393_v23 = vadd.f32 %v392_v21, %v782_v39 }
 0x10a   :  { %455 = vst [vmem:[#allocation2 + $0x50] sm:$0xff] %v311_v18  ;;  %487 = vst [vmem:[#allocation2 + $0x150] sm:$0xff] %v391_v19 }
 0x10b   :  { %456 = vst [vmem:[#allocation2 + $0x58] sm:$0xff] %v313_v22  ;;  %488 = vst [vmem:[#allocation2 + $0x158] sm:$0xff] %v393_v23 }
 0x10d   :  { %v316_v24 = vpop.f32.mrb[12].mxu0  ;;  %v396_v25 = vpop.f32.mrb[12].mxu1 }
 0x10e   :  { %v317_v26 = vadd.f32 %v316_v24, %v780_v38  ;;  %v397_v27 = vadd.f32 %v396_v25, %v780_v38  ;;  %v318_v28 = vpop.f32.mrb[13].mxu0  ;;  %v398_v29 = vpop.f32.mrb[13].mxu1 }
 0x10f   :  { %v319_v30 = vadd.f32 %v318_v28, %v782_v39  ;;  %v399_v31 = vadd.f32 %v398_v29, %v782_v39  ;;  %v320_v32 = vpop.f32.mrb[14].mxu0  ;;  %v400_v33 = vpop.f32.mrb[14].mxu1 }
 0x110   :  { %457 = vst [vmem:[#allocation2 + $0x60] sm:$0xff] %v317_v26  ;;  %489 = vst [vmem:[#allocation2 + $0x160] sm:$0xff] %v397_v27  ;;  %v321_v34 = vadd.f32 %v320_v32, %v780_v38  ;;  %v401_v35 = vadd.f32 %v400_v33, %v780_v38  ;;  %v322_v36 = vpop.f32.mrb[15].mxu0  ;;  %v402_v37 = vpop.f32.mrb[15].mxu1 }
 0x111   :  { %458 = vst [vmem:[#allocation2 + $0x68] sm:$0xff] %v319_v30  ;;  %490 = vst [vmem:[#allocation2 + $0x168] sm:$0xff] %v399_v31  ;;  %v323_v40 = vadd.f32 %v322_v36, %v782_v39  ;;  %v403_v41 = vadd.f32 %v402_v37, %v782_v39 }
 0x112   :  { %459 = vst [vmem:[#allocation2 + $0x70] sm:$0xff] %v321_v34  ;;  %491 = vst [vmem:[#allocation2 + $0x170] sm:$0xff] %v401_v35 }
 0x113   :  { %460 = vst [vmem:[#allocation2 + $0x78] sm:$0xff] %v323_v40  ;;  %492 = vst [vmem:[#allocation2 + $0x178] sm:$0xff] %v403_v41 }
 0x115   :  { %v326_v42 = vpop.f32.mrb[16].mxu0  ;;  %v406_v43 = vpop.f32.mrb[16].mxu1 }
 0x116   :  { %v327_v44 = vadd.f32 %v326_v42, %v780_v38  ;;  %v407_v45 = vadd.f32 %v406_v43, %v780_v38  ;;  %v328_v46 = vpop.f32.mrb[17].mxu0  ;;  %v408_v47 = vpop.f32.mrb[17].mxu1 }
 0x117   :  { %v329_v48 = vadd.f32 %v328_v46, %v782_v39  ;;  %v409_v49 = vadd.f32 %v408_v47, %v782_v39  ;;  %v330_v50 = vpop.f32.mrb[18].mxu0  ;;  %v410_v51 = vpop.f32.mrb[18].mxu1 }
 0x118   :  { %461 = vst [vmem:[#allocation2 + $0x80] sm:$0xff] %v327_v44  ;;  %493 = vst [vmem:[#allocation2 + $0x180] sm:$0xff] %v407_v45  ;;  %v331_v52 = vadd.f32 %v330_v50, %v780_v38  ;;  %v411_v53 = vadd.f32 %v410_v51, %v780_v38  ;;  %v332_v54 = vpop.f32.mrb[19].mxu0  ;;  %v412_v55 = vpop.f32.mrb[19].mxu1 }
 0x119   :  { %462 = vst [vmem:[#allocation2 + $0x88] sm:$0xff] %v329_v48  ;;  %494 = vst [vmem:[#allocation2 + $0x188] sm:$0xff] %v409_v49  ;;  %v333_v56 = vadd.f32 %v332_v54, %v782_v39  ;;  %v413_v57 = vadd.f32 %v412_v55, %v782_v39 }
 0x11a   :  { %463 = vst [vmem:[#allocation2 + $0x90] sm:$0xff] %v331_v52  ;;  %495 = vst [vmem:[#allocation2 + $0x190] sm:$0xff] %v411_v53 }
 0x11b   :  { %464 = vst [vmem:[#allocation2 + $0x98] sm:$0xff] %v333_v56  ;;  %496 = vst [vmem:[#allocation2 + $0x198] sm:$0xff] %v413_v57 }
 0x11d   :  { %v336_v58 = vpop.f32.mrb[20].mxu0  ;;  %v416_v59 = vpop.f32.mrb[20].mxu1 }
 0x11e   :  { %v337_v60 = vadd.f32 %v336_v58, %v780_v38  ;;  %v417_v61 = vadd.f32 %v416_v59, %v780_v38  ;;  %v338_v62 = vpop.f32.mrb[21].mxu0  ;;  %v418_v63 = vpop.f32.mrb[21].mxu1 }
 0x11f   :  { %v339_v0 = vadd.f32 %v338_v62, %v782_v39  ;;  %v419_v1 = vadd.f32 %v418_v63, %v782_v39  ;;  %v340_v2 = vpop.f32.mrb[22].mxu0  ;;  %v420_v3 = vpop.f32.mrb[22].mxu1 }
 0x120   :  { %465 = vst [vmem:[#allocation2 + $0xa0] sm:$0xff] %v337_v60  ;;  %497 = vst [vmem:[#allocation2 + $0x1a0] sm:$0xff] %v417_v61  ;;  %v341_v4 = vadd.f32 %v340_v2, %v780_v38  ;;  %v421_v5 = vadd.f32 %v420_v3, %v780_v38  ;;  %v342_v6 = vpop.f32.mrb[23].mxu0  ;;  %v422_v7 = vpop.f32.mrb[23].mxu1 }
 0x121   :  { %466 = vst [vmem:[#allocation2 + $0xa8] sm:$0xff] %v339_v0  ;;  %498 = vst [vmem:[#allocation2 + $0x1a8] sm:$0xff] %v419_v1  ;;  %v343_v8 = vadd.f32 %v342_v6, %v782_v39  ;;  %v423_v9 = vadd.f32 %v422_v7, %v782_v39 }
 0x122   :  { %467 = vst [vmem:[#allocation2 + $0xb0] sm:$0xff] %v341_v4  ;;  %499 = vst [vmem:[#allocation2 + $0x1b0] sm:$0xff] %v421_v5 }
 0x123   :  { %468 = vst [vmem:[#allocation2 + $0xb8] sm:$0xff] %v343_v8  ;;  %500 = vst [vmem:[#allocation2 + $0x1b8] sm:$0xff] %v423_v9 }
 0x125   :  { %v346_v10 = vpop.f32.mrb[24].mxu0  ;;  %v426_v11 = vpop.f32.mrb[24].mxu1 }
 0x126   :  { %v347_v12 = vadd.f32 %v346_v10, %v780_v38  ;;  %v427_v13 = vadd.f32 %v426_v11, %v780_v38  ;;  %v348_v14 = vpop.f32.mrb[25].mxu0  ;;  %v428_v15 = vpop.f32.mrb[25].mxu1 }
 0x127   :  { %v349_v16 = vadd.f32 %v348_v14, %v782_v39  ;;  %v429_v17 = vadd.f32 %v428_v15, %v782_v39  ;;  %v350_v18 = vpop.f32.mrb[26].mxu0  ;;  %v430_v19 = vpop.f32.mrb[26].mxu1 }
 0x128   :  { %469 = vst [vmem:[#allocation2 + $0xc0] sm:$0xff] %v347_v12  ;;  %501 = vst [vmem:[#allocation2 + $0x1c0] sm:$0xff] %v427_v13  ;;  %v351_v20 = vadd.f32 %v350_v18, %v780_v38  ;;  %v431_v21 = vadd.f32 %v430_v19, %v780_v38  ;;  %v352_v22 = vpop.f32.mrb[27].mxu0  ;;  %v432_v23 = vpop.f32.mrb[27].mxu1 }
 0x129   :  { %470 = vst [vmem:[#allocation2 + $0xc8] sm:$0xff] %v349_v16  ;;  %502 = vst [vmem:[#allocation2 + $0x1c8] sm:$0xff] %v429_v17  ;;  %v353_v24 = vadd.f32 %v352_v22, %v782_v39  ;;  %v433_v25 = vadd.f32 %v432_v23, %v782_v39 }
 0x12a   :  { %471 = vst [vmem:[#allocation2 + $0xd0] sm:$0xff] %v351_v20  ;;  %503 = vst [vmem:[#allocation2 + $0x1d0] sm:$0xff] %v431_v21 }
 0x12b   :  { %472 = vst [vmem:[#allocation2 + $0xd8] sm:$0xff] %v353_v24  ;;  %504 = vst [vmem:[#allocation2 + $0x1d8] sm:$0xff] %v433_v25 }
 0x12d   :  { %v356_v26 = vpop.f32.mrb[28].mxu0  ;;  %v436_v27 = vpop.f32.mrb[28].mxu1 }
 0x12e   :  { %v357_v28 = vadd.f32 %v356_v26, %v780_v38  ;;  %v437_v29 = vadd.f32 %v436_v27, %v780_v38  ;;  %v358_v30 = vpop.f32.mrb[29].mxu0  ;;  %v438_v31 = vpop.f32.mrb[29].mxu1 }
 0x12f   :  { %v359_v32 = vadd.f32 %v358_v30, %v782_v39  ;;  %v439_v33 = vadd.f32 %v438_v31, %v782_v39  ;;  %v360_v34 = vpop.f32.mrb[30].mxu0  ;;  %v440_v35 = vpop.f32.mrb[30].mxu1 }
 0x130   :  { %473 = vst [vmem:[#allocation2 + $0xe0] sm:$0xff] %v357_v28  ;;  %505 = vst [vmem:[#allocation2 + $0x1e0] sm:$0xff] %v437_v29  ;;  %v361_v36 = vadd.f32 %v360_v34, %v780_v38  ;;  %v441_v37 = vadd.f32 %v440_v35, %v780_v38  ;;  %v362_v40 = vpop.f32.mrb[31].mxu0  ;;  %v442_v41 = vpop.f32.mrb[31].mxu1 }
 0x131   :  { %474 = vst [vmem:[#allocation2 + $0xe8] sm:$0xff] %v359_v32  ;;  %506 = vst [vmem:[#allocation2 + $0x1e8] sm:$0xff] %v439_v33  ;;  %v363_v42 = vadd.f32 %v362_v40, %v782_v39  ;;  %v443_v43 = vadd.f32 %v442_v41, %v782_v39 }
 0x132   :  { %475 = vst [vmem:[#allocation2 + $0xf0] sm:$0xff] %v361_v36  ;;  %507 = vst [vmem:[#allocation2 + $0x1f0] sm:$0xff] %v441_v37 }
 0x133   :  { %476 = vst [vmem:[#allocation2 + $0xf8] sm:$0xff] %v363_v42  ;;  %508 = vst [vmem:[#allocation2 + $0x1f8] sm:$0xff] %v443_v43 }
 0x134   :  { %628 = shalt.err (!%p625_p4)
}
 0x135   :  { %s629_s25 = scalar_lea.hbm %s863_s3, 8192 }
 0x136   :  { %p630_p5 = scmp.ne.s32.totalorder %s863_s3, %s629_s25  ;;  %p633_p6 = scmp.lt.u32.totalorder %s629_s25, %s863_s3 }
 0x138   :  { %p635_p7 = pnand %p633_p6, %p630_p5 }
 0x13a   :  { %638 = shalt.err (!%p635_p7)
}
 0x13b   :  { %s643_s30 = smov 256   ;;  %s644_s4 = smov 16  }
 0x13c   :  { %520 = dma.vmem_to_hbm [thread:$0]  %s515_s2, 8192, %s863_s3, [#allocation3], %s643_s30, %s643_s30, %s644_s4  }
 0x13d   :  { %639 = dma.done.wait [#allocation3], 8192  }
 0x13e   :  { %640 = vsyncadd [#allocation3], 4294959104 }
 0x13f   :  { %524 = vsyncpa [#allocation3], 1 }

// kernel: rnnlm_forward.2
= control target key start
LH: loop header
LB: loop body
LE: loop exit
PB: predicated region body
PF: predicated region fallthrough
CT: control target
= control target key end

     0   :  { %14 = vsyncpa [#allocation7], 0  ;;  %s5214_s0 = inlined_call_operand.vmem [shape: bf16[32,8,128], index: 0, kind: input, shape index: {}]   ;;  %s5215_s1 = inlined_call_operand.vmem [shape: bf16[128,512], index: 1, kind: input, shape index: {}]   ;;  %s5216_s2 = inlined_call_operand.vmem [shape: f32[1,512], index: 2, kind: input, shape index: {}]   ;;  %s5217_s3 = inlined_call_operand.vmem [shape: f32[8,128], index: 3, kind: input, shape index: {}]   ;;  %s5218_s4 = inlined_call_operand.vmem [shape: f32[8,128], index: 4, kind: input, shape index: {}]   ;;  %s5219_s5 = inlined_call_operand.vmem [shape: bf16[128,512], index: 5, kind: input, shape index: {}]   ;;  %s5220_s6 = inlined_call_operand.vmem [shape: bf16[32,8,128], index: 6, kind: output, shape index: {0}]   ;;  %s5221_s7 = inlined_call_operand.hbm [shape: f32[8,128], index: 7, kind: output, shape index: {1}]   ;;  %s5222_s8 = inlined_call_operand.hbm [shape: f32[8,128], index: 8, kind: output, shape index: {2}]  }
   0x1   :  { %15 = vsyncpa [#allocation9], 0  ;;  %s3623_s27 = smov 0  }
   0x2 LB: > { %s3629_s28 = sadd.s32 4294967295, %s3573_s27   ;;  %p3025_p0 = scmp.ge.s32.totalorder %s3573_s27, 1  ;;  %s3573_s27 = sphi %s3623_s27, %s21_s27  }
   0x3   : > { %p260_p1 = scmp.lt.s32.totalorder %s3573_s27, 3 }
   0x5   : > { %p261_p2 = pnand %p3025_p0, %p260_p1 }
   0x7   : > { %264 = sbr.rel (%p261_p2) target bundleno = 4162 (0x1042), region = 44 }
   0xe   : > { %s3026_s29 = sshll.u32 %s3629_s28, 4  ;;  %p3030_p4 = scmp.ne.s32.totalorder %s3629_s28, 0 }
   0xf   : > { %p295_p3 = scmp.lt.s32.totalorder %s3026_s29, 31  ;;  %v311_v0 = vld [vmem:[%s5217_s3] sm:$0xff] (!%p3030_p4) }
  0x10   : > { %310 = sbr.rel (%p3030_p4) target bundleno = 23 (0x17), region = 48  ;;  %v313_v1 = vld [vmem:[%s5218_s4] sm:$0xff] (!%p3030_p4)  ;;  %312 = vst [vmem:[#allocation4] sm:$0xff] (!%p3030_p4), %v311_v0 }
  0x11   : > { %s5329_s29 = smov (!%p295_p3, %s3026_s29), 31  ;;  %314 = vst [vmem:[#allocation5] sm:$0xff] (!%p3030_p4), %v313_v1 }
  0x12   : > { %s3027_s30 = sshll.u32 %s5329_s29, 2 }
  0x13   : > { %s3637_s11 = scalar_lea.vmem %s5214_s0, %s3027_s30  ;;  %s3642_s14 = scalar_lea.vmem %s5220_s6, %s3027_s30 }
  0x17 PF: > { %v3179_v2 = vld [vmem:[%s5215_s1 + $0x4] ss:$16 sps:$4 sm:$0xff]   ;;  %v3181_v3 = vld [vmem:[%s5215_s1 + $0xc] ss:$16 sps:$4 sm:$0xff]   ;;  %v5223_v4 = vmov 0   ;;  %s3576_s18 = smov [#allocation8]  }
  0x18   : > { %625 = vmatprep.mubr.bf16.mxu0 %v5223_v4  ;;  %738 = vmatprep.mubr.bf16.mxu1 %v5223_v4  ;;  %v3183_v5 = vld [vmem:[%s5215_s1] ss:$16 sps:$4 sm:$0xff]   ;;  %v3184_v6 = vld [vmem:[%s5215_s1 + $0x8] ss:$16 sps:$4 sm:$0xff]   ;;  %v3185_v7 = vld [vmem:[%s5215_s1 + $0x24] ss:$16 sps:$4 sm:$0xff]  }
  0x19   : > { %593 = vmatprep.subr.bf16.mxu0 %v3179_v2  ;;  %706 = vmatprep.subr.bf16.mxu1 %v3181_v3  ;;  %v3187_v8 = vld [vmem:[%s5215_s1 + $0x2c] ss:$16 sps:$4 sm:$0xff]   ;;  %v3189_v9 = vld [vmem:[%s5215_s1 + $0x20] ss:$16 sps:$4 sm:$0xff]   ;;  %v3190_v10 = vld [vmem:[%s5215_s1 + $0x28] ss:$16 sps:$4 sm:$0xff]  }
  0x1a   : > { %594 = vmatpush1.bf16.msra.mxu0 %v3183_v5  ;;  %707 = vmatpush1.bf16.msra.mxu1 %v3184_v6  ;;  %v3191_v11 = vld [vmem:[%s5215_s1 + $0x44] ss:$16 sps:$4 sm:$0xff]   ;;  %v3193_v12 = vld [vmem:[%s5215_s1 + $0x4c] ss:$16 sps:$4 sm:$0xff]   ;;  %v3195_v13 = vld [vmem:[%s5215_s1 + $0x40] ss:$16 sps:$4 sm:$0xff]  }
  0x1b   : > { %595 = vmatprep.subr.bf16.mxu0 %v3185_v7  ;;  %708 = vmatprep.subr.bf16.mxu1 %v3187_v8  ;;  %v3196_v14 = vld [vmem:[%s5215_s1 + $0x48] ss:$16 sps:$4 sm:$0xff]   ;;  %v3197_v15 = vld [vmem:[%s5215_s1 + $0x64] ss:$16 sps:$4 sm:$0xff]   ;;  %v3199_v16 = vld [vmem:[%s5215_s1 + $0x6c] ss:$16 sps:$4 sm:$0xff]  }
  0x1c   : > { %v3201_v17 = vld [vmem:[%s5215_s1 + $0x60] ss:$16 sps:$4 sm:$0xff]   ;;  %v3202_v18 = vld [vmem:[%s5215_s1 + $0x68] ss:$16 sps:$4 sm:$0xff]   ;;  %v3203_v19 = vld [vmem:[%s5215_s1 + $0x84] ss:$16 sps:$4 sm:$0xff]  }
  0x1d   : > { %v3205_v20 = vld [vmem:[%s5215_s1 + $0x8c] ss:$16 sps:$4 sm:$0xff]   ;;  %v3207_v21 = vld [vmem:[%s5215_s1 + $0x80] ss:$16 sps:$4 sm:$0xff]   ;;  %v3208_v22 = vld [vmem:[%s5215_s1 + $0x88] ss:$16 sps:$4 sm:$0xff]  }
  0x1e   : > { %596 = vmatpush1.bf16.msra.mxu0 %v3189_v9  ;;  %709 = vmatpush1.bf16.msra.mxu1 %v3190_v10  ;;  %v3209_v23 = vld [vmem:[%s5215_s1 + $0xa4] ss:$16 sps:$4 sm:$0xff]   ;;  %v3211_v24 = vld [vmem:[%s5215_s1 + $0xac] ss:$16 sps:$4 sm:$0xff]   ;;  %v3213_v25 = vld [vmem:[%s5215_s1 + $0xa0] ss:$16 sps:$4 sm:$0xff]  }
  0x1f   : > { %597 = vmatprep.subr.bf16.mxu0 %v3191_v11  ;;  %710 = vmatprep.subr.bf16.mxu1 %v3193_v12  ;;  %v3214_v26 = vld [vmem:[%s5215_s1 + $0xa8] ss:$16 sps:$4 sm:$0xff]   ;;  %v3215_v27 = vld [vmem:[%s5215_s1 + $0xc4] ss:$16 sps:$4 sm:$0xff]   ;;  %v3217_v28 = vld [vmem:[%s5215_s1 + $0xcc] ss:$16 sps:$4 sm:$0xff]  }
  0x20   : > { %v3219_v29 = vld [vmem:[%s5215_s1 + $0xc0] ss:$16 sps:$4 sm:$0xff]   ;;  %v3220_v30 = vld [vmem:[%s5215_s1 + $0xc8] ss:$16 sps:$4 sm:$0xff]   ;;  %v3221_v31 = vld [vmem:[%s5215_s1 + $0xe4] ss:$16 sps:$4 sm:$0xff]  }
  0x21   : > { %v3223_v32 = vld [vmem:[%s5215_s1 + $0xec] ss:$16 sps:$4 sm:$0xff]   ;;  %v3225_v33 = vld [vmem:[%s5215_s1 + $0xe0] ss:$16 sps:$4 sm:$0xff]   ;;  %v3226_v34 = vld [vmem:[%s5215_s1 + $0xe8] ss:$16 sps:$4 sm:$0xff]  }
  0x22   : > { %598 = vmatpush1.bf16.msra.mxu0 %v3195_v13  ;;  %711 = vmatpush1.bf16.msra.mxu1 %v3196_v14  ;;  %v3752_v35 = vld [vmem:[%s5219_s5 + $0x4] ss:$16 sps:$4 sm:$0xff]   ;;  %v3757_v36 = vld [vmem:[%s5219_s5 + $0xc] ss:$16 sps:$4 sm:$0xff]   ;;  %v3763_v38 = vld [vmem:[%s5219_s5] ss:$16 sps:$4 sm:$0xff]   ;;  %v365_v14 = vlaneseq }
  0x23   : > { %599 = vmatprep.subr.bf16.mxu0 %v3197_v15  ;;  %712 = vmatprep.subr.bf16.mxu1 %v3199_v16  ;;  %v3227_v37 = vld [vmem:[%s3637_s11] sm:$0xff]   ;;  %v3775_v40 = vld [vmem:[%s5219_s5 + $0x8] ss:$16 sps:$4 sm:$0xff]   ;;  %v3780_v41 = vld [vmem:[%s5219_s5 + $0x2c] ss:$16 sps:$4 sm:$0xff]   ;;  %s2946_s19 = sshll.u32 %s3576_s18, 4  ;;  %s2947_s19 = int_to_ptr.vmem [resolvable:$true] %s2946_s19 }
  0x24   : > { %v3770_v39 = vld [vmem:[%s5219_s5 + $0x24] ss:$16 sps:$4 sm:$0xff]   ;;  %v3787_v42 = vld [vmem:[%s5219_s5 + $0x20] ss:$16 sps:$4 sm:$0xff]   ;;  %v3800_v44 = vld [vmem:[%s5219_s5 + $0x28] ss:$16 sps:$4 sm:$0xff]   ;;  %p3514_p9 = scmp.lt.s32.totalorder %s2947_s19, %s2947_s19 }
  0x25   : > { %v3794_v43 = vld [vmem:[%s5219_s5 + $0x44] ss:$16 sps:$4 sm:$0xff]   ;;  %v3233_v45 = vld [vmem:[%s3637_s11 + $0x8] sm:$0xff]   ;;  %v3809_v46 = vld [vmem:[%s5219_s5 + $0x40] ss:$16 sps:$4 sm:$0xff]   ;;  %v366_v15 = vshrl.u32 %v365_v14, 7 }
  0x26   : > { %600 = vmatpush1.bf16.msra.mxu0 %v3201_v17  ;;  %713 = vmatpush1.bf16.msra.mxu1 %v3202_v18  ;;  %v3814_v47 = vld [vmem:[%s5219_s5 + $0x4c] ss:$16 sps:$4 sm:$0xff]   ;;  %v3819_v48 = vld [vmem:[%s5219_s5 + $0x64] ss:$16 sps:$4 sm:$0xff]   ;;  %v3825_v49 = vld [vmem:[%s5219_s5 + $0x48] ss:$16 sps:$4 sm:$0xff]  }
  0x27   : > { %601 = vmatprep.subr.bf16.mxu0 %v3203_v19  ;;  %714 = vmatprep.subr.bf16.mxu1 %v3205_v20  ;;  %v3830_v50 = vld [vmem:[%s5219_s5 + $0x6c] ss:$16 sps:$4 sm:$0xff]   ;;  %v3839_v51 = vld [vmem:[%s5219_s5 + $0x60] ss:$16 sps:$4 sm:$0xff]   ;;  %v3844_v52 = vld [vmem:[%s5219_s5 + $0x84] ss:$16 sps:$4 sm:$0xff]  }
  0x28   : > { %v3851_v53 = vld [vmem:[%s5219_s5 + $0x68] ss:$16 sps:$4 sm:$0xff]   ;;  %v3240_v54 = vld [vmem:[%s3637_s11 + $0x10] sm:$0xff]   ;;  %v3864_v56 = vld [vmem:[%s5219_s5 + $0x8c] ss:$16 sps:$4 sm:$0xff]   ;;  %v375_v16 = vsub.s32 2, %v366_v15 }
  0x29   : > { %v3858_v55 = vld [vmem:[%s5219_s5 + $0x80] ss:$16 sps:$4 sm:$0xff]   ;;  %v3871_v57 = vld [vmem:[%s5219_s5 + $0xa4] ss:$16 sps:$4 sm:$0xff]   ;;  %v3876_v58 = vld [vmem:[%s5219_s5 + $0x88] ss:$16 sps:$4 sm:$0xff]  }
  0x2a   : > { %602 = vmatpush1.bf16.msra.mxu0 %v3207_v21  ;;  %715 = vmatpush1.bf16.msra.mxu1 %v3208_v22  ;;  %v3881_v59 = vld [vmem:[%s5219_s5 + $0xac] ss:$16 sps:$4 sm:$0xff]   ;;  %v3890_v60 = vld [vmem:[%s5219_s5 + $0xa0] ss:$16 sps:$4 sm:$0xff]   ;;  %v3897_v61 = vld [vmem:[%s5219_s5 + $0xc4] ss:$16 sps:$4 sm:$0xff]  }
  0x2b   : > { %603 = vmatprep.subr.bf16.mxu0 %v3209_v23  ;;  %716 = vmatprep.subr.bf16.mxu1 %v3211_v24  ;;  %v3902_v62 = vld [vmem:[%s5219_s5 + $0xa8] ss:$16 sps:$4 sm:$0xff]   ;;  %v3910_v0 = vld [vmem:[%s5219_s5 + $0xc0] ss:$16 sps:$4 sm:$0xff]   ;;  %v3915_v1 = vld [vmem:[%s5219_s5 + $0xcc] ss:$16 sps:$4 sm:$0xff]  }
  0x2c   : > { %v3247_v63 = vld [vmem:[%s3637_s11 + $0x18] sm:$0xff]   ;;  %v3922_v2 = vld [vmem:[%s5219_s5 + $0xe4] ss:$16 sps:$4 sm:$0xff]   ;;  %v3941_v6 = vld [vmem:[%s5219_s5 + $0xe0] ss:$16 sps:$4 sm:$0xff]   ;;  %v379_v17 = vsub.s32 3, %v366_v15 }
  0x2d   : > { %v3927_v3 = vld [vmem:[%s5219_s5 + $0xc8] ss:$16 sps:$4 sm:$0xff]   ;;  %v3932_v5 = vld [vmem:[%s5219_s5 + $0xec] ss:$16 sps:$4 sm:$0xff]   ;;  %v3254_v8 = vld [vmem:[%s3637_s11 + $0x20] sm:$0xff]   ;;  %v367_v18 = vsub.s32 0, %v366_v15 }
  0x2e   : > { %604 = vmatpush1.bf16.msra.mxu0 %v3213_v25  ;;  %717 = vmatpush1.bf16.msra.mxu1 %v3214_v26  ;;  %v3948_v7 = vld [vmem:[%s5219_s5 + $0xe8] ss:$16 sps:$4 sm:$0xff]   ;;  %v3268_v10 = vld [vmem:[%s3637_s11 + $0x30] sm:$0xff]   ;;  %v915_v12 = vld [vmem:[#allocation4] sm:$0xff]  ;;  %v371_v20 = vsub.s32 1, %v366_v15  ;;  %p3164_p5 = scmp.eq.s32.totalorder %s3629_s28, 1 }
  0x2f   : > { %605 = vmatprep.subr.bf16.mxu0 %v3215_v27  ;;  %718 = vmatprep.subr.bf16.mxu1 %v3217_v28  ;;  %v3261_v9 = vld [vmem:[%s3637_s11 + $0x28] sm:$0xff]   ;;  %v3275_v11 = vld [vmem:[%s3637_s11 + $0x38] sm:$0xff]   ;;  %v921_v13 = vpack.c.bf16 %v915_v12, %v915_v12  ;;  %v363_v19 = vld [vmem:[%s5216_s2] sm:$0xf]  ;;  %s3507_s20 = scalar_lea.vmem %s2947_s19, 128 }
  0x30   : > { %v4004_v21 = vrot.slane %v363_v19, %v375_v16  ;;  %v4010_v24 = vrot.slane %v363_v19, %v379_v17  ;;  %v4012_v25 = vrot.slane %v363_v19, %v367_v18  ;;  %v4018_v28 = vrot.slane %v363_v19, %v371_v20  ;;  %p3508_p6 = scmp.ne.s32.totalorder %s2947_s19, %s3507_s20  ;;  %p3515_p10 = scmp.lt.s32.totalorder %s3507_s20, %s3507_s20 }
  0x32   : > { %606 = vmatpush1.bf16.msra.mxu0 %v3219_v29  ;;  %719 = vmatpush1.bf16.msra.mxu1 %v3220_v30  ;;  %p3509_p7 = pnand %p3508_p6, %p3164_p5  ;;  %p3516_p11 = por %p3515_p10, %p3514_p9 }
  0x33   : > { %607 = vmatprep.subr.bf16.mxu0 %v3221_v31  ;;  %720 = vmatprep.subr.bf16.mxu1 %v3223_v32 }
  0x34   : > { %p3510_p8 = pneg %p3509_p7 }
  0x36   : > { %608 = vmatpush1.bf16.msra.mxu0 %v3225_v33  ;;  %721 = vmatpush1.bf16.msra.mxu1 %v3226_v34  ;;  %p3517_p12 = pnand %p3516_p11, %p3510_p8 }
  0x37   : > { %1082 = vmatprep.subr.bf16.mxu0 %v3752_v35  ;;  %1123 = vmatprep.subr.bf16.mxu1 %v3757_v36 }
  0x39   : > { %626 = vmatmul.mubr.bf16.vlgmr.msra.gmra.mrb[0].mxu0 %v3227_v37  ;;  %739 = vmatmul.mubr.bf16.vlgmr.msra.gmra.mrb[0].mxu1 %v3227_v37 }
  0x3a   : > { %1083 = vmatpush1.bf16.msra.mxu0 %v3763_v38  ;;  %635 = vmatprep.mubr.bf16.mxu0 %v5223_v4 }
  0x3b   : > { %748 = vmatprep.mubr.bf16.mxu1 %v5223_v4  ;;  %1084 = vmatprep.subr.bf16.mxu0 %v3770_v39 }
  0x3c   : > { %1124 = vmatpush1.bf16.msra.mxu1 %v3775_v40 }
  0x3d   : > { %1125 = vmatprep.subr.bf16.mxu1 %v3780_v41 }
  0x3e   : > { %1085 = vmatpush1.bf16.msra.mxu0 %v3787_v42 }
  0x3f   : > { %1086 = vmatprep.subr.bf16.mxu0 %v3794_v43 }
  0x40   : > { %1126 = vmatpush1.bf16.msra.mxu1 %v3800_v44 }
  0x41   : > { %636 = vmatmul.mubr.bf16.gmra.mrb[4].mxu0 %v3233_v45  ;;  %749 = vmatmul.mubr.bf16.gmra.mrb[4].mxu1 %v3233_v45 }
  0x42   : > { %645 = vmatprep.mubr.bf16.mxu0 %v5223_v4  ;;  %758 = vmatprep.mubr.bf16.mxu1 %v5223_v4 }
  0x43   : > { %1087 = vmatpush1.bf16.msra.mxu0 %v3809_v46  ;;  %1127 = vmatprep.subr.bf16.mxu1 %v3814_v47 }
  0x44   : > { %1088 = vmatprep.subr.bf16.mxu0 %v3819_v48  ;;  %1128 = vmatpush1.bf16.msra.mxu1 %v3825_v49 }
  0x45   : > { %1129 = vmatprep.subr.bf16.mxu1 %v3830_v50 }
  0x47   : > { %1089 = vmatpush1.bf16.msra.mxu0 %v3839_v51 }
  0x48   : > { %1090 = vmatprep.subr.bf16.mxu0 %v3844_v52  ;;  %1130 = vmatpush1.bf16.msra.mxu1 %v3851_v53 }
  0x49   : > { %646 = vmatmul.mubr.bf16.gmra.mrb[8].mxu0 %v3240_v54  ;;  %759 = vmatmul.mubr.bf16.gmra.mrb[8].mxu1 %v3240_v54 }
  0x4a   : > { %655 = vmatprep.mubr.bf16.mxu0 %v5223_v4  ;;  %768 = vmatprep.mubr.bf16.mxu1 %v5223_v4 }
  0x4b   : > { %1091 = vmatpush1.bf16.msra.mxu0 %v3858_v55  ;;  %1131 = vmatprep.subr.bf16.mxu1 %v3864_v56 }
  0x4c   : > { %1092 = vmatprep.subr.bf16.mxu0 %v3871_v57  ;;  %1132 = vmatpush1.bf16.msra.mxu1 %v3876_v58 }
  0x4d   : > { %1133 = vmatprep.subr.bf16.mxu1 %v3881_v59 }
  0x4f   : > { %1093 = vmatpush1.bf16.msra.mxu0 %v3890_v60 }
  0x50   : > { %1094 = vmatprep.subr.bf16.mxu0 %v3897_v61  ;;  %1134 = vmatpush1.bf16.msra.mxu1 %v3902_v62 }
  0x51   : > { %656 = vmatmul.mubr.bf16.gmra.mrb[12].mxu0 %v3247_v63  ;;  %769 = vmatmul.mubr.bf16.gmra.mrb[12].mxu1 %v3247_v63 }
  0x52   : > { %665 = vmatprep.mubr.bf16.mxu0 %v5223_v4  ;;  %778 = vmatprep.mubr.bf16.mxu1 %v5223_v4 }
  0x53   : > { %1095 = vmatpush1.bf16.msra.mxu0 %v3910_v0  ;;  %1135 = vmatprep.subr.bf16.mxu1 %v3915_v1 }
  0x54   : > { %1096 = vmatprep.subr.bf16.mxu0 %v3922_v2  ;;  %1136 = vmatpush1.bf16.msra.mxu1 %v3927_v3 }
  0x55   : > { %1137 = vmatprep.subr.bf16.mxu1 %v3932_v5 }
  0x57   : > { %1097 = vmatpush1.bf16.msra.mxu0 %v3941_v6 }
  0x58   : > { %1138 = vmatpush1.bf16.msra.mxu1 %v3948_v7  ;;  %1193 = vmatprep.subr.bf16.mxu0 %v3752_v35 }
  0x59   : > { %666 = vmatmul.mubr.bf16.gmra.mrb[16].mxu0 %v3254_v8  ;;  %779 = vmatmul.mubr.bf16.gmra.mrb[16].mxu1 %v3254_v8 }
  0x5a   : > { %675 = vmatprep.mubr.bf16.mxu0 %v5223_v4  ;;  %788 = vmatprep.mubr.bf16.mxu1 %v5223_v4 }
  0x5b   : > { %1234 = vmatprep.subr.bf16.mxu1 %v3757_v36 }
  0x61   : > { %676 = vmatmul.mubr.bf16.gmra.mrb[20].mxu0 %v3261_v9  ;;  %789 = vmatmul.mubr.bf16.gmra.mrb[20].mxu1 %v3261_v9 }
  0x62   : > { %685 = vmatprep.mubr.bf16.mxu0 %v5223_v4  ;;  %798 = vmatprep.mubr.bf16.mxu1 %v5223_v4 }
  0x69   : > { %686 = vmatmul.mubr.bf16.gmra.mrb[24].mxu0 %v3268_v10  ;;  %799 = vmatmul.mubr.bf16.gmra.mrb[24].mxu1 %v3268_v10 }
  0x6a   : > { %695 = vmatprep.mubr.bf16.mxu0 %v5223_v4  ;;  %808 = vmatprep.mubr.bf16.mxu1 %v5223_v4 }
  0x71   : > { %696 = vmatmul.mubr.bf16.gmra.mrb[28].mxu0 %v3275_v11  ;;  %809 = vmatmul.mubr.bf16.gmra.mrb[28].mxu1 %v3275_v11 }
  0x72   : > { %1114 = vmatprep.mubr.bf16.mxu0 %v5223_v4  ;;  %1155 = vmatprep.mubr.bf16.mxu1 %v5223_v4 }
  0x79   : > { %1115 = vmatmul.mubr.bf16.vlgmr.msra.gmra.mrb[32].mxu0 %v921_v13  ;;  %1156 = vmatmul.mubr.bf16.vlgmr.msra.gmra.mrb[32].mxu1 %v921_v13 }
  0x7a   : > { %1194 = vmatpush1.bf16.msra.mxu0 %v3763_v38  ;;  %1235 = vmatpush1.bf16.msra.mxu1 %v3775_v40 }
  0x7b   : > { %1195 = vmatprep.subr.bf16.mxu0 %v3770_v39  ;;  %1236 = vmatprep.subr.bf16.mxu1 %v3780_v41 }
  0x7c   : > { %1225 = vmatprep.mubr.bf16.mxu0 %v5223_v4  ;;  %1266 = vmatprep.mubr.bf16.mxu1 %v5223_v4 }
  0x7e   : > { %1196 = vmatpush1.bf16.msra.mxu0 %v3787_v42  ;;  %1237 = vmatpush1.bf16.msra.mxu1 %v3800_v44 }
  0x7f   : > { %1197 = vmatprep.subr.bf16.mxu0 %v3794_v43  ;;  %1238 = vmatprep.subr.bf16.mxu1 %v3814_v47 }
  0x82   : > { %1198 = vmatpush1.bf16.msra.mxu0 %v3809_v46  ;;  %1239 = vmatpush1.bf16.msra.mxu1 %v3825_v49 }
  0x83   : > { %1199 = vmatprep.subr.bf16.mxu0 %v3819_v48  ;;  %1240 = vmatprep.subr.bf16.mxu1 %v3830_v50 }
  0x86   : > { %1200 = vmatpush1.bf16.msra.mxu0 %v3839_v51  ;;  %1241 = vmatpush1.bf16.msra.mxu1 %v3851_v53 }
  0x87   : > { %1201 = vmatprep.subr.bf16.mxu0 %v3844_v52  ;;  %1242 = vmatprep.subr.bf16.mxu1 %v3864_v56 }
  0x8a   : > { %1202 = vmatpush1.bf16.msra.mxu0 %v3858_v55  ;;  %1243 = vmatpush1.bf16.msra.mxu1 %v3876_v58 }
  0x8b   : > { %1203 = vmatprep.subr.bf16.mxu0 %v3871_v57  ;;  %1244 = vmatprep.subr.bf16.mxu1 %v3881_v59 }
  0x8e   : > { %1204 = vmatpush1.bf16.msra.mxu0 %v3890_v60  ;;  %1245 = vmatpush1.bf16.msra.mxu1 %v3902_v62 }
  0x8f   : > { %1205 = vmatprep.subr.bf16.mxu0 %v3897_v61  ;;  %1246 = vmatprep.subr.bf16.mxu1 %v3915_v1 }
  0x92   : > { %1206 = vmatpush1.bf16.msra.mxu0 %v3910_v0  ;;  %1247 = vmatpush1.bf16.msra.mxu1 %v3927_v3 }
  0x93   : > { %1207 = vmatprep.subr.bf16.mxu0 %v3922_v2  ;;  %1248 = vmatprep.subr.bf16.mxu1 %v3932_v5 }
  0x96   : > { %1208 = vmatpush1.bf16.msra.mxu0 %v3941_v6  ;;  %1249 = vmatpush1.bf16.msra.mxu1 %v3948_v7 }
  0x97   : > { %1305 = vmatprep.subr.bf16.mxu0 %v3752_v35  ;;  %1346 = vmatprep.subr.bf16.mxu1 %v3757_v36 }
 0x10c   : > { %v4006_v22 = vpop.f32.mrb[0].mxu0  ;;  %v4008_v23 = vpop.f32.mrb[0].mxu1 }
 0x10d   : > { %v4014_v26 = vpop.f32.mrb[1].mxu0  ;;  %v4016_v27 = vpop.f32.mrb[1].mxu1 }
 0x10e   : > { %v631_v29 = vpop.f32.mrb[2].mxu0  ;;  %v744_v30 = vpop.f32.mrb[2].mxu1 }
 0x10f   : > { %v4021_v31 = vadd.f32 %v631_v29, %v4012_v25  ;;  %v633_v32 = vpop.f32.mrb[3].mxu0  ;;  %v4024_v33 = vadd.f32 %v744_v30, %v4004_v21  ;;  %v746_v34 = vpop.f32.mrb[3].mxu1 }
 0x110   : > { %v4027_v37 = vadd.f32 %v633_v32, %v4018_v28  ;;  %v4030_v45 = vadd.f32 %v746_v34, %v4010_v24 }
 0x114   : > { %v637_v54 = vpop.f32.mrb[4].mxu0  ;;  %v750_v63 = vpop.f32.mrb[4].mxu1 }
 0x115   : > { %v4033_v8 = vadd.f32 %v637_v54, %v4012_v25  ;;  %v639_v9 = vpop.f32.mrb[5].mxu0  ;;  %v4036_v10 = vadd.f32 %v750_v63, %v4004_v21  ;;  %v752_v11 = vpop.f32.mrb[5].mxu1 }
 0x116   : > { %v4039_v12 = vadd.f32 %v639_v9, %v4018_v28  ;;  %v641_v13 = vpop.f32.mrb[6].mxu0  ;;  %v4042_v14 = vadd.f32 %v752_v11, %v4010_v24  ;;  %v754_v15 = vpop.f32.mrb[6].mxu1 }
 0x117   : > { %v4045_v16 = vadd.f32 %v641_v13, %v4012_v25  ;;  %v643_v17 = vpop.f32.mrb[7].mxu0  ;;  %v4048_v18 = vadd.f32 %v754_v15, %v4004_v21  ;;  %v756_v19 = vpop.f32.mrb[7].mxu1 }
 0x118   : > { %v4051_v20 = vadd.f32 %v643_v17, %v4018_v28  ;;  %v4054_v29 = vadd.f32 %v756_v19, %v4010_v24 }
 0x119   : > { %5225 = vst [vmem:[#allocation12_spill] sm:$0xff] %v4048_v18 }
 0x11a   : > { %5226 = vst [vmem:[#allocation13_spill] sm:$0xff] %v4051_v20  ;;  %5227 = vst [vmem:[#allocation14_spill] sm:$0xff] %v4054_v29 }
 0x11c   : > { %v647_v30 = vpop.f32.mrb[8].mxu0  ;;  %v760_v32 = vpop.f32.mrb[8].mxu1 }
 0x11d   : > { %v4057_v34 = vadd.f32 %v647_v30, %v4012_v25  ;;  %v649_v54 = vpop.f32.mrb[9].mxu0  ;;  %v4060_v63 = vadd.f32 %v760_v32, %v4004_v21  ;;  %v762_v9 = vpop.f32.mrb[9].mxu1 }
 0x11e   : > { %v4063_v11 = vadd.f32 %v649_v54, %v4018_v28  ;;  %v651_v13 = vpop.f32.mrb[10].mxu0  ;;  %v4066_v15 = vadd.f32 %v762_v9, %v4010_v24  ;;  %v764_v17 = vpop.f32.mrb[10].mxu1 }
 0x11f   : > { %5228 = vst [vmem:[#allocation15_spill] sm:$0xff] %v4057_v34  ;;  %5229 = vst [vmem:[#allocation16_spill] sm:$0xff] %v4060_v63  ;;  %v4069_v19 = vadd.f32 %v651_v13, %v4012_v25  ;;  %v653_v4 = vpop.f32.mrb[11].mxu0  ;;  %v4072_v30 = vadd.f32 %v764_v17, %v4004_v21  ;;  %v766_v34 = vpop.f32.mrb[11].mxu1 }
 0x120   : > { %5230 = vst [vmem:[#allocation17_spill] sm:$0xff] %v4063_v11  ;;  %5231 = vst [vmem:[#allocation18_spill] sm:$0xff] %v4066_v15  ;;  %v4075_v32 = vadd.f32 %v653_v4, %v4018_v28  ;;  %v4078_v63 = vadd.f32 %v766_v34, %v4010_v24 }
 0x121   : > { %5232 = vst [vmem:[#allocation19_spill] sm:$0xff] %v4069_v19  ;;  %5233 = vst [vmem:[#allocation20_spill] sm:$0xff] %v4072_v30 }
 0x122   : > { %5234 = vst [vmem:[#allocation21_spill] sm:$0xff] %v4075_v32  ;;  %5235 = vst [vmem:[#allocation22_spill] sm:$0xff] %v4078_v63 }
 0x124   : > { %v657_v54 = vpop.f32.mrb[12].mxu0  ;;  %v770_v11 = vpop.f32.mrb[12].mxu1 }
 0x125   : > { %v4081_v9 = vadd.f32 %v657_v54, %v4012_v25  ;;  %v659_v15 = vpop.f32.mrb[13].mxu0  ;;  %v4084_v13 = vadd.f32 %v770_v11, %v4004_v21  ;;  %v772_v19 = vpop.f32.mrb[13].mxu1 }
 0x126   : > { %v4087_v17 = vadd.f32 %v659_v15, %v4018_v28  ;;  %v661_v30 = vpop.f32.mrb[14].mxu0  ;;  %v4090_v4 = vadd.f32 %v772_v19, %v4010_v24  ;;  %v774_v32 = vpop.f32.mrb[14].mxu1 }
 0x127   : > { %5236 = vst [vmem:[#allocation23_spill] sm:$0xff] %v4081_v9  ;;  %5237 = vst [vmem:[#allocation24_spill] sm:$0xff] %v4084_v13  ;;  %v4093_v34 = vadd.f32 %v661_v30, %v4012_v25  ;;  %v663_v63 = vpop.f32.mrb[15].mxu0  ;;  %v4096_v54 = vadd.f32 %v774_v32, %v4004_v21  ;;  %v776_v9 = vpop.f32.mrb[15].mxu1 }
 0x128   : > { %5238 = vst [vmem:[#allocation25_spill] sm:$0xff] %v4087_v17  ;;  %5239 = vst [vmem:[#allocation26_spill] sm:$0xff] %v4090_v4  ;;  %v4099_v11 = vadd.f32 %v663_v63, %v4018_v28  ;;  %v4102_v13 = vadd.f32 %v776_v9, %v4010_v24 }
 0x129   : > { %5240 = vst [vmem:[#allocation27_spill] sm:$0xff] %v4093_v34  ;;  %5241 = vst [vmem:[#allocation28_spill] sm:$0xff] %v4096_v54 }
 0x12a   : > { %5242 = vst [vmem:[#allocation29_spill] sm:$0xff] %v4099_v11  ;;  %5243 = vst [vmem:[#allocation30_spill] sm:$0xff] %v4102_v13 }
 0x12c   : > { %v667_v15 = vpop.f32.mrb[16].mxu0  ;;  %v780_v17 = vpop.f32.mrb[16].mxu1 }
 0x12d   : > { %v4105_v19 = vadd.f32 %v667_v15, %v4012_v25  ;;  %v669_v4 = vpop.f32.mrb[17].mxu0  ;;  %v4108_v30 = vadd.f32 %v780_v17, %v4004_v21  ;;  %v782_v34 = vpop.f32.mrb[17].mxu1 }
 0x12e   : > { %v4111_v32 = vadd.f32 %v669_v4, %v4018_v28  ;;  %v671_v54 = vpop.f32.mrb[18].mxu0  ;;  %v4114_v63 = vadd.f32 %v782_v34, %v4010_v24  ;;  %v784_v11 = vpop.f32.mrb[18].mxu1 }
 0x12f   : > { %5244 = vst [vmem:[#allocation31_spill] sm:$0xff] %v4105_v19  ;;  %5245 = vst [vmem:[#allocation32_spill] sm:$0xff] %v4108_v30  ;;  %v4117_v9 = vadd.f32 %v671_v54, %v4012_v25  ;;  %v673_v13 = vpop.f32.mrb[19].mxu0  ;;  %v4120_v15 = vadd.f32 %v784_v11, %v4004_v21  ;;  %v786_v19 = vpop.f32.mrb[19].mxu1 }
 0x130   : > { %5246 = vst [vmem:[#allocation33_spill] sm:$0xff] %v4111_v32  ;;  %5247 = vst [vmem:[#allocation34_spill] sm:$0xff] %v4114_v63  ;;  %v4123_v17 = vadd.f32 %v673_v13, %v4018_v28  ;;  %v4126_v30 = vadd.f32 %v786_v19, %v4010_v24 }
 0x131   : > { %5248 = vst [vmem:[#allocation35_spill] sm:$0xff] %v4117_v9  ;;  %5249 = vst [vmem:[#allocation36_spill] sm:$0xff] %v4120_v15 }
 0x132   : > { %5250 = vst [vmem:[#allocation37_spill] sm:$0xff] %v4123_v17  ;;  %5251 = vst [vmem:[#allocation38_spill] sm:$0xff] %v4126_v30 }
 0x134   : > { %v677_v4 = vpop.f32.mrb[20].mxu0  ;;  %v790_v32 = vpop.f32.mrb[20].mxu1 }
 0x135   : > { %v4129_v34 = vadd.f32 %v677_v4, %v4012_v25  ;;  %v679_v63 = vpop.f32.mrb[21].mxu0  ;;  %v4132_v54 = vadd.f32 %v790_v32, %v4004_v21  ;;  %v792_v9 = vpop.f32.mrb[21].mxu1 }
 0x136   : > { %v4135_v11 = vadd.f32 %v679_v63, %v4018_v28  ;;  %v681_v15 = vpop.f32.mrb[22].mxu0  ;;  %v4138_v13 = vadd.f32 %v792_v9, %v4010_v24  ;;  %v794_v17 = vpop.f32.mrb[22].mxu1 }
 0x137   : > { %5252 = vst [vmem:[#allocation39_spill] sm:$0xff] %v4129_v34  ;;  %5253 = vst [vmem:[#allocation40_spill] sm:$0xff] %v4132_v54  ;;  %v4141_v19 = vadd.f32 %v681_v15, %v4012_v25  ;;  %v683_v30 = vpop.f32.mrb[23].mxu0  ;;  %v4144_v4 = vadd.f32 %v794_v17, %v4004_v21  ;;  %v796_v34 = vpop.f32.mrb[23].mxu1 }
 0x138   : > { %5254 = vst [vmem:[#allocation41_spill] sm:$0xff] %v4135_v11  ;;  %5255 = vst [vmem:[#allocation42_spill] sm:$0xff] %v4138_v13  ;;  %v4147_v32 = vadd.f32 %v683_v30, %v4018_v28  ;;  %v4150_v54 = vadd.f32 %v796_v34, %v4010_v24 }
 0x139   : > { %5256 = vst [vmem:[#allocation43_spill] sm:$0xff] %v4141_v19  ;;  %5257 = vst [vmem:[#allocation44_spill] sm:$0xff] %v4144_v4 }
 0x13a   : > { %5258 = vst [vmem:[#allocation45_spill] sm:$0xff] %v4147_v32  ;;  %5259 = vst [vmem:[#allocation46_spill] sm:$0xff] %v4150_v54 }
 0x13c   : > { %v687_v63 = vpop.f32.mrb[24].mxu0  ;;  %v800_v11 = vpop.f32.mrb[24].mxu1 }
 0x13d   : > { %v4153_v9 = vadd.f32 %v687_v63, %v4012_v25  ;;  %v689_v13 = vpop.f32.mrb[25].mxu0  ;;  %v4156_v15 = vadd.f32 %v800_v11, %v4004_v21  ;;  %v802_v19 = vpop.f32.mrb[25].mxu1 }
 0x13e   : > { %v4159_v17 = vadd.f32 %v689_v13, %v4018_v28  ;;  %v691_v4 = vpop.f32.mrb[26].mxu0  ;;  %v4162_v30 = vadd.f32 %v802_v19, %v4010_v24  ;;  %v804_v32 = vpop.f32.mrb[26].mxu1 }
 0x13f   : > { %5260 = vst [vmem:[#allocation47_spill] sm:$0xff] %v4153_v9  ;;  %5261 = vst [vmem:[#allocation48_spill] sm:$0xff] %v4156_v15  ;;  %v4165_v34 = vadd.f32 %v691_v4, %v4012_v25  ;;  %v693_v54 = vpop.f32.mrb[27].mxu0  ;;  %v4168_v63 = vadd.f32 %v804_v32, %v4004_v21  ;;  %v806_v9 = vpop.f32.mrb[27].mxu1 }
 0x140   : > { %5262 = vst [vmem:[#allocation49_spill] sm:$0xff] %v4159_v17  ;;  %5263 = vst [vmem:[#allocation50_spill] sm:$0xff] %v4162_v30  ;;  %v4171_v11 = vadd.f32 %v693_v54, %v4018_v28  ;;  %v4174_v15 = vadd.f32 %v806_v9, %v4010_v24 }
 0x141   : > { %5264 = vst [vmem:[#allocation51_spill] sm:$0xff] %v4165_v34  ;;  %5265 = vst [vmem:[#allocation52_spill] sm:$0xff] %v4168_v63 }
 0x142   : > { %5266 = vst [vmem:[#allocation53_spill] sm:$0xff] %v4171_v11  ;;  %5267 = vst [vmem:[#allocation54_spill] sm:$0xff] %v4174_v15 }
 0x144   : > { %v697_v13 = vpop.f32.mrb[28].mxu0  ;;  %v810_v17 = vpop.f32.mrb[28].mxu1 }
 0x145   : > { %v4177_v19 = vadd.f32 %v697_v13, %v4012_v25  ;;  %v699_v30 = vpop.f32.mrb[29].mxu0  ;;  %v4180_v4 = vadd.f32 %v810_v17, %v4004_v21  ;;  %v812_v34 = vpop.f32.mrb[29].mxu1 }
 0x146   : > { %v4183_v32 = vadd.f32 %v699_v30, %v4018_v28  ;;  %v701_v63 = vpop.f32.mrb[30].mxu0  ;;  %v4186_v54 = vadd.f32 %v812_v34, %v4010_v24  ;;  %v814_v11 = vpop.f32.mrb[30].mxu1  ;;  %v628_v30 = vadd.f32 %v4006_v22, %v4012_v25  ;;  %v741_v34 = vadd.f32 %v4008_v23, %v4004_v21 }
 0x147   : > { %5268 = vst [vmem:[#allocation55_spill] sm:$0xff] %v4177_v19  ;;  %5269 = vst [vmem:[#allocation56_spill] sm:$0xff] %v4180_v4  ;;  %v4189_v9 = vadd.f32 %v701_v63, %v4012_v25  ;;  %v703_v15 = vpop.f32.mrb[31].mxu0  ;;  %v4192_v13 = vadd.f32 %v814_v11, %v4004_v21  ;;  %v816_v19 = vpop.f32.mrb[31].mxu1  ;;  %v630_v63 = vadd.f32 %v4014_v26, %v4018_v28 }
 0x148   : > { %5270 = vst [vmem:[#allocation57_spill] sm:$0xff] %v4183_v32  ;;  %5271 = vst [vmem:[#allocation58_spill] sm:$0xff] %v4186_v54  ;;  %v4195_v17 = vadd.f32 %v703_v15, %v4018_v28  ;;  %v4198_v4 = vadd.f32 %v816_v19, %v4010_v24  ;;  %v743_v11 = vadd.f32 %v4016_v27, %v4010_v24 }
 0x149   : > { %5272 = vst [vmem:[#allocation59_spill] sm:$0xff] %v4189_v9  ;;  %5273 = vst [vmem:[#allocation60_spill] sm:$0xff] %v4192_v13 }
 0x14a   : > { %5274 = vst [vmem:[#allocation61_spill] sm:$0xff] %v4195_v17  ;;  %5275 = vst [vmem:[#allocation62_spill] sm:$0xff] %v4198_v4 }
 0x14c   : > { %v1116_v13 = vpop.f32.mrb[32].mxu0  ;;  %v1157_v9 = vpop.f32.mrb[32].mxu1 }
 0x14d   : > { %v1164_v54 = vadd.f32 %v1116_v13, %v628_v30  ;;  %v1166_v15 = vadd.f32 %v1157_v9, %v741_v34  ;;  %v1118_v17 = vpop.f32.mrb[33].mxu0  ;;  %v1159_v32 = vpop.f32.mrb[33].mxu1  ;;  %v916_v13 = vld [vmem:[#allocation5] sm:$0xff] }
 0x14e   : > { %v1165_v19 = vadd.f32 %v1118_v17, %v630_v63  ;;  %v1167_v4 = vadd.f32 %v1159_v32, %v743_v11  ;;  %v1120_v29 = vpop.f32.mrb[34].mxu0  ;;  %v1161_v20 = vpop.f32.mrb[34].mxu1 }
 0x14f   : > { %v1168_v22 = vmul.f32 0.5, %v1164_v54  ;;  %v1121_v25 = vpop.f32.mrb[35].mxu0  ;;  %v1162_v18 = vpop.f32.mrb[35].mxu1 }
 0x150   : > { %v1172_v21 = vmul.f32 0.5, %v1165_v19  ;;  %v1177_v23 = vmul.f32 0.5, %v1167_v4 }
 0x151   : > { %3283 = vtanh.f32 %v1168_v22 }
 0x152   : > { %3285 = vtanh.f32 %v1172_v21 }
 0x153   : > { %3287 = vtanh.f32 %v1166_v15  ;;  %v5276_v15 = vmov 0  }
 0x154   : > { %3289 = vtanh.f32 %v1177_v23 }
 0x15b   : > { %v3284_v26 = vpop.eup %3283 }
 0x15c   : > { %v3286_v24 = vpop.eup %3285  ;;  %v1170_v27 = vmul.f32 0.5, %v3284_v26 }
 0x15d   : > { %v1174_v28 = vmul.f32 0.5, %v3286_v24  ;;  %v3288_v30 = vpop.eup %3287 }
 0x15e   : > { %v1171_v9 = vadd.f32 0.5, %v1170_v27  ;;  %v3290_v18 = vpop.eup %3289 }
 0x15f   : > { %v1175_v17 = vadd.f32 0.5, %v1174_v28  ;;  %v1179_v54 = vmul.f32 0.5, %v3290_v18 }
 0x160   : > { %v1182_v32 = vmul.f32 %v3288_v30, %v1171_v9 }
 0x161   : > { %v1181_v29 = vmul.f32 %v1175_v17, %v916_v13  ;;  %v1180_v34 = vadd.f32 0.5, %v1179_v54 }
 0x163   : > { %v4208_v20 = vadd.f32 %v1182_v32, %v1181_v29 }
 0x165   : > { %3291 = vtanh.f32 %v4208_v20 }
 0x16f   : > { %v3292_v63 = vpop.eup %3291 }
 0x170   : > { %v4211_v4 = vmul.f32 %v3292_v63, %v1180_v34 }
 0x172   : > { %v1192_v11 = vpack.c.bf16 %v4211_v4, %v4211_v4 }
 0x174   : > { %1226 = vmatmul.mubr.bf16.vlgmr.msra.gmra.mrb[36].mxu0 %v1192_v11  ;;  %1267 = vmatmul.mubr.bf16.vlgmr.msra.gmra.mrb[36].mxu1 %v1192_v11 }
 0x175   : > { %1306 = vmatpush1.bf16.msra.mxu0 %v3763_v38  ;;  %1347 = vmatpush1.bf16.msra.mxu1 %v3775_v40 }
 0x176   : > { %1307 = vmatprep.subr.bf16.mxu0 %v3770_v39  ;;  %1348 = vmatprep.subr.bf16.mxu1 %v3780_v41 }
 0x177   : > { %1337 = vmatprep.mubr.bf16.mxu0 %v5276_v15  ;;  %1378 = vmatprep.mubr.bf16.mxu1 %v5276_v15 }
 0x179   : > { %1308 = vmatpush1.bf16.msra.mxu0 %v3787_v42  ;;  %1349 = vmatpush1.bf16.msra.mxu1 %v3800_v44 }
 0x17a   : > { %1309 = vmatprep.subr.bf16.mxu0 %v3794_v43  ;;  %1350 = vmatprep.subr.bf16.mxu1 %v3814_v47 }
 0x17d   : > { %1310 = vmatpush1.bf16.msra.mxu0 %v3809_v46  ;;  %1351 = vmatpush1.bf16.msra.mxu1 %v3825_v49 }
 0x17e   : > { %1311 = vmatprep.subr.bf16.mxu0 %v3819_v48  ;;  %1352 = vmatprep.subr.bf16.mxu1 %v3830_v50 }
 0x181   : > { %1312 = vmatpush1.bf16.msra.mxu0 %v3839_v51  ;;  %1353 = vmatpush1.bf16.msra.mxu1 %v3851_v53 }
 0x182   : > { %1313 = vmatprep.subr.bf16.mxu0 %v3844_v52  ;;  %1354 = vmatprep.subr.bf16.mxu1 %v3864_v56 }
 0x185   : > { %1314 = vmatpush1.bf16.msra.mxu0 %v3858_v55  ;;  %1355 = vmatpush1.bf16.msra.mxu1 %v3876_v58 }
 0x186   : > { %1315 = vmatprep.subr.bf16.mxu0 %v3871_v57  ;;  %1356 = vmatprep.subr.bf16.mxu1 %v3881_v59 }
 0x189   : > { %1316 = vmatpush1.bf16.msra.mxu0 %v3890_v60  ;;  %1357 = vmatpush1.bf16.msra.mxu1 %v3902_v62 }
 0x18a   : > { %1317 = vmatprep.subr.bf16.mxu0 %v3897_v61  ;;  %1358 = vmatprep.subr.bf16.mxu1 %v3915_v1 }
 0x18d   : > { %1318 = vmatpush1.bf16.msra.mxu0 %v3910_v0  ;;  %1359 = vmatpush1.bf16.msra.mxu1 %v3927_v3 }
 0x18e   : > { %1319 = vmatprep.subr.bf16.mxu0 %v3922_v2  ;;  %1360 = vmatprep.subr.bf16.mxu1 %v3932_v5 }
 0x191   : > { %1320 = vmatpush1.bf16.msra.mxu0 %v3941_v6  ;;  %1361 = vmatpush1.bf16.msra.mxu1 %v3948_v7 }
 0x192   : > { %1417 = vmatprep.subr.bf16.mxu0 %v3752_v35  ;;  %1458 = vmatprep.subr.bf16.mxu1 %v3757_v36 }
 0x247   : > { %v1227_v19 = vpop.f32.mrb[36].mxu0  ;;  %v1268_v22 = vpop.f32.mrb[36].mxu1 }
 0x248   : > { %v1275_v25 = vadd.f32 %v1227_v19, %v4021_v31  ;;  %v1277_v21 = vadd.f32 %v1268_v22, %v4024_v33  ;;  %v1229_v23 = vpop.f32.mrb[37].mxu0  ;;  %v1270_v26 = vpop.f32.mrb[37].mxu1 }
 0x249   : > { %v1276_v24 = vadd.f32 %v1229_v23, %v4027_v37  ;;  %v1278_v27 = vadd.f32 %v1270_v26, %v4030_v45  ;;  %v1231_v28 = vpop.f32.mrb[38].mxu0  ;;  %v1272_v9 = vpop.f32.mrb[38].mxu1 }
 0x24a   : > { %v1279_v13 = vmul.f32 0.5, %v1275_v25  ;;  %v1232_v30 = vpop.f32.mrb[39].mxu0  ;;  %v1273_v17 = vpop.f32.mrb[39].mxu1 }
 0x24b   : > { %v1283_v32 = vmul.f32 0.5, %v1276_v24  ;;  %v1288_v29 = vmul.f32 0.5, %v1278_v27 }
 0x24c   : > { %3293 = vtanh.f32 %v1279_v13 }
 0x24d   : > { %3295 = vtanh.f32 %v1283_v32 }
 0x24e   : > { %3297 = vtanh.f32 %v1277_v21 }
 0x24f   : > { %3299 = vtanh.f32 %v1288_v29 }
 0x256   : > { %v3294_v18 = vpop.eup %3293 }
 0x257   : > { %v3296_v31 = vpop.eup %3295  ;;  %v1281_v54 = vmul.f32 0.5, %v3294_v18 }
 0x258   : > { %v1285_v33 = vmul.f32 0.5, %v3296_v31  ;;  %v3298_v37 = vpop.eup %3297 }
 0x259   : > { %v1282_v34 = vadd.f32 0.5, %v1281_v54  ;;  %v3300_v22 = vpop.eup %3299 }
 0x25a   : > { %v1286_v63 = vadd.f32 0.5, %v1285_v33  ;;  %v1290_v25 = vmul.f32 0.5, %v3300_v22 }
 0x25b   : > { %v1293_v45 = vmul.f32 %v3298_v37, %v1282_v34 }
 0x25c   : > { %v1292_v11 = vmul.f32 %v1286_v63, %v4208_v20  ;;  %v1291_v21 = vadd.f32 0.5, %v1290_v25 }
 0x25e   : > { %v4254_v19 = vadd.f32 %v1293_v45, %v1292_v11 }
 0x260   : > { %3301 = vtanh.f32 %v4254_v19 }
 0x26a   : > { %v3302_v23 = vpop.eup %3301 }
 0x26b   : > { %v1296_v26 = vmul.f32 %v3302_v23, %v1291_v21 }
 0x26d   : > { %v3112_v24 = vpack.c.bf16 %v1296_v26, %v4211_v4  ;;  %v1304_v27 = vpack.c.bf16 %v1296_v26, %v1296_v26 }
 0x26f   : > { %3113 = vst [vmem:[%s3642_s14] sm:$0xff] %v3112_v24   ;;  %1338 = vmatmul.mubr.bf16.vlgmr.msra.gmra.mrb[40].mxu0 %v1304_v27  ;;  %1379 = vmatmul.mubr.bf16.vlgmr.msra.gmra.mrb[40].mxu1 %v1304_v27 }
 0x270   : > { %1418 = vmatpush1.bf16.msra.mxu0 %v3763_v38  ;;  %1459 = vmatpush1.bf16.msra.mxu1 %v3775_v40 }
 0x271   : > { %1419 = vmatprep.subr.bf16.mxu0 %v3770_v39  ;;  %1460 = vmatprep.subr.bf16.mxu1 %v3780_v41 }
 0x272   : > { %1449 = vmatprep.mubr.bf16.mxu0 %v5276_v15  ;;  %1490 = vmatprep.mubr.bf16.mxu1 %v5276_v15 }
 0x274   : > { %1420 = vmatpush1.bf16.msra.mxu0 %v3787_v42  ;;  %1461 = vmatpush1.bf16.msra.mxu1 %v3800_v44 }
 0x275   : > { %1421 = vmatprep.subr.bf16.mxu0 %v3794_v43  ;;  %1462 = vmatprep.subr.bf16.mxu1 %v3814_v47 }
 0x278   : > { %1422 = vmatpush1.bf16.msra.mxu0 %v3809_v46  ;;  %1463 = vmatpush1.bf16.msra.mxu1 %v3825_v49 }
 0x279   : > { %1423 = vmatprep.subr.bf16.mxu0 %v3819_v48  ;;  %1464 = vmatprep.subr.bf16.mxu1 %v3830_v50 }
 0x27c   : > { %1424 = vmatpush1.bf16.msra.mxu0 %v3839_v51  ;;  %1465 = vmatpush1.bf16.msra.mxu1 %v3851_v53 }
 0x27d   : > { %1425 = vmatprep.subr.bf16.mxu0 %v3844_v52  ;;  %1466 = vmatprep.subr.bf16.mxu1 %v3864_v56 }
 0x280   : > { %1426 = vmatpush1.bf16.msra.mxu0 %v3858_v55  ;;  %1467 = vmatpush1.bf16.msra.mxu1 %v3876_v58 }
 0x281   : > { %1427 = vmatprep.subr.bf16.mxu0 %v3871_v57  ;;  %1468 = vmatprep.subr.bf16.mxu1 %v3881_v59 }
 0x284   : > { %1428 = vmatpush1.bf16.msra.mxu0 %v3890_v60  ;;  %1469 = vmatpush1.bf16.msra.mxu1 %v3902_v62 }
 0x285   : > { %1429 = vmatprep.subr.bf16.mxu0 %v3897_v61  ;;  %1470 = vmatprep.subr.bf16.mxu1 %v3915_v1 }
 0x288   : > { %1430 = vmatpush1.bf16.msra.mxu0 %v3910_v0  ;;  %1471 = vmatpush1.bf16.msra.mxu1 %v3927_v3 }
 0x289   : > { %1431 = vmatprep.subr.bf16.mxu0 %v3922_v2  ;;  %1472 = vmatprep.subr.bf16.mxu1 %v3932_v5 }
 0x28c   : > { %1432 = vmatpush1.bf16.msra.mxu0 %v3941_v6  ;;  %1473 = vmatpush1.bf16.msra.mxu1 %v3948_v7 }
 0x28d   : > { %1529 = vmatprep.subr.bf16.mxu0 %v3752_v35  ;;  %1570 = vmatprep.subr.bf16.mxu1 %v3757_v36 }
 0x342   : > { %v1339_v20 = vpop.f32.mrb[40].mxu0  ;;  %v1380_v4 = vpop.f32.mrb[40].mxu1 }
 0x343   : > { %v1387_v28 = vadd.f32 %v1339_v20, %v4033_v8  ;;  %v1389_v9 = vadd.f32 %v1380_v4, %v4036_v10  ;;  %v1341_v13 = vpop.f32.mrb[41].mxu0  ;;  %v1382_v30 = vpop.f32.mrb[41].mxu1 }
 0x344   : > { %v1388_v17 = vadd.f32 %v1341_v13, %v4039_v12  ;;  %v1390_v32 = vadd.f32 %v1382_v30, %v4042_v14  ;;  %v1343_v29 = vpop.f32.mrb[42].mxu0  ;;  %v1384_v18 = vpop.f32.mrb[42].mxu1 }
 0x345   : > { %v1391_v31 = vmul.f32 0.5, %v1387_v28  ;;  %v1344_v54 = vpop.f32.mrb[43].mxu0  ;;  %v1385_v33 = vpop.f32.mrb[43].mxu1 }
 0x346   : > { %v1395_v35 = vmul.f32 0.5, %v1388_v17  ;;  %v1400_v36 = vmul.f32 0.5, %v1390_v32 }
 0x347   : > { %3303 = vtanh.f32 %v1391_v31 }
 0x348   : > { %3305 = vtanh.f32 %v1395_v35 }
 0x349   : > { %3307 = vtanh.f32 %v1389_v9 }
 0x34a   : > { %3309 = vtanh.f32 %v1400_v36 }
 0x351   : > { %v3304_v34 = vpop.eup %3303 }
 0x352   : > { %v3306_v8 = vpop.eup %3305  ;;  %v1393_v37 = vmul.f32 0.5, %v3304_v34  ;;  %v4362_v34 = vld [vmem:[%s5219_s5] ss:$16 sps:$4 sm:$0xff]  }
 0x353   : > { %v1397_v10 = vmul.f32 0.5, %v3306_v8  ;;  %v3308_v45 = vpop.eup %3307  ;;  %v4368_v8 = vld [vmem:[%s5219_s5 + $0x8] ss:$16 sps:$4 sm:$0xff]  }
 0x354   : > { %v1394_v63 = vadd.f32 0.5, %v1393_v37  ;;  %v3310_v25 = vpop.eup %3309  ;;  %v4374_v37 = vld [vmem:[%s5219_s5 + $0x24] ss:$16 sps:$4 sm:$0xff]  }
 0x355   : > { %v1398_v12 = vadd.f32 0.5, %v1397_v10  ;;  %v1402_v21 = vmul.f32 0.5, %v3310_v25  ;;  %v4380_v10 = vld [vmem:[%s5219_s5 + $0x2c] ss:$16 sps:$4 sm:$0xff]   ;;  %v4424_v25 = vld [vmem:[%s5219_s5 + $0x64] ss:$16 sps:$4 sm:$0xff]  }
 0x356   : > { %v1405_v11 = vmul.f32 %v3308_v45, %v1394_v63  ;;  %v4388_v63 = vld [vmem:[%s5219_s5 + $0x20] ss:$16 sps:$4 sm:$0xff]   ;;  %v4394_v45 = vld [vmem:[%s5219_s5 + $0x28] ss:$16 sps:$4 sm:$0xff]  }
 0x357   : > { %v1404_v14 = vmul.f32 %v1398_v12, %v4254_v19  ;;  %v1403_v23 = vadd.f32 0.5, %v1402_v21  ;;  %v4400_v12 = vld [vmem:[%s5219_s5 + $0x44] ss:$16 sps:$4 sm:$0xff]   ;;  %v4430_v21 = vld [vmem:[%s5219_s5 + $0x6c] ss:$16 sps:$4 sm:$0xff]  }
 0x359   : > { %v4298_v22 = vadd.f32 %v1405_v11, %v1404_v14  ;;  %v4406_v11 = vld [vmem:[%s5219_s5 + $0x4c] ss:$16 sps:$4 sm:$0xff]   ;;  %v4412_v14 = vld [vmem:[%s5219_s5 + $0x40] ss:$16 sps:$4 sm:$0xff]  }
 0x35b   : > { %3311 = vtanh.f32 %v4298_v22 }
 0x365   : > { %v3312_v26 = vpop.eup %3311 }
 0x366   : > { %v4301_v24 = vmul.f32 %v3312_v26, %v1403_v23  ;;  %v4436_v23 = vld [vmem:[%s5219_s5 + $0x60] ss:$16 sps:$4 sm:$0xff]   ;;  %v4442_v26 = vld [vmem:[%s5219_s5 + $0x68] ss:$16 sps:$4 sm:$0xff]  }
 0x368   : > { %v1416_v27 = vpack.c.bf16 %v4301_v24, %v4301_v24 }
 0x36a   : > { %1450 = vmatmul.mubr.bf16.vlgmr.msra.gmra.mrb[44].mxu0 %v1416_v27  ;;  %1491 = vmatmul.mubr.bf16.vlgmr.msra.gmra.mrb[44].mxu1 %v1416_v27  ;;  %v4454_v27 = vld [vmem:[%s5219_s5 + $0x8c] ss:$16 sps:$4 sm:$0xff]  }
 0x36b   : > { %1530 = vmatpush1.bf16.msra.mxu0 %v3763_v38  ;;  %1571 = vmatpush1.bf16.msra.mxu1 %v3775_v40  ;;  %v4340_v38 = vld [vmem:[%s5219_s5 + $0x4] ss:$16 sps:$4 sm:$0xff]  }
 0x36c   : > { %1531 = vmatprep.subr.bf16.mxu0 %v3770_v39  ;;  %1572 = vmatprep.subr.bf16.mxu1 %v3780_v41  ;;  %v4346_v39 = vld [vmem:[%s5219_s5 + $0xc] ss:$16 sps:$4 sm:$0xff]  }
 0x36d   : > { %1561 = vmatprep.mubr.bf16.mxu0 %v5276_v15  ;;  %1602 = vmatprep.mubr.bf16.mxu1 %v5276_v15 }
 0x36f   : > { %1532 = vmatpush1.bf16.msra.mxu0 %v3787_v42  ;;  %1573 = vmatpush1.bf16.msra.mxu1 %v3800_v44 }
 0x370   : > { %1533 = vmatprep.subr.bf16.mxu0 %v3794_v43  ;;  %1574 = vmatprep.subr.bf16.mxu1 %v3814_v47  ;;  %v5277_v43 = vld [vmem:[#allocation12_spill] sm:$0xff] }
 0x373   : > { %1534 = vmatpush1.bf16.msra.mxu0 %v3809_v46  ;;  %1575 = vmatpush1.bf16.msra.mxu1 %v3825_v49 }
 0x374   : > { %1535 = vmatprep.subr.bf16.mxu0 %v3819_v48  ;;  %1576 = vmatprep.subr.bf16.mxu1 %v3830_v50  ;;  %v5278_v48 = vld [vmem:[#allocation13_spill] sm:$0xff]  ;;  %v5279_v50 = vld [vmem:[#allocation14_spill] sm:$0xff] }
 0x377   : > { %1536 = vmatpush1.bf16.msra.mxu0 %v3839_v51  ;;  %1577 = vmatpush1.bf16.msra.mxu1 %v3851_v53 }
 0x378   : > { %1537 = vmatprep.subr.bf16.mxu0 %v3844_v52  ;;  %1578 = vmatprep.subr.bf16.mxu1 %v3864_v56 }
 0x37b   : > { %1538 = vmatpush1.bf16.msra.mxu0 %v3858_v55  ;;  %1579 = vmatpush1.bf16.msra.mxu1 %v3876_v58 }
 0x37c   : > { %1539 = vmatprep.subr.bf16.mxu0 %v3871_v57  ;;  %1580 = vmatprep.subr.bf16.mxu1 %v3881_v59 }
 0x37f   : > { %1540 = vmatpush1.bf16.msra.mxu0 %v3890_v60  ;;  %1581 = vmatpush1.bf16.msra.mxu1 %v3902_v62 }
 0x380   : > { %1541 = vmatprep.subr.bf16.mxu0 %v3897_v61  ;;  %1582 = vmatprep.subr.bf16.mxu1 %v3915_v1 }
 0x383   : > { %1542 = vmatpush1.bf16.msra.mxu0 %v3910_v0  ;;  %1583 = vmatpush1.bf16.msra.mxu1 %v3927_v3 }
 0x384   : > { %1543 = vmatprep.subr.bf16.mxu0 %v3922_v2  ;;  %1584 = vmatprep.subr.bf16.mxu1 %v3932_v5 }
 0x387   : > { %1544 = vmatpush1.bf16.msra.mxu0 %v3941_v6  ;;  %1585 = vmatpush1.bf16.msra.mxu1 %v3948_v7 }
 0x388   : > { %1641 = vmatprep.subr.bf16.mxu0 %v4340_v38  ;;  %1682 = vmatprep.subr.bf16.mxu1 %v4346_v39 }
 0x43d   : > { %v1451_v40 = vpop.f32.mrb[44].mxu0  ;;  %v1492_v41 = vpop.f32.mrb[44].mxu1 }
 0x43e   : > { %v1499_v42 = vadd.f32 %v1451_v40, %v4045_v16  ;;  %v1501_v44 = vadd.f32 %v1492_v41, %v5277_v43  ;;  %v1453_v46 = vpop.f32.mrb[45].mxu0  ;;  %v1494_v47 = vpop.f32.mrb[45].mxu1  ;;  %v4460_v40 = vld [vmem:[%s5219_s5 + $0x80] ss:$16 sps:$4 sm:$0xff]   ;;  %v4466_v41 = vld [vmem:[%s5219_s5 + $0x88] ss:$16 sps:$4 sm:$0xff]  }
 0x43f   : > { %v1500_v49 = vadd.f32 %v1453_v46, %v5278_v48  ;;  %v1502_v51 = vadd.f32 %v1494_v47, %v5279_v50  ;;  %v1455_v52 = vpop.f32.mrb[46].mxu0  ;;  %v1496_v53 = vpop.f32.mrb[46].mxu1  ;;  %v4478_v43 = vld [vmem:[%s5219_s5 + $0xac] ss:$16 sps:$4 sm:$0xff]   ;;  %v5283_v48 = vld [vmem:[#allocation18_spill] sm:$0xff] }
 0x440   : > { %v1503_v55 = vmul.f32 0.5, %v1499_v42  ;;  %v1456_v56 = vpop.f32.mrb[47].mxu0  ;;  %v1497_v57 = vpop.f32.mrb[47].mxu1  ;;  %v4472_v42 = vld [vmem:[%s5219_s5 + $0xa4] ss:$16 sps:$4 sm:$0xff]   ;;  %v5282_v47 = vld [vmem:[#allocation17_spill] sm:$0xff] }
 0x441   : > { %v1507_v58 = vmul.f32 0.5, %v1500_v49  ;;  %v1512_v59 = vmul.f32 0.5, %v1502_v51 }
 0x442   : > { %3313 = vtanh.f32 %v1503_v55 }
 0x443   : > { %3315 = vtanh.f32 %v1507_v58 }
 0x444   : > { %3317 = vtanh.f32 %v1501_v44  ;;  %v5281_v44 = vld [vmem:[#allocation16_spill] sm:$0xff] }
 0x445   : > { %3319 = vtanh.f32 %v1512_v59 }
 0x44c   : > { %v3314_v19 = vpop.eup %3313 }
 0x44d   : > { %v3316_v16 = vpop.eup %3315  ;;  %v1505_v20 = vmul.f32 0.5, %v3314_v19 }
 0x44e   : > { %v1509_v4 = vmul.f32 0.5, %v3316_v16  ;;  %v3318_v9 = vpop.eup %3317 }
 0x44f   : > { %v1506_v28 = vadd.f32 0.5, %v1505_v20  ;;  %v3320_v29 = vpop.eup %3319 }
 0x450   : > { %v1510_v13 = vadd.f32 0.5, %v1509_v4  ;;  %v1514_v18 = vmul.f32 0.5, %v3320_v29 }
 0x451   : > { %v1517_v30 = vmul.f32 %v3318_v9, %v1506_v28 }
 0x452   : > { %v1516_v17 = vmul.f32 %v1510_v13, %v4298_v22  ;;  %v1515_v31 = vadd.f32 0.5, %v1514_v18  ;;  %v4418_v22 = vld [vmem:[%s5219_s5 + $0x48] ss:$16 sps:$4 sm:$0xff]  }
 0x454   : > { %v4354_v32 = vadd.f32 %v1517_v30, %v1516_v17 }
 0x456   : > { %3321 = vtanh.f32 %v4354_v32 }
 0x460   : > { %v3322_v54 = vpop.eup %3321 }
 0x461   : > { %v1520_v33 = vmul.f32 %v3322_v54, %v1515_v31  ;;  %v4536_v31 = vld [vmem:[%s5219_s5 + $0xa8] ss:$16 sps:$4 sm:$0xff]   ;;  %v4542_v54 = vld [vmem:[%s5219_s5 + $0xc4] ss:$16 sps:$4 sm:$0xff]  }
 0x463   : > { %v3117_v35 = vpack.c.bf16 %v1520_v33, %v4301_v24  ;;  %v1528_v36 = vpack.c.bf16 %v1520_v33, %v1520_v33  ;;  %v4448_v24 = vld [vmem:[%s5219_s5 + $0x84] ss:$16 sps:$4 sm:$0xff]   ;;  %v4548_v33 = vld [vmem:[%s5219_s5 + $0xcc] ss:$16 sps:$4 sm:$0xff]  }
 0x465   : > { %3149 = vst [vmem:[%s3642_s14 + $0x8] sm:$0xff] %v3117_v35   ;;  %1562 = vmatmul.mubr.bf16.vlgmr.msra.gmra.mrb[48].mxu0 %v1528_v36  ;;  %1603 = vmatmul.mubr.bf16.vlgmr.msra.gmra.mrb[48].mxu1 %v1528_v36  ;;  %v4554_v35 = vld [vmem:[%s5219_s5 + $0xc0] ss:$16 sps:$4 sm:$0xff]   ;;  %v4560_v36 = vld [vmem:[%s5219_s5 + $0xc8] ss:$16 sps:$4 sm:$0xff]  }
 0x466   : > { %1642 = vmatpush1.bf16.msra.mxu0 %v4362_v34  ;;  %1683 = vmatpush1.bf16.msra.mxu1 %v4368_v8 }
 0x467   : > { %1643 = vmatprep.subr.bf16.mxu0 %v4374_v37  ;;  %1684 = vmatprep.subr.bf16.mxu1 %v4380_v10 }
 0x468   : > { %1673 = vmatprep.mubr.bf16.mxu0 %v5276_v15  ;;  %1714 = vmatprep.mubr.bf16.mxu1 %v5276_v15 }
 0x46a   : > { %1644 = vmatpush1.bf16.msra.mxu0 %v4388_v63  ;;  %1685 = vmatpush1.bf16.msra.mxu1 %v4394_v45 }
 0x46b   : > { %1645 = vmatprep.subr.bf16.mxu0 %v4400_v12  ;;  %1686 = vmatprep.subr.bf16.mxu1 %v4406_v11 }
 0x46e   : > { %1646 = vmatpush1.bf16.msra.mxu0 %v4412_v14  ;;  %1687 = vmatpush1.bf16.msra.mxu1 %v4418_v22 }
 0x46f   : > { %1647 = vmatprep.subr.bf16.mxu0 %v4424_v25  ;;  %1688 = vmatprep.subr.bf16.mxu1 %v4430_v21 }
 0x472   : > { %1648 = vmatpush1.bf16.msra.mxu0 %v4436_v23  ;;  %1689 = vmatpush1.bf16.msra.mxu1 %v4442_v26 }
 0x473   : > { %1649 = vmatprep.subr.bf16.mxu0 %v4448_v24  ;;  %1690 = vmatprep.subr.bf16.mxu1 %v4454_v27 }
 0x476   : > { %1650 = vmatpush1.bf16.msra.mxu0 %v4460_v40  ;;  %1691 = vmatpush1.bf16.msra.mxu1 %v4466_v41 }
 0x477   : > { %1651 = vmatprep.subr.bf16.mxu0 %v4472_v42  ;;  %1692 = vmatprep.subr.bf16.mxu1 %v4478_v43 }
 0x47a   : > { %1652 = vmatpush1.bf16.msra.mxu0 %v3890_v60  ;;  %1693 = vmatpush1.bf16.msra.mxu1 %v3902_v62  ;;  %v5280_v62 = vld [vmem:[#allocation15_spill] sm:$0xff] }
 0x47b   : > { %1653 = vmatprep.subr.bf16.mxu0 %v3897_v61  ;;  %1694 = vmatprep.subr.bf16.mxu1 %v3915_v1 }
 0x47e   : > { %1654 = vmatpush1.bf16.msra.mxu0 %v3910_v0  ;;  %1695 = vmatpush1.bf16.msra.mxu1 %v3927_v3 }
 0x47f   : > { %1655 = vmatprep.subr.bf16.mxu0 %v3922_v2  ;;  %1696 = vmatprep.subr.bf16.mxu1 %v3932_v5 }
 0x482   : > { %1656 = vmatpush1.bf16.msra.mxu0 %v3941_v6  ;;  %1697 = vmatpush1.bf16.msra.mxu1 %v3948_v7 }
 0x483   : > { %1753 = vmatprep.subr.bf16.mxu0 %v4340_v38  ;;  %1794 = vmatprep.subr.bf16.mxu1 %v4346_v39 }
 0x538   : > { %v1563_v60 = vpop.f32.mrb[48].mxu0  ;;  %v1604_v61 = vpop.f32.mrb[48].mxu1 }
 0x539   : > { %v1611_v1 = vadd.f32 %v1563_v60, %v5280_v62  ;;  %v1613_v0 = vadd.f32 %v1604_v61, %v5281_v44  ;;  %v1565_v46 = vpop.f32.mrb[49].mxu0  ;;  %v1606_v3 = vpop.f32.mrb[49].mxu1  ;;  %v4566_v60 = vld [vmem:[%s5219_s5 + $0xe4] ss:$16 sps:$4 sm:$0xff]   ;;  %v4572_v61 = vld [vmem:[%s5219_s5 + $0xec] ss:$16 sps:$4 sm:$0xff]  }
 0x53a   : > { %v1612_v2 = vadd.f32 %v1565_v46, %v5282_v47  ;;  %v1614_v5 = vadd.f32 %v1606_v3, %v5283_v48  ;;  %v1567_v49 = vpop.f32.mrb[50].mxu0  ;;  %v1608_v6 = vpop.f32.mrb[50].mxu1  ;;  %v4578_v62 = vld [vmem:[%s5219_s5 + $0xe0] ss:$16 sps:$4 sm:$0xff]   ;;  %v5284_v46 = vld [vmem:[#allocation19_spill] sm:$0xff] }
 0x53b   : > { %v1615_v50 = vmul.f32 0.5, %v1611_v1  ;;  %v1568_v7 = vpop.f32.mrb[51].mxu0  ;;  %v1609_v51 = vpop.f32.mrb[51].mxu1  ;;  %v4584_v1 = vld [vmem:[%s5219_s5 + $0xe8] ss:$16 sps:$4 sm:$0xff]   ;;  %v5285_v47 = vld [vmem:[#allocation20_spill] sm:$0xff] }
 0x53c   : > { %v1619_v52 = vmul.f32 0.5, %v1612_v2  ;;  %v1624_v53 = vmul.f32 0.5, %v1614_v5  ;;  %v5286_v49 = vld [vmem:[#allocation21_spill] sm:$0xff] }
 0x53d   : > { %3323 = vtanh.f32 %v1615_v50  ;;  %v5287_v50 = vld [vmem:[#allocation22_spill] sm:$0xff] }
 0x53e   : > { %3325 = vtanh.f32 %v1619_v52 }
 0x53f   : > { %3327 = vtanh.f32 %v1613_v0 }
 0x540   : > { %3329 = vtanh.f32 %v1624_v53 }
 0x547   : > { %v3324_v55 = vpop.eup %3323 }
 0x548   : > { %v3326_v56 = vpop.eup %3325  ;;  %v1617_v57 = vmul.f32 0.5, %v3324_v55 }
 0x549   : > { %v1621_v58 = vmul.f32 0.5, %v3326_v56  ;;  %v3328_v19 = vpop.eup %3327 }
 0x54a   : > { %v1618_v59 = vadd.f32 0.5, %v1617_v57  ;;  %v3330_v9 = vpop.eup %3329 }
 0x54b   : > { %v1622_v16 = vadd.f32 0.5, %v1621_v58  ;;  %v1626_v13 = vmul.f32 0.5, %v3330_v9 }
 0x54c   : > { %v1629_v20 = vmul.f32 %v3328_v19, %v1618_v59 }
 0x54d   : > { %v1628_v4 = vmul.f32 %v1622_v16, %v4354_v32  ;;  %v1627_v30 = vadd.f32 0.5, %v1626_v13  ;;  %v4530_v32 = vld [vmem:[%s5219_s5 + $0xa0] ss:$16 sps:$4 sm:$0xff]  }
 0x54f   : > { %v4498_v28 = vadd.f32 %v1629_v20, %v1628_v4 }
 0x551   : > { %3331 = vtanh.f32 %v4498_v28 }
 0x55b   : > { %v3332_v17 = vpop.eup %3331 }
 0x55c   : > { %v4501_v29 = vmul.f32 %v3332_v17, %v1627_v30 }
 0x55e   : > { %v1640_v18 = vpack.c.bf16 %v4501_v29, %v4501_v29 }
 0x560   : > { %1674 = vmatmul.mubr.bf16.vlgmr.msra.gmra.mrb[52].mxu0 %v1640_v18  ;;  %1715 = vmatmul.mubr.bf16.vlgmr.msra.gmra.mrb[52].mxu1 %v1640_v18 }
 0x561   : > { %1754 = vmatpush1.bf16.msra.mxu0 %v4362_v34  ;;  %1795 = vmatpush1.bf16.msra.mxu1 %v4368_v8 }
 0x562   : > { %1755 = vmatprep.subr.bf16.mxu0 %v4374_v37  ;;  %1796 = vmatprep.subr.bf16.mxu1 %v4380_v10 }
 0x563   : > { %1785 = vmatprep.mubr.bf16.mxu0 %v5276_v15  ;;  %1826 = vmatprep.mubr.bf16.mxu1 %v5276_v15 }
 0x565   : > { %1756 = vmatpush1.bf16.msra.mxu0 %v4388_v63  ;;  %1797 = vmatpush1.bf16.msra.mxu1 %v4394_v45 }
 0x566   : > { %1757 = vmatprep.subr.bf16.mxu0 %v4400_v12  ;;  %1798 = vmatprep.subr.bf16.mxu1 %v4406_v11 }
 0x569   : > { %1758 = vmatpush1.bf16.msra.mxu0 %v4412_v14  ;;  %1799 = vmatpush1.bf16.msra.mxu1 %v4418_v22 }
 0x56a   : > { %1759 = vmatprep.subr.bf16.mxu0 %v4424_v25  ;;  %1800 = vmatprep.subr.bf16.mxu1 %v4430_v21 }
 0x56d   : > { %1760 = vmatpush1.bf16.msra.mxu0 %v4436_v23  ;;  %1801 = vmatpush1.bf16.msra.mxu1 %v4442_v26 }
 0x56e   : > { %1761 = vmatprep.subr.bf16.mxu0 %v4448_v24  ;;  %1802 = vmatprep.subr.bf16.mxu1 %v4454_v27 }
 0x571   : > { %1762 = vmatpush1.bf16.msra.mxu0 %v4460_v40  ;;  %1803 = vmatpush1.bf16.msra.mxu1 %v4466_v41 }
 0x572   : > { %1763 = vmatprep.subr.bf16.mxu0 %v4472_v42  ;;  %1804 = vmatprep.subr.bf16.mxu1 %v4478_v43 }
 0x575   : > { %1764 = vmatpush1.bf16.msra.mxu0 %v4530_v32  ;;  %1805 = vmatpush1.bf16.msra.mxu1 %v4536_v31 }
 0x576   : > { %1765 = vmatprep.subr.bf16.mxu0 %v4542_v54  ;;  %1806 = vmatprep.subr.bf16.mxu1 %v4548_v33 }
 0x579   : > { %1766 = vmatpush1.bf16.msra.mxu0 %v4554_v35  ;;  %1807 = vmatpush1.bf16.msra.mxu1 %v4560_v36 }
 0x57a   : > { %1767 = vmatprep.subr.bf16.mxu0 %v4566_v60  ;;  %1808 = vmatprep.subr.bf16.mxu1 %v4572_v61 }
 0x57d   : > { %1768 = vmatpush1.bf16.msra.mxu0 %v4578_v62  ;;  %1809 = vmatpush1.bf16.msra.mxu1 %v4584_v1 }
 0x57e   : > { %1865 = vmatprep.subr.bf16.mxu0 %v4340_v38  ;;  %1906 = vmatprep.subr.bf16.mxu1 %v4346_v39 }
 0x633   : > { %v1675_v44 = vpop.f32.mrb[52].mxu0  ;;  %v1716_v0 = vpop.f32.mrb[52].mxu1 }
 0x634   : > { %v1723_v3 = vadd.f32 %v1675_v44, %v5284_v46  ;;  %v1725_v2 = vadd.f32 %v1716_v0, %v5285_v47  ;;  %v1677_v48 = vpop.f32.mrb[53].mxu0  ;;  %v1718_v5 = vpop.f32.mrb[53].mxu1 }
 0x635   : > { %v1724_v6 = vadd.f32 %v1677_v48, %v5286_v49  ;;  %v1726_v7 = vadd.f32 %v1718_v5, %v5287_v50  ;;  %v1679_v51 = vpop.f32.mrb[54].mxu0  ;;  %v1720_v52 = vpop.f32.mrb[54].mxu1  ;;  %v5288_v5 = vld [vmem:[#allocation23_spill] sm:$0xff] }
 0x636   : > { %v1727_v53 = vmul.f32 0.5, %v1723_v3  ;;  %v1680_v55 = vpop.f32.mrb[55].mxu0  ;;  %v1721_v56 = vpop.f32.mrb[55].mxu1  ;;  %v5290_v52 = vld [vmem:[#allocation25_spill] sm:$0xff] }
 0x637   : > { %v1731_v57 = vmul.f32 0.5, %v1724_v6  ;;  %v1736_v58 = vmul.f32 0.5, %v1726_v7  ;;  %v5289_v6 = vld [vmem:[#allocation24_spill] sm:$0xff]  ;;  %v5291_v55 = vld [vmem:[#allocation26_spill] sm:$0xff] }
 0x638   : > { %3333 = vtanh.f32 %v1727_v53 }
 0x639   : > { %3335 = vtanh.f32 %v1731_v57 }
 0x63a   : > { %3337 = vtanh.f32 %v1725_v2 }
 0x63b   : > { %3339 = vtanh.f32 %v1736_v58 }
 0x642   : > { %v3334_v59 = vpop.eup %3333 }
 0x643   : > { %v3336_v19 = vpop.eup %3335  ;;  %v1729_v16 = vmul.f32 0.5, %v3334_v59 }
 0x644   : > { %v1733_v20 = vmul.f32 0.5, %v3336_v19  ;;  %v3338_v9 = vpop.eup %3337 }
 0x645   : > { %v1730_v4 = vadd.f32 0.5, %v1729_v16  ;;  %v3340_v44 = vpop.eup %3339 }
 0x646   : > { %v1734_v13 = vadd.f32 0.5, %v1733_v20  ;;  %v1738_v0 = vmul.f32 0.5, %v3340_v44 }
 0x647   : > { %v1741_v30 = vmul.f32 %v3338_v9, %v1730_v4 }
 0x648   : > { %v1740_v17 = vmul.f32 %v1734_v13, %v4498_v28  ;;  %v1739_v46 = vadd.f32 0.5, %v1738_v0 }
 0x64a   : > { %v4594_v18 = vadd.f32 %v1741_v30, %v1740_v17 }
 0x64c   : > { %3341 = vtanh.f32 %v4594_v18 }
 0x656   : > { %v3342_v3 = vpop.eup %3341 }
 0x657   : > { %v1744_v47 = vmul.f32 %v3342_v3, %v1739_v46 }
 0x659   : > { %v3122_v2 = vpack.c.bf16 %v1744_v47, %v4501_v29  ;;  %v1752_v48 = vpack.c.bf16 %v1744_v47, %v1744_v47 }
 0x65b   : > { %3150 = vst [vmem:[%s3642_s14 + $0x10] sm:$0xff] %v3122_v2   ;;  %1786 = vmatmul.mubr.bf16.vlgmr.msra.gmra.mrb[56].mxu0 %v1752_v48  ;;  %1827 = vmatmul.mubr.bf16.vlgmr.msra.gmra.mrb[56].mxu1 %v1752_v48 }
 0x65c   : > { %1866 = vmatpush1.bf16.msra.mxu0 %v4362_v34  ;;  %1907 = vmatpush1.bf16.msra.mxu1 %v4368_v8 }
 0x65d   : > { %1867 = vmatprep.subr.bf16.mxu0 %v4374_v37  ;;  %1908 = vmatprep.subr.bf16.mxu1 %v4380_v10 }
 0x65e   : > { %1897 = vmatprep.mubr.bf16.mxu0 %v5276_v15  ;;  %1938 = vmatprep.mubr.bf16.mxu1 %v5276_v15 }
 0x660   : > { %1868 = vmatpush1.bf16.msra.mxu0 %v4388_v63  ;;  %1909 = vmatpush1.bf16.msra.mxu1 %v4394_v45 }
 0x661   : > { %1869 = vmatprep.subr.bf16.mxu0 %v4400_v12  ;;  %1910 = vmatprep.subr.bf16.mxu1 %v4406_v11 }
 0x664   : > { %1870 = vmatpush1.bf16.msra.mxu0 %v4412_v14  ;;  %1911 = vmatpush1.bf16.msra.mxu1 %v4418_v22 }
 0x665   : > { %1871 = vmatprep.subr.bf16.mxu0 %v4424_v25  ;;  %1912 = vmatprep.subr.bf16.mxu1 %v4430_v21 }
 0x668   : > { %1872 = vmatpush1.bf16.msra.mxu0 %v4436_v23  ;;  %1913 = vmatpush1.bf16.msra.mxu1 %v4442_v26 }
 0x669   : > { %1873 = vmatprep.subr.bf16.mxu0 %v4448_v24  ;;  %1914 = vmatprep.subr.bf16.mxu1 %v4454_v27 }
 0x66c   : > { %1874 = vmatpush1.bf16.msra.mxu0 %v4460_v40  ;;  %1915 = vmatpush1.bf16.msra.mxu1 %v4466_v41 }
 0x66d   : > { %1875 = vmatprep.subr.bf16.mxu0 %v4472_v42  ;;  %1916 = vmatprep.subr.bf16.mxu1 %v4478_v43 }
 0x670   : > { %1876 = vmatpush1.bf16.msra.mxu0 %v4530_v32  ;;  %1917 = vmatpush1.bf16.msra.mxu1 %v4536_v31 }
 0x671   : > { %1877 = vmatprep.subr.bf16.mxu0 %v4542_v54  ;;  %1918 = vmatprep.subr.bf16.mxu1 %v4548_v33 }
 0x674   : > { %1878 = vmatpush1.bf16.msra.mxu0 %v4554_v35  ;;  %1919 = vmatpush1.bf16.msra.mxu1 %v4560_v36 }
 0x675   : > { %1879 = vmatprep.subr.bf16.mxu0 %v4566_v60  ;;  %1920 = vmatprep.subr.bf16.mxu1 %v4572_v61 }
 0x678   : > { %1880 = vmatpush1.bf16.msra.mxu0 %v4578_v62  ;;  %1921 = vmatpush1.bf16.msra.mxu1 %v4584_v1 }
 0x679   : > { %1977 = vmatprep.subr.bf16.mxu0 %v4340_v38  ;;  %2018 = vmatprep.subr.bf16.mxu1 %v4346_v39 }
 0x72e   : > { %v1787_v28 = vpop.f32.mrb[56].mxu0  ;;  %v1828_v29 = vpop.f32.mrb[56].mxu1 }
 0x72f   : > { %v1835_v49 = vadd.f32 %v1787_v28, %v5288_v5  ;;  %v1837_v50 = vadd.f32 %v1828_v29, %v5289_v6  ;;  %v1789_v7 = vpop.f32.mrb[57].mxu0  ;;  %v1830_v51 = vpop.f32.mrb[57].mxu1 }
 0x730   : > { %v1836_v53 = vadd.f32 %v1789_v7, %v5290_v52  ;;  %v1838_v56 = vadd.f32 %v1830_v51, %v5291_v55  ;;  %v1791_v57 = vpop.f32.mrb[58].mxu0  ;;  %v1832_v58 = vpop.f32.mrb[58].mxu1  ;;  %v5292_v7 = vld [vmem:[#allocation27_spill] sm:$0xff]  ;;  %v5293_v52 = vld [vmem:[#allocation28_spill] sm:$0xff] }
 0x731   : > { %v1839_v59 = vmul.f32 0.5, %v1835_v49  ;;  %v1792_v19 = vpop.f32.mrb[59].mxu0  ;;  %v1833_v16 = vpop.f32.mrb[59].mxu1  ;;  %v5294_v57 = vld [vmem:[#allocation29_spill] sm:$0xff] }
 0x732   : > { %v1843_v20 = vmul.f32 0.5, %v1836_v53  ;;  %v1848_v4 = vmul.f32 0.5, %v1838_v56 }
 0x733   : > { %3343 = vtanh.f32 %v1839_v59  ;;  %v5295_v59 = vld [vmem:[#allocation30_spill] sm:$0xff] }
 0x734   : > { %3345 = vtanh.f32 %v1843_v20 }
 0x735   : > { %3347 = vtanh.f32 %v1837_v50 }
 0x736   : > { %3349 = vtanh.f32 %v1848_v4 }
 0x73d   : > { %v3344_v9 = vpop.eup %3343 }
 0x73e   : > { %v3346_v13 = vpop.eup %3345  ;;  %v1841_v30 = vmul.f32 0.5, %v3344_v9 }
 0x73f   : > { %v1845_v17 = vmul.f32 0.5, %v3346_v13  ;;  %v3348_v0 = vpop.eup %3347 }
 0x740   : > { %v1842_v44 = vadd.f32 0.5, %v1841_v30  ;;  %v3350_v48 = vpop.eup %3349 }
 0x741   : > { %v1846_v46 = vadd.f32 0.5, %v1845_v17  ;;  %v1850_v28 = vmul.f32 0.5, %v3350_v48 }
 0x742   : > { %v1853_v3 = vmul.f32 %v3348_v0, %v1842_v44 }
 0x743   : > { %v1852_v47 = vmul.f32 %v1846_v46, %v4594_v18  ;;  %v1851_v29 = vadd.f32 0.5, %v1850_v28 }
 0x745   : > { %v4638_v2 = vadd.f32 %v1853_v3, %v1852_v47 }
 0x747   : > { %3351 = vtanh.f32 %v4638_v2 }
 0x751   : > { %v3352_v5 = vpop.eup %3351 }
 0x752   : > { %v4641_v49 = vmul.f32 %v3352_v5, %v1851_v29 }
 0x754   : > { %v1864_v6 = vpack.c.bf16 %v4641_v49, %v4641_v49 }
 0x756   : > { %1898 = vmatmul.mubr.bf16.vlgmr.msra.gmra.mrb[60].mxu0 %v1864_v6  ;;  %1939 = vmatmul.mubr.bf16.vlgmr.msra.gmra.mrb[60].mxu1 %v1864_v6 }
 0x757   : > { %1978 = vmatpush1.bf16.msra.mxu0 %v4362_v34  ;;  %2019 = vmatpush1.bf16.msra.mxu1 %v4368_v8 }
 0x758   : > { %1979 = vmatprep.subr.bf16.mxu0 %v4374_v37  ;;  %2020 = vmatprep.subr.bf16.mxu1 %v4380_v10 }
 0x759   : > { %2009 = vmatprep.mubr.bf16.mxu0 %v5276_v15  ;;  %2050 = vmatprep.mubr.bf16.mxu1 %v5276_v15 }
 0x75b   : > { %1980 = vmatpush1.bf16.msra.mxu0 %v4388_v63  ;;  %2021 = vmatpush1.bf16.msra.mxu1 %v4394_v45 }
 0x75c   : > { %1981 = vmatprep.subr.bf16.mxu0 %v4400_v12  ;;  %2022 = vmatprep.subr.bf16.mxu1 %v4406_v11 }
 0x75f   : > { %1982 = vmatpush1.bf16.msra.mxu0 %v4412_v14  ;;  %2023 = vmatpush1.bf16.msra.mxu1 %v4418_v22 }
 0x760   : > { %1983 = vmatprep.subr.bf16.mxu0 %v4424_v25  ;;  %2024 = vmatprep.subr.bf16.mxu1 %v4430_v21 }
 0x763   : > { %1984 = vmatpush1.bf16.msra.mxu0 %v4436_v23  ;;  %2025 = vmatpush1.bf16.msra.mxu1 %v4442_v26 }
 0x764   : > { %1985 = vmatprep.subr.bf16.mxu0 %v4448_v24  ;;  %2026 = vmatprep.subr.bf16.mxu1 %v4454_v27 }
 0x767   : > { %1986 = vmatpush1.bf16.msra.mxu0 %v4460_v40  ;;  %2027 = vmatpush1.bf16.msra.mxu1 %v4466_v41 }
 0x768   : > { %1987 = vmatprep.subr.bf16.mxu0 %v4472_v42  ;;  %2028 = vmatprep.subr.bf16.mxu1 %v4478_v43 }
 0x76b   : > { %1988 = vmatpush1.bf16.msra.mxu0 %v4530_v32  ;;  %2029 = vmatpush1.bf16.msra.mxu1 %v4536_v31 }
 0x76c   : > { %1989 = vmatprep.subr.bf16.mxu0 %v4542_v54  ;;  %2030 = vmatprep.subr.bf16.mxu1 %v4548_v33 }
 0x76f   : > { %1990 = vmatpush1.bf16.msra.mxu0 %v4554_v35  ;;  %2031 = vmatpush1.bf16.msra.mxu1 %v4560_v36 }
 0x770   : > { %1991 = vmatprep.subr.bf16.mxu0 %v4566_v60  ;;  %2032 = vmatprep.subr.bf16.mxu1 %v4572_v61 }
 0x773   : > { %1992 = vmatpush1.bf16.msra.mxu0 %v4578_v62  ;;  %2033 = vmatpush1.bf16.msra.mxu1 %v4584_v1 }
 0x774   : > { %2089 = vmatprep.subr.bf16.mxu0 %v4340_v38  ;;  %2130 = vmatprep.subr.bf16.mxu1 %v4346_v39 }
 0x829   : > { %v1899_v18 = vpop.f32.mrb[60].mxu0  ;;  %v1940_v50 = vpop.f32.mrb[60].mxu1 }
 0x82a   : > { %v1947_v51 = vadd.f32 %v1899_v18, %v5292_v7  ;;  %v1949_v53 = vadd.f32 %v1940_v50, %v5293_v52  ;;  %v1901_v55 = vpop.f32.mrb[61].mxu0  ;;  %v1942_v56 = vpop.f32.mrb[61].mxu1 }
 0x82b   : > { %v1948_v58 = vadd.f32 %v1901_v55, %v5294_v57  ;;  %v1950_v19 = vadd.f32 %v1942_v56, %v5295_v59  ;;  %v1903_v16 = vpop.f32.mrb[62].mxu0  ;;  %v1944_v20 = vpop.f32.mrb[62].mxu1  ;;  %v5296_v56 = vld [vmem:[#allocation31_spill] sm:$0xff] }
 0x82c   : > { %v1951_v4 = vmul.f32 0.5, %v1947_v51  ;;  %v1904_v9 = vpop.f32.mrb[63].mxu0  ;;  %v1945_v13 = vpop.f32.mrb[63].mxu1  ;;  %v5298_v20 = vld [vmem:[#allocation33_spill] sm:$0xff] }
 0x82d   : > { %v1955_v30 = vmul.f32 0.5, %v1948_v58  ;;  %v1960_v17 = vmul.f32 0.5, %v1950_v19  ;;  %v5297_v58 = vld [vmem:[#allocation32_spill] sm:$0xff]  ;;  %v5299_v9 = vld [vmem:[#allocation34_spill] sm:$0xff] }
 0x82e   : > { %3353 = vtanh.f32 %v1951_v4 }
 0x82f   : > { %3355 = vtanh.f32 %v1955_v30 }
 0x830   : > { %3357 = vtanh.f32 %v1949_v53 }
 0x831   : > { %3359 = vtanh.f32 %v1960_v17 }
 0x838   : > { %v3354_v44 = vpop.eup %3353 }
 0x839   : > { %v3356_v0 = vpop.eup %3355  ;;  %v1953_v46 = vmul.f32 0.5, %v3354_v44 }
 0x83a   : > { %v1957_v3 = vmul.f32 0.5, %v3356_v0  ;;  %v3358_v48 = vpop.eup %3357 }
 0x83b   : > { %v1954_v47 = vadd.f32 0.5, %v1953_v46  ;;  %v3360_v18 = vpop.eup %3359 }
 0x83c   : > { %v1958_v28 = vadd.f32 0.5, %v1957_v3  ;;  %v1962_v50 = vmul.f32 0.5, %v3360_v18 }
 0x83d   : > { %v1965_v29 = vmul.f32 %v3358_v48, %v1954_v47 }
 0x83e   : > { %v1964_v5 = vmul.f32 %v1958_v28, %v4638_v2  ;;  %v1963_v7 = vadd.f32 0.5, %v1962_v50 }
 0x840   : > { %v4684_v6 = vadd.f32 %v1965_v29, %v1964_v5 }
 0x842   : > { %3361 = vtanh.f32 %v4684_v6 }
 0x84c   : > { %v3362_v51 = vpop.eup %3361 }
 0x84d   : > { %v1968_v52 = vmul.f32 %v3362_v51, %v1963_v7 }
 0x84f   : > { %v3127_v53 = vpack.c.bf16 %v1968_v52, %v4641_v49  ;;  %v1976_v55 = vpack.c.bf16 %v1968_v52, %v1968_v52 }
 0x851   : > { %3151 = vst [vmem:[%s3642_s14 + $0x18] sm:$0xff] %v3127_v53   ;;  %2010 = vmatmul.mubr.bf16.vlgmr.msra.gmra.mrb[64].mxu0 %v1976_v55  ;;  %2051 = vmatmul.mubr.bf16.vlgmr.msra.gmra.mrb[64].mxu1 %v1976_v55 }
 0x852   : > { %2090 = vmatpush1.bf16.msra.mxu0 %v4362_v34  ;;  %2131 = vmatpush1.bf16.msra.mxu1 %v4368_v8 }
 0x853   : > { %2091 = vmatprep.subr.bf16.mxu0 %v4374_v37  ;;  %2132 = vmatprep.subr.bf16.mxu1 %v4380_v10 }
 0x854   : > { %2121 = vmatprep.mubr.bf16.mxu0 %v5276_v15  ;;  %2162 = vmatprep.mubr.bf16.mxu1 %v5276_v15 }
 0x856   : > { %2092 = vmatpush1.bf16.msra.mxu0 %v4388_v63  ;;  %2133 = vmatpush1.bf16.msra.mxu1 %v4394_v45 }
 0x857   : > { %2093 = vmatprep.subr.bf16.mxu0 %v4400_v12  ;;  %2134 = vmatprep.subr.bf16.mxu1 %v4406_v11 }
 0x85a   : > { %2094 = vmatpush1.bf16.msra.mxu0 %v4412_v14  ;;  %2135 = vmatpush1.bf16.msra.mxu1 %v4418_v22 }
 0x85b   : > { %2095 = vmatprep.subr.bf16.mxu0 %v4424_v25  ;;  %2136 = vmatprep.subr.bf16.mxu1 %v4430_v21 }
 0x85e   : > { %2096 = vmatpush1.bf16.msra.mxu0 %v4436_v23  ;;  %2137 = vmatpush1.bf16.msra.mxu1 %v4442_v26 }
 0x85f   : > { %2097 = vmatprep.subr.bf16.mxu0 %v4448_v24  ;;  %2138 = vmatprep.subr.bf16.mxu1 %v4454_v27 }
 0x862   : > { %2098 = vmatpush1.bf16.msra.mxu0 %v4460_v40  ;;  %2139 = vmatpush1.bf16.msra.mxu1 %v4466_v41 }
 0x863   : > { %2099 = vmatprep.subr.bf16.mxu0 %v4472_v42  ;;  %2140 = vmatprep.subr.bf16.mxu1 %v4478_v43 }
 0x866   : > { %2100 = vmatpush1.bf16.msra.mxu0 %v4530_v32  ;;  %2141 = vmatpush1.bf16.msra.mxu1 %v4536_v31 }
 0x867   : > { %2101 = vmatprep.subr.bf16.mxu0 %v4542_v54  ;;  %2142 = vmatprep.subr.bf16.mxu1 %v4548_v33 }
 0x86a   : > { %2102 = vmatpush1.bf16.msra.mxu0 %v4554_v35  ;;  %2143 = vmatpush1.bf16.msra.mxu1 %v4560_v36 }
 0x86b   : > { %2103 = vmatprep.subr.bf16.mxu0 %v4566_v60  ;;  %2144 = vmatprep.subr.bf16.mxu1 %v4572_v61 }
 0x86e   : > { %2104 = vmatpush1.bf16.msra.mxu0 %v4578_v62  ;;  %2145 = vmatpush1.bf16.msra.mxu1 %v4584_v1 }
 0x86f   : > { %2201 = vmatprep.subr.bf16.mxu0 %v4340_v38  ;;  %2242 = vmatprep.subr.bf16.mxu1 %v4346_v39 }
 0x924   : > { %v2011_v2 = vpop.f32.mrb[64].mxu0  ;;  %v2052_v49 = vpop.f32.mrb[64].mxu1 }
 0x925   : > { %v2059_v57 = vadd.f32 %v2011_v2, %v5296_v56  ;;  %v2061_v59 = vadd.f32 %v2052_v49, %v5297_v58  ;;  %v2013_v19 = vpop.f32.mrb[65].mxu0  ;;  %v2054_v16 = vpop.f32.mrb[65].mxu1 }
 0x926   : > { %v2060_v4 = vadd.f32 %v2013_v19, %v5298_v20  ;;  %v2062_v13 = vadd.f32 %v2054_v16, %v5299_v9  ;;  %v2015_v30 = vpop.f32.mrb[66].mxu0  ;;  %v2056_v17 = vpop.f32.mrb[66].mxu1  ;;  %v5300_v19 = vld [vmem:[#allocation35_spill] sm:$0xff]  ;;  %v5301_v20 = vld [vmem:[#allocation36_spill] sm:$0xff] }
 0x927   : > { %v2063_v44 = vmul.f32 0.5, %v2059_v57  ;;  %v2016_v0 = vpop.f32.mrb[67].mxu0  ;;  %v2057_v46 = vpop.f32.mrb[67].mxu1  ;;  %v5302_v30 = vld [vmem:[#allocation37_spill] sm:$0xff] }
 0x928   : > { %v2067_v3 = vmul.f32 0.5, %v2060_v4  ;;  %v2072_v47 = vmul.f32 0.5, %v2062_v13 }
 0x929   : > { %3363 = vtanh.f32 %v2063_v44  ;;  %v5303_v44 = vld [vmem:[#allocation38_spill] sm:$0xff] }
 0x92a   : > { %3365 = vtanh.f32 %v2067_v3 }
 0x92b   : > { %3367 = vtanh.f32 %v2061_v59 }
 0x92c   : > { %3369 = vtanh.f32 %v2072_v47 }
 0x933   : > { %v3364_v48 = vpop.eup %3363 }
 0x934   : > { %v3366_v28 = vpop.eup %3365  ;;  %v2065_v29 = vmul.f32 0.5, %v3364_v48 }
 0x935   : > { %v2069_v5 = vmul.f32 0.5, %v3366_v28  ;;  %v3368_v50 = vpop.eup %3367 }
 0x936   : > { %v2066_v18 = vadd.f32 0.5, %v2065_v29  ;;  %v3370_v55 = vpop.eup %3369 }
 0x937   : > { %v2070_v7 = vadd.f32 0.5, %v2069_v5  ;;  %v2074_v2 = vmul.f32 0.5, %v3370_v55 }
 0x938   : > { %v2077_v51 = vmul.f32 %v3368_v50, %v2066_v18 }
 0x939   : > { %v2076_v52 = vmul.f32 %v2070_v7, %v4684_v6  ;;  %v2075_v49 = vadd.f32 0.5, %v2074_v2 }
 0x93b   : > { %v4728_v53 = vadd.f32 %v2077_v51, %v2076_v52 }
 0x93d   : > { %3371 = vtanh.f32 %v4728_v53 }
 0x947   : > { %v3372_v56 = vpop.eup %3371 }
 0x948   : > { %v4731_v57 = vmul.f32 %v3372_v56, %v2075_v49 }
 0x94a   : > { %v2088_v58 = vpack.c.bf16 %v4731_v57, %v4731_v57 }
 0x94c   : > { %2122 = vmatmul.mubr.bf16.vlgmr.msra.gmra.mrb[68].mxu0 %v2088_v58  ;;  %2163 = vmatmul.mubr.bf16.vlgmr.msra.gmra.mrb[68].mxu1 %v2088_v58 }
 0x94d   : > { %2202 = vmatpush1.bf16.msra.mxu0 %v4362_v34  ;;  %2243 = vmatpush1.bf16.msra.mxu1 %v4368_v8 }
 0x94e   : > { %2203 = vmatprep.subr.bf16.mxu0 %v4374_v37  ;;  %2244 = vmatprep.subr.bf16.mxu1 %v4380_v10 }
 0x94f   : > { %2233 = vmatprep.mubr.bf16.mxu0 %v5276_v15  ;;  %2274 = vmatprep.mubr.bf16.mxu1 %v5276_v15 }
 0x951   : > { %2204 = vmatpush1.bf16.msra.mxu0 %v4388_v63  ;;  %2245 = vmatpush1.bf16.msra.mxu1 %v4394_v45 }
 0x952   : > { %2205 = vmatprep.subr.bf16.mxu0 %v4400_v12  ;;  %2246 = vmatprep.subr.bf16.mxu1 %v4406_v11 }
 0x955   : > { %2206 = vmatpush1.bf16.msra.mxu0 %v4412_v14  ;;  %2247 = vmatpush1.bf16.msra.mxu1 %v4418_v22 }
 0x956   : > { %2207 = vmatprep.subr.bf16.mxu0 %v4424_v25  ;;  %2248 = vmatprep.subr.bf16.mxu1 %v4430_v21 }
 0x959   : > { %2208 = vmatpush1.bf16.msra.mxu0 %v4436_v23  ;;  %2249 = vmatpush1.bf16.msra.mxu1 %v4442_v26 }
 0x95a   : > { %2209 = vmatprep.subr.bf16.mxu0 %v4448_v24  ;;  %2250 = vmatprep.subr.bf16.mxu1 %v4454_v27 }
 0x95d   : > { %2210 = vmatpush1.bf16.msra.mxu0 %v4460_v40  ;;  %2251 = vmatpush1.bf16.msra.mxu1 %v4466_v41 }
 0x95e   : > { %2211 = vmatprep.subr.bf16.mxu0 %v4472_v42  ;;  %2252 = vmatprep.subr.bf16.mxu1 %v4478_v43 }
 0x961   : > { %2212 = vmatpush1.bf16.msra.mxu0 %v4530_v32  ;;  %2253 = vmatpush1.bf16.msra.mxu1 %v4536_v31 }
 0x962   : > { %2213 = vmatprep.subr.bf16.mxu0 %v4542_v54  ;;  %2254 = vmatprep.subr.bf16.mxu1 %v4548_v33 }
 0x965   : > { %2214 = vmatpush1.bf16.msra.mxu0 %v4554_v35  ;;  %2255 = vmatpush1.bf16.msra.mxu1 %v4560_v36 }
 0x966   : > { %2215 = vmatprep.subr.bf16.mxu0 %v4566_v60  ;;  %2256 = vmatprep.subr.bf16.mxu1 %v4572_v61 }
 0x969   : > { %2216 = vmatpush1.bf16.msra.mxu0 %v4578_v62  ;;  %2257 = vmatpush1.bf16.msra.mxu1 %v4584_v1 }
 0x96a   : > { %2313 = vmatprep.subr.bf16.mxu0 %v4340_v38  ;;  %2354 = vmatprep.subr.bf16.mxu1 %v4346_v39 }
 0xa1f   : > { %v2123_v6 = vpop.f32.mrb[68].mxu0  ;;  %v2164_v59 = vpop.f32.mrb[68].mxu1 }
 0xa20   : > { %v2171_v16 = vadd.f32 %v2123_v6, %v5300_v19  ;;  %v2173_v4 = vadd.f32 %v2164_v59, %v5301_v20  ;;  %v2125_v9 = vpop.f32.mrb[69].mxu0  ;;  %v2166_v13 = vpop.f32.mrb[69].mxu1 }
 0xa21   : > { %v2172_v17 = vadd.f32 %v2125_v9, %v5302_v30  ;;  %v2174_v0 = vadd.f32 %v2166_v13, %v5303_v44  ;;  %v2127_v46 = vpop.f32.mrb[70].mxu0  ;;  %v2168_v3 = vpop.f32.mrb[70].mxu1  ;;  %v5304_v13 = vld [vmem:[#allocation39_spill] sm:$0xff] }
 0xa22   : > { %v2175_v47 = vmul.f32 0.5, %v2171_v16  ;;  %v2128_v48 = vpop.f32.mrb[71].mxu0  ;;  %v2169_v28 = vpop.f32.mrb[71].mxu1  ;;  %v5306_v3 = vld [vmem:[#allocation41_spill] sm:$0xff] }
 0xa23   : > { %v2179_v38 = vmul.f32 0.5, %v2172_v17  ;;  %v2184_v39 = vmul.f32 0.5, %v2174_v0  ;;  %v5305_v17 = vld [vmem:[#allocation40_spill] sm:$0xff]  ;;  %v5307_v48 = vld [vmem:[#allocation42_spill] sm:$0xff] }
 0xa24   : > { %3373 = vtanh.f32 %v2175_v47 }
 0xa25   : > { %3375 = vtanh.f32 %v2179_v38 }
 0xa26   : > { %3377 = vtanh.f32 %v2173_v4 }
 0xa27   : > { %3379 = vtanh.f32 %v2184_v39 }
 0xa2e   : > { %v3374_v29 = vpop.eup %3373 }
 0xa2f   : > { %v3376_v5 = vpop.eup %3375  ;;  %v2177_v18 = vmul.f32 0.5, %v3374_v29 }
 0xa30   : > { %v2181_v50 = vmul.f32 0.5, %v3376_v5  ;;  %v3378_v51 = vpop.eup %3377 }
 0xa31   : > { %v2178_v7 = vadd.f32 0.5, %v2177_v18  ;;  %v3380_v56 = vpop.eup %3379 }
 0xa32   : > { %v2182_v52 = vadd.f32 0.5, %v2181_v50  ;;  %v2186_v58 = vmul.f32 0.5, %v3380_v56 }
 0xa33   : > { %v2189_v55 = vmul.f32 %v3378_v51, %v2178_v7 }
 0xa34   : > { %v2188_v2 = vmul.f32 %v2182_v52, %v4728_v53  ;;  %v2187_v6 = vadd.f32 0.5, %v2186_v58  ;;  %v4814_v53 = vld [vmem:[%s5219_s5 + $0x4] ss:$16 sps:$4 sm:$0xff]  }
 0xa36   : > { %v4774_v49 = vadd.f32 %v2189_v55, %v2188_v2 }
 0xa38   : > { %3381 = vtanh.f32 %v4774_v49 }
 0xa42   : > { %v3382_v59 = vpop.eup %3381 }
 0xa43   : > { %v2192_v19 = vmul.f32 %v3382_v59, %v2187_v6 }
 0xa45   : > { %v3132_v16 = vpack.c.bf16 %v2192_v19, %v4731_v57  ;;  %v2200_v20 = vpack.c.bf16 %v2192_v19, %v2192_v19  ;;  %v4820_v57 = vld [vmem:[%s5219_s5 + $0xc] ss:$16 sps:$4 sm:$0xff]  }
 0xa47   : > { %3152 = vst [vmem:[%s3642_s14 + $0x20] sm:$0xff] %v3132_v16   ;;  %2234 = vmatmul.mubr.bf16.vlgmr.msra.gmra.mrb[72].mxu0 %v2200_v20  ;;  %2275 = vmatmul.mubr.bf16.vlgmr.msra.gmra.mrb[72].mxu1 %v2200_v20 }
 0xa48   : > { %2314 = vmatpush1.bf16.msra.mxu0 %v4362_v34  ;;  %2355 = vmatpush1.bf16.msra.mxu1 %v4368_v8 }
 0xa49   : > { %2315 = vmatprep.subr.bf16.mxu0 %v4374_v37  ;;  %2356 = vmatprep.subr.bf16.mxu1 %v4380_v10 }
 0xa4a   : > { %2345 = vmatprep.mubr.bf16.mxu0 %v5276_v15  ;;  %2386 = vmatprep.mubr.bf16.mxu1 %v5276_v15 }
 0xa4c   : > { %2316 = vmatpush1.bf16.msra.mxu0 %v4388_v63  ;;  %2357 = vmatpush1.bf16.msra.mxu1 %v4394_v45 }
 0xa4d   : > { %2317 = vmatprep.subr.bf16.mxu0 %v4400_v12  ;;  %2358 = vmatprep.subr.bf16.mxu1 %v4406_v11 }
 0xa50   : > { %2318 = vmatpush1.bf16.msra.mxu0 %v4412_v14  ;;  %2359 = vmatpush1.bf16.msra.mxu1 %v4418_v22 }
 0xa51   : > { %2319 = vmatprep.subr.bf16.mxu0 %v4424_v25  ;;  %2360 = vmatprep.subr.bf16.mxu1 %v4430_v21 }
 0xa54   : > { %2320 = vmatpush1.bf16.msra.mxu0 %v4436_v23  ;;  %2361 = vmatpush1.bf16.msra.mxu1 %v4442_v26 }
 0xa55   : > { %2321 = vmatprep.subr.bf16.mxu0 %v4448_v24  ;;  %2362 = vmatprep.subr.bf16.mxu1 %v4454_v27 }
 0xa58   : > { %2322 = vmatpush1.bf16.msra.mxu0 %v4460_v40  ;;  %2363 = vmatpush1.bf16.msra.mxu1 %v4466_v41 }
 0xa59   : > { %2323 = vmatprep.subr.bf16.mxu0 %v4472_v42  ;;  %2364 = vmatprep.subr.bf16.mxu1 %v4478_v43 }
 0xa5c   : > { %2324 = vmatpush1.bf16.msra.mxu0 %v4530_v32  ;;  %2365 = vmatpush1.bf16.msra.mxu1 %v4536_v31 }
 0xa5d   : > { %2325 = vmatprep.subr.bf16.mxu0 %v4542_v54  ;;  %2366 = vmatprep.subr.bf16.mxu1 %v4548_v33 }
 0xa60   : > { %2326 = vmatpush1.bf16.msra.mxu0 %v4554_v35  ;;  %2367 = vmatpush1.bf16.msra.mxu1 %v4560_v36 }
 0xa61   : > { %2327 = vmatprep.subr.bf16.mxu0 %v4566_v60  ;;  %2368 = vmatprep.subr.bf16.mxu1 %v4572_v61 }
 0xa64   : > { %2328 = vmatpush1.bf16.msra.mxu0 %v4578_v62  ;;  %2369 = vmatpush1.bf16.msra.mxu1 %v4584_v1 }
 0xa65   : > { %2425 = vmatprep.subr.bf16.mxu0 %v4814_v53  ;;  %2466 = vmatprep.subr.bf16.mxu1 %v4820_v57 }
 0xb1a   : > { %v2235_v4 = vpop.f32.mrb[72].mxu0  ;;  %v2276_v9 = vpop.f32.mrb[72].mxu1 }
 0xb1b   : > { %v2283_v30 = vadd.f32 %v2235_v4, %v5304_v13  ;;  %v2285_v44 = vadd.f32 %v2276_v9, %v5305_v17  ;;  %v2237_v0 = vpop.f32.mrb[73].mxu0  ;;  %v2278_v46 = vpop.f32.mrb[73].mxu1 }
 0xb1c   : > { %v2284_v47 = vadd.f32 %v2237_v0, %v5306_v3  ;;  %v2286_v28 = vadd.f32 %v2278_v46, %v5307_v48  ;;  %v2239_v38 = vpop.f32.mrb[74].mxu0  ;;  %v2280_v39 = vpop.f32.mrb[74].mxu1  ;;  %v4882_v48 = vld [vmem:[%s5219_s5] ss:$16 sps:$4 sm:$0xff]  }
 0xb1d   : > { %v2287_v29 = vmul.f32 0.5, %v2283_v30  ;;  %v2240_v5 = vpop.f32.mrb[75].mxu0  ;;  %v2281_v18 = vpop.f32.mrb[75].mxu1  ;;  %v4894_v38 = vld [vmem:[%s5219_s5 + $0x24] ss:$16 sps:$4 sm:$0xff]  }
 0xb1e   : > { %v2291_v50 = vmul.f32 0.5, %v2284_v47  ;;  %v2296_v7 = vmul.f32 0.5, %v2286_v28  ;;  %v4888_v28 = vld [vmem:[%s5219_s5 + $0x8] ss:$16 sps:$4 sm:$0xff]   ;;  %v4900_v39 = vld [vmem:[%s5219_s5 + $0x2c] ss:$16 sps:$4 sm:$0xff]  }
 0xb1f   : > { %3383 = vtanh.f32 %v2287_v29  ;;  %v4908_v29 = vld [vmem:[%s5219_s5 + $0x20] ss:$16 sps:$4 sm:$0xff]   ;;  %v4914_v5 = vld [vmem:[%s5219_s5 + $0x28] ss:$16 sps:$4 sm:$0xff]   ;;  %v4920_v18 = vld [vmem:[%s5219_s5 + $0x44] ss:$16 sps:$4 sm:$0xff]  }
 0xb20   : > { %3385 = vtanh.f32 %v2291_v50  ;;  %v4926_v50 = vld [vmem:[%s5219_s5 + $0x4c] ss:$16 sps:$4 sm:$0xff]  }
 0xb21   : > { %3387 = vtanh.f32 %v2285_v44 }
 0xb22   : > { %3389 = vtanh.f32 %v2296_v7  ;;  %v4932_v7 = vld [vmem:[%s5219_s5 + $0x40] ss:$16 sps:$4 sm:$0xff]  }
 0xb29   : > { %v3384_v51 = vpop.eup %3383 }
 0xb2a   : > { %v3386_v52 = vpop.eup %3385  ;;  %v2289_v55 = vmul.f32 0.5, %v3384_v51  ;;  %v4938_v51 = vld [vmem:[%s5219_s5 + $0x48] ss:$16 sps:$4 sm:$0xff]  }
 0xb2b   : > { %v2293_v2 = vmul.f32 0.5, %v3386_v52  ;;  %v3388_v58 = vpop.eup %3387  ;;  %v4944_v52 = vld [vmem:[%s5219_s5 + $0x64] ss:$16 sps:$4 sm:$0xff]  }
 0xb2c   : > { %v2290_v56 = vadd.f32 0.5, %v2289_v55  ;;  %v3390_v20 = vpop.eup %3389  ;;  %v4950_v55 = vld [vmem:[%s5219_s5 + $0x6c] ss:$16 sps:$4 sm:$0xff]  }
 0xb2d   : > { %v2294_v6 = vadd.f32 0.5, %v2293_v2  ;;  %v2298_v4 = vmul.f32 0.5, %v3390_v20  ;;  %v4956_v2 = vld [vmem:[%s5219_s5 + $0x60] ss:$16 sps:$4 sm:$0xff]   ;;  %v4998_v20 = vld [vmem:[%s5219_s5 + $0xac] ss:$16 sps:$4 sm:$0xff]  }
 0xb2e   : > { %v2301_v59 = vmul.f32 %v3388_v58, %v2290_v56  ;;  %v4962_v56 = vld [vmem:[%s5219_s5 + $0x68] ss:$16 sps:$4 sm:$0xff]   ;;  %v4968_v58 = vld [vmem:[%s5219_s5 + $0x84] ss:$16 sps:$4 sm:$0xff]  }
 0xb2f   : > { %v2300_v19 = vmul.f32 %v2294_v6, %v4774_v49  ;;  %v2299_v9 = vadd.f32 0.5, %v2298_v4  ;;  %v4974_v6 = vld [vmem:[%s5219_s5 + $0x8c] ss:$16 sps:$4 sm:$0xff]   ;;  %v5004_v4 = vld [vmem:[%s5219_s5 + $0xa0] ss:$16 sps:$4 sm:$0xff]  }
 0xb31   : > { %v4828_v16 = vadd.f32 %v2301_v59, %v2300_v19  ;;  %v4980_v59 = vld [vmem:[%s5219_s5 + $0x80] ss:$16 sps:$4 sm:$0xff]   ;;  %v4986_v19 = vld [vmem:[%s5219_s5 + $0x88] ss:$16 sps:$4 sm:$0xff]  }
 0xb33   : > { %3391 = vtanh.f32 %v4828_v16 }
 0xb3d   : > { %v3392_v13 = vpop.eup %3391 }
 0xb3e   : > { %v4831_v30 = vmul.f32 %v3392_v13, %v2299_v9  ;;  %v5010_v9 = vld [vmem:[%s5219_s5 + $0xa8] ss:$16 sps:$4 sm:$0xff]   ;;  %v5016_v13 = vld [vmem:[%s5219_s5 + $0xc4] ss:$16 sps:$4 sm:$0xff]  }
 0xb40   : > { %v2312_v17 = vpack.c.bf16 %v4831_v30, %v4831_v30 }
 0xb42   : > { %2346 = vmatmul.mubr.bf16.vlgmr.msra.gmra.mrb[76].mxu0 %v2312_v17  ;;  %2387 = vmatmul.mubr.bf16.vlgmr.msra.gmra.mrb[76].mxu1 %v2312_v17  ;;  %v5028_v17 = vld [vmem:[%s5219_s5 + $0xc0] ss:$16 sps:$4 sm:$0xff]  }
 0xb43   : > { %2426 = vmatpush1.bf16.msra.mxu0 %v4362_v34  ;;  %2467 = vmatpush1.bf16.msra.mxu1 %v4368_v8 }
 0xb44   : > { %2427 = vmatprep.subr.bf16.mxu0 %v4374_v37  ;;  %2468 = vmatprep.subr.bf16.mxu1 %v4380_v10  ;;  %v5308_v37 = vld [vmem:[#allocation43_spill] sm:$0xff] }
 0xb45   : > { %2457 = vmatprep.mubr.bf16.mxu0 %v5276_v15  ;;  %2498 = vmatprep.mubr.bf16.mxu1 %v5276_v15 }
 0xb47   : > { %2428 = vmatpush1.bf16.msra.mxu0 %v4388_v63  ;;  %2469 = vmatpush1.bf16.msra.mxu1 %v4394_v45  ;;  %v5309_v63 = vld [vmem:[#allocation44_spill] sm:$0xff] }
 0xb48   : > { %2429 = vmatprep.subr.bf16.mxu0 %v4400_v12  ;;  %2470 = vmatprep.subr.bf16.mxu1 %v4406_v11 }
 0xb4b   : > { %2430 = vmatpush1.bf16.msra.mxu0 %v4412_v14  ;;  %2471 = vmatpush1.bf16.msra.mxu1 %v4418_v22  ;;  %v5310_v14 = vld [vmem:[#allocation45_spill] sm:$0xff] }
 0xb4c   : > { %2431 = vmatprep.subr.bf16.mxu0 %v4424_v25  ;;  %2472 = vmatprep.subr.bf16.mxu1 %v4430_v21  ;;  %v5311_v25 = vld [vmem:[#allocation46_spill] sm:$0xff] }
 0xb4f   : > { %2432 = vmatpush1.bf16.msra.mxu0 %v4436_v23  ;;  %2473 = vmatpush1.bf16.msra.mxu1 %v4442_v26 }
 0xb50   : > { %2433 = vmatprep.subr.bf16.mxu0 %v4448_v24  ;;  %2474 = vmatprep.subr.bf16.mxu1 %v4454_v27 }
 0xb53   : > { %2434 = vmatpush1.bf16.msra.mxu0 %v4460_v40  ;;  %2475 = vmatpush1.bf16.msra.mxu1 %v4466_v41 }
 0xb54   : > { %2435 = vmatprep.subr.bf16.mxu0 %v4472_v42  ;;  %2476 = vmatprep.subr.bf16.mxu1 %v4478_v43 }
 0xb57   : > { %2436 = vmatpush1.bf16.msra.mxu0 %v4530_v32  ;;  %2477 = vmatpush1.bf16.msra.mxu1 %v4536_v31 }
 0xb58   : > { %2437 = vmatprep.subr.bf16.mxu0 %v4542_v54  ;;  %2478 = vmatprep.subr.bf16.mxu1 %v4548_v33 }
 0xb5b   : > { %2438 = vmatpush1.bf16.msra.mxu0 %v4554_v35  ;;  %2479 = vmatpush1.bf16.msra.mxu1 %v4560_v36 }
 0xb5c   : > { %2439 = vmatprep.subr.bf16.mxu0 %v4566_v60  ;;  %2480 = vmatprep.subr.bf16.mxu1 %v4572_v61 }
 0xb5f   : > { %2440 = vmatpush1.bf16.msra.mxu0 %v4578_v62  ;;  %2481 = vmatpush1.bf16.msra.mxu1 %v4584_v1 }
 0xb60   : > { %2537 = vmatprep.subr.bf16.mxu0 %v4814_v53  ;;  %2578 = vmatprep.subr.bf16.mxu1 %v4820_v57 }
 0xc15   : > { %v2347_v34 = vpop.f32.mrb[76].mxu0  ;;  %v2388_v8 = vpop.f32.mrb[76].mxu1 }
 0xc16   : > { %v2395_v10 = vadd.f32 %v2347_v34, %v5308_v37  ;;  %v2397_v45 = vadd.f32 %v2388_v8, %v5309_v63  ;;  %v2349_v12 = vpop.f32.mrb[77].mxu0  ;;  %v2390_v11 = vpop.f32.mrb[77].mxu1  ;;  %v5034_v34 = vld [vmem:[%s5219_s5 + $0xc8] ss:$16 sps:$4 sm:$0xff]   ;;  %v5040_v8 = vld [vmem:[%s5219_s5 + $0xe4] ss:$16 sps:$4 sm:$0xff]  }
 0xc17   : > { %v2396_v22 = vadd.f32 %v2349_v12, %v5310_v14  ;;  %v2398_v21 = vadd.f32 %v2390_v11, %v5311_v25  ;;  %v2351_v23 = vpop.f32.mrb[78].mxu0  ;;  %v2392_v26 = vpop.f32.mrb[78].mxu1  ;;  %v5046_v37 = vld [vmem:[%s5219_s5 + $0xec] ss:$16 sps:$4 sm:$0xff]   ;;  %v5058_v63 = vld [vmem:[%s5219_s5 + $0xe8] ss:$16 sps:$4 sm:$0xff]  }
 0xc18   : > { %v2399_v24 = vmul.f32 0.5, %v2395_v10  ;;  %v2352_v27 = vpop.f32.mrb[79].mxu0  ;;  %v2393_v40 = vpop.f32.mrb[79].mxu1  ;;  %v5052_v10 = vld [vmem:[%s5219_s5 + $0xe0] ss:$16 sps:$4 sm:$0xff]   ;;  %v5312_v11 = vld [vmem:[#allocation47_spill] sm:$0xff] }
 0xc19   : > { %v2403_v41 = vmul.f32 0.5, %v2396_v22  ;;  %v2408_v42 = vmul.f32 0.5, %v2398_v21  ;;  %v5313_v22 = vld [vmem:[#allocation48_spill] sm:$0xff]  ;;  %v5314_v26 = vld [vmem:[#allocation49_spill] sm:$0xff]  ;;  %v5315_v27 = vld [vmem:[#allocation50_spill] sm:$0xff] }
 0xc1a   : > { %3393 = vtanh.f32 %v2399_v24 }
 0xc1b   : > { %3395 = vtanh.f32 %v2403_v41 }
 0xc1c   : > { %3397 = vtanh.f32 %v2397_v45 }
 0xc1d   : > { %3399 = vtanh.f32 %v2408_v42 }
 0xc24   : > { %v3394_v43 = vpop.eup %3393 }
 0xc25   : > { %v3396_v32 = vpop.eup %3395  ;;  %v2401_v31 = vmul.f32 0.5, %v3394_v43 }
 0xc26   : > { %v2405_v54 = vmul.f32 0.5, %v3396_v32  ;;  %v3398_v35 = vpop.eup %3397 }
 0xc27   : > { %v2402_v33 = vadd.f32 0.5, %v2401_v31  ;;  %v3400_v1 = vpop.eup %3399 }
 0xc28   : > { %v2406_v36 = vadd.f32 0.5, %v2405_v54  ;;  %v2410_v49 = vmul.f32 0.5, %v3400_v1 }
 0xc29   : > { %v2413_v60 = vmul.f32 %v3398_v35, %v2402_v33 }
 0xc2a   : > { %v2412_v61 = vmul.f32 %v2406_v36, %v4828_v16  ;;  %v2411_v44 = vadd.f32 0.5, %v2410_v49  ;;  %v4992_v16 = vld [vmem:[%s5219_s5 + $0xa4] ss:$16 sps:$4 sm:$0xff]  }
 0xc2c   : > { %v4874_v62 = vadd.f32 %v2413_v60, %v2412_v61 }
 0xc2e   : > { %3401 = vtanh.f32 %v4874_v62 }
 0xc38   : > { %v3402_v0 = vpop.eup %3401 }
 0xc39   : > { %v2416_v46 = vmul.f32 %v3402_v0, %v2411_v44 }
 0xc3b   : > { %v3137_v3 = vpack.c.bf16 %v2416_v46, %v4831_v30  ;;  %v2424_v47 = vpack.c.bf16 %v2416_v46, %v2416_v46  ;;  %v5022_v30 = vld [vmem:[%s5219_s5 + $0xcc] ss:$16 sps:$4 sm:$0xff]  }
 0xc3d   : > { %3153 = vst [vmem:[%s3642_s14 + $0x28] sm:$0xff] %v3137_v3   ;;  %2458 = vmatmul.mubr.bf16.vlgmr.msra.gmra.mrb[80].mxu0 %v2424_v47  ;;  %2499 = vmatmul.mubr.bf16.vlgmr.msra.gmra.mrb[80].mxu1 %v2424_v47 }
 0xc3e   : > { %2538 = vmatpush1.bf16.msra.mxu0 %v4882_v48  ;;  %2579 = vmatpush1.bf16.msra.mxu1 %v4888_v28 }
 0xc3f   : > { %2539 = vmatprep.subr.bf16.mxu0 %v4894_v38  ;;  %2580 = vmatprep.subr.bf16.mxu1 %v4900_v39 }
 0xc40   : > { %2569 = vmatprep.mubr.bf16.mxu0 %v5276_v15  ;;  %2610 = vmatprep.mubr.bf16.mxu1 %v5276_v15 }
 0xc42   : > { %2540 = vmatpush1.bf16.msra.mxu0 %v4908_v29  ;;  %2581 = vmatpush1.bf16.msra.mxu1 %v4914_v5 }
 0xc43   : > { %2541 = vmatprep.subr.bf16.mxu0 %v4920_v18  ;;  %2582 = vmatprep.subr.bf16.mxu1 %v4926_v50 }
 0xc46   : > { %2542 = vmatpush1.bf16.msra.mxu0 %v4932_v7  ;;  %2583 = vmatpush1.bf16.msra.mxu1 %v4938_v51 }
 0xc47   : > { %2543 = vmatprep.subr.bf16.mxu0 %v4944_v52  ;;  %2584 = vmatprep.subr.bf16.mxu1 %v4950_v55 }
 0xc4a   : > { %2544 = vmatpush1.bf16.msra.mxu0 %v4956_v2  ;;  %2585 = vmatpush1.bf16.msra.mxu1 %v4962_v56 }
 0xc4b   : > { %2545 = vmatprep.subr.bf16.mxu0 %v4968_v58  ;;  %2586 = vmatprep.subr.bf16.mxu1 %v4974_v6 }
 0xc4e   : > { %2546 = vmatpush1.bf16.msra.mxu0 %v4980_v59  ;;  %2587 = vmatpush1.bf16.msra.mxu1 %v4986_v19 }
 0xc4f   : > { %2547 = vmatprep.subr.bf16.mxu0 %v4992_v16  ;;  %2588 = vmatprep.subr.bf16.mxu1 %v4998_v20 }
 0xc52   : > { %2548 = vmatpush1.bf16.msra.mxu0 %v5004_v4  ;;  %2589 = vmatpush1.bf16.msra.mxu1 %v5010_v9 }
 0xc53   : > { %2549 = vmatprep.subr.bf16.mxu0 %v5016_v13  ;;  %2590 = vmatprep.subr.bf16.mxu1 %v5022_v30 }
 0xc56   : > { %2550 = vmatpush1.bf16.msra.mxu0 %v5028_v17  ;;  %2591 = vmatpush1.bf16.msra.mxu1 %v5034_v34 }
 0xc57   : > { %2551 = vmatprep.subr.bf16.mxu0 %v5040_v8  ;;  %2592 = vmatprep.subr.bf16.mxu1 %v5046_v37 }
 0xc5a   : > { %2552 = vmatpush1.bf16.msra.mxu0 %v5052_v10  ;;  %2593 = vmatpush1.bf16.msra.mxu1 %v5058_v63 }
 0xc5b   : > { %2649 = vmatprep.subr.bf16.mxu0 %v4814_v53  ;;  %2690 = vmatprep.subr.bf16.mxu1 %v4820_v57 }
 0xd10   : > { %v2459_v45 = vpop.f32.mrb[80].mxu0  ;;  %v2500_v12 = vpop.f32.mrb[80].mxu1 }
 0xd11   : > { %v2507_v14 = vadd.f32 %v2459_v45, %v5312_v11  ;;  %v2509_v25 = vadd.f32 %v2500_v12, %v5313_v22  ;;  %v2461_v21 = vpop.f32.mrb[81].mxu0  ;;  %v2502_v23 = vpop.f32.mrb[81].mxu1 }
 0xd12   : > { %v2508_v24 = vadd.f32 %v2461_v21, %v5314_v26  ;;  %v2510_v40 = vadd.f32 %v2502_v23, %v5315_v27  ;;  %v2463_v41 = vpop.f32.mrb[82].mxu0  ;;  %v2504_v42 = vpop.f32.mrb[82].mxu1  ;;  %v5316_v21 = vld [vmem:[#allocation51_spill] sm:$0xff]  ;;  %v5317_v26 = vld [vmem:[#allocation52_spill] sm:$0xff] }
 0xd13   : > { %v2511_v43 = vmul.f32 0.5, %v2507_v14  ;;  %v2464_v32 = vpop.f32.mrb[83].mxu0  ;;  %v2505_v31 = vpop.f32.mrb[83].mxu1  ;;  %v5318_v41 = vld [vmem:[#allocation53_spill] sm:$0xff] }
 0xd14   : > { %v2515_v54 = vmul.f32 0.5, %v2508_v24  ;;  %v2520_v33 = vmul.f32 0.5, %v2510_v40 }
 0xd15   : > { %3403 = vtanh.f32 %v2511_v43  ;;  %v5319_v43 = vld [vmem:[#allocation54_spill] sm:$0xff] }
 0xd16   : > { %3405 = vtanh.f32 %v2515_v54 }
 0xd17   : > { %3407 = vtanh.f32 %v2509_v25 }
 0xd18   : > { %3409 = vtanh.f32 %v2520_v33 }
 0xd1f   : > { %v3404_v35 = vpop.eup %3403 }
 0xd20   : > { %v3406_v36 = vpop.eup %3405  ;;  %v2513_v60 = vmul.f32 0.5, %v3404_v35 }
 0xd21   : > { %v2517_v61 = vmul.f32 0.5, %v3406_v36  ;;  %v3408_v49 = vpop.eup %3407 }
 0xd22   : > { %v2514_v1 = vadd.f32 0.5, %v2513_v60  ;;  %v3410_v47 = vpop.eup %3409 }
 0xd23   : > { %v2518_v44 = vadd.f32 0.5, %v2517_v61  ;;  %v2522_v45 = vmul.f32 0.5, %v3410_v47 }
 0xd24   : > { %v2525_v0 = vmul.f32 %v3408_v49, %v2514_v1 }
 0xd25   : > { %v2524_v46 = vmul.f32 %v2518_v44, %v4874_v62  ;;  %v2523_v12 = vadd.f32 0.5, %v2522_v45 }
 0xd27   : > { %v5068_v3 = vadd.f32 %v2525_v0, %v2524_v46 }
 0xd29   : > { %3411 = vtanh.f32 %v5068_v3 }
 0xd33   : > { %v3412_v11 = vpop.eup %3411 }
 0xd34   : > { %v5071_v14 = vmul.f32 %v3412_v11, %v2523_v12 }
 0xd36   : > { %v2536_v22 = vpack.c.bf16 %v5071_v14, %v5071_v14 }
 0xd38   : > { %2570 = vmatmul.mubr.bf16.vlgmr.msra.gmra.mrb[84].mxu0 %v2536_v22  ;;  %2611 = vmatmul.mubr.bf16.vlgmr.msra.gmra.mrb[84].mxu1 %v2536_v22 }
 0xd39   : > { %2650 = vmatpush1.bf16.msra.mxu0 %v4882_v48  ;;  %2691 = vmatpush1.bf16.msra.mxu1 %v4888_v28 }
 0xd3a   : > { %2651 = vmatprep.subr.bf16.mxu0 %v4894_v38  ;;  %2692 = vmatprep.subr.bf16.mxu1 %v4900_v39 }
 0xd3b   : > { %2681 = vmatprep.mubr.bf16.mxu0 %v5276_v15  ;;  %2722 = vmatprep.mubr.bf16.mxu1 %v5276_v15 }
 0xd3d   : > { %2652 = vmatpush1.bf16.msra.mxu0 %v4908_v29  ;;  %2693 = vmatpush1.bf16.msra.mxu1 %v4914_v5 }
 0xd3e   : > { %2653 = vmatprep.subr.bf16.mxu0 %v4920_v18  ;;  %2694 = vmatprep.subr.bf16.mxu1 %v4926_v50 }
 0xd41   : > { %2654 = vmatpush1.bf16.msra.mxu0 %v4932_v7  ;;  %2695 = vmatpush1.bf16.msra.mxu1 %v4938_v51 }
 0xd42   : > { %2655 = vmatprep.subr.bf16.mxu0 %v4944_v52  ;;  %2696 = vmatprep.subr.bf16.mxu1 %v4950_v55 }
 0xd45   : > { %2656 = vmatpush1.bf16.msra.mxu0 %v4956_v2  ;;  %2697 = vmatpush1.bf16.msra.mxu1 %v4962_v56 }
 0xd46   : > { %2657 = vmatprep.subr.bf16.mxu0 %v4968_v58  ;;  %2698 = vmatprep.subr.bf16.mxu1 %v4974_v6 }
 0xd49   : > { %2658 = vmatpush1.bf16.msra.mxu0 %v4980_v59  ;;  %2699 = vmatpush1.bf16.msra.mxu1 %v4986_v19 }
 0xd4a   : > { %2659 = vmatprep.subr.bf16.mxu0 %v4992_v16  ;;  %2700 = vmatprep.subr.bf16.mxu1 %v4998_v20 }
 0xd4d   : > { %2660 = vmatpush1.bf16.msra.mxu0 %v5004_v4  ;;  %2701 = vmatpush1.bf16.msra.mxu1 %v5010_v9 }
 0xd4e   : > { %2661 = vmatprep.subr.bf16.mxu0 %v5016_v13  ;;  %2702 = vmatprep.subr.bf16.mxu1 %v5022_v30 }
 0xd51   : > { %2662 = vmatpush1.bf16.msra.mxu0 %v5028_v17  ;;  %2703 = vmatpush1.bf16.msra.mxu1 %v5034_v34 }
 0xd52   : > { %2663 = vmatprep.subr.bf16.mxu0 %v5040_v8  ;;  %2704 = vmatprep.subr.bf16.mxu1 %v5046_v37 }
 0xd55   : > { %2664 = vmatpush1.bf16.msra.mxu0 %v5052_v10  ;;  %2705 = vmatpush1.bf16.msra.mxu1 %v5058_v63 }
 0xd56   : > { %2761 = vmatprep.subr.bf16.mxu0 %v4814_v53  ;;  %2802 = vmatprep.subr.bf16.mxu1 %v4820_v57 }
 0xe0b   : > { %v2571_v62 = vpop.f32.mrb[84].mxu0  ;;  %v2612_v25 = vpop.f32.mrb[84].mxu1 }
 0xe0c   : > { %v2619_v23 = vadd.f32 %v2571_v62, %v5316_v21  ;;  %v2621_v24 = vadd.f32 %v2612_v25, %v5317_v26  ;;  %v2573_v27 = vpop.f32.mrb[85].mxu0  ;;  %v2614_v40 = vpop.f32.mrb[85].mxu1 }
 0xe0d   : > { %v2620_v42 = vadd.f32 %v2573_v27, %v5318_v41  ;;  %v2622_v32 = vadd.f32 %v2614_v40, %v5319_v43  ;;  %v2575_v31 = vpop.f32.mrb[86].mxu0  ;;  %v2616_v54 = vpop.f32.mrb[86].mxu1 }
 0xe0e   : > { %v2623_v33 = vmul.f32 0.5, %v2619_v23  ;;  %v2576_v35 = vpop.f32.mrb[87].mxu0  ;;  %v2617_v36 = vpop.f32.mrb[87].mxu1 }
 0xe0f   : > { %v2627_v53 = vmul.f32 0.5, %v2620_v42  ;;  %v2632_v57 = vmul.f32 0.5, %v2622_v32  ;;  %v5324_v42 = vld [vmem:[#allocation59_spill] sm:$0xff]  ;;  %v5325_v32 = vld [vmem:[#allocation60_spill] sm:$0xff]  ;;  %v5326_v35 = vld [vmem:[#allocation61_spill] sm:$0xff] }
 0xe10   : > { %3413 = vtanh.f32 %v2623_v33 }
 0xe11   : > { %3415 = vtanh.f32 %v2627_v53  ;;  %v5327_v53 = vld [vmem:[#allocation62_spill] sm:$0xff] }
 0xe12   : > { %3417 = vtanh.f32 %v2621_v24 }
 0xe13   : > { %3419 = vtanh.f32 %v2632_v57 }
 0xe1a   : > { %v3414_v60 = vpop.eup %3413 }
 0xe1b   : > { %v3416_v61 = vpop.eup %3415  ;;  %v2625_v1 = vmul.f32 0.5, %v3414_v60 }
 0xe1c   : > { %v2629_v49 = vmul.f32 0.5, %v3416_v61  ;;  %v3418_v0 = vpop.eup %3417 }
 0xe1d   : > { %v2626_v44 = vadd.f32 0.5, %v2625_v1  ;;  %v3420_v11 = vpop.eup %3419 }
 0xe1e   : > { %v2630_v46 = vadd.f32 0.5, %v2629_v49  ;;  %v2634_v22 = vmul.f32 0.5, %v3420_v11 }
 0xe1f   : > { %v2637_v47 = vmul.f32 %v3418_v0, %v2626_v44 }
 0xe20   : > { %v2636_v45 = vmul.f32 %v2630_v46, %v5068_v3  ;;  %v2635_v62 = vadd.f32 0.5, %v2634_v22 }
 0xe22   : > { %v5114_v12 = vadd.f32 %v2637_v47, %v2636_v45 }
 0xe24   : > { %3421 = vtanh.f32 %v5114_v12 }
 0xe2e   : > { %v3422_v25 = vpop.eup %3421 }
 0xe2f   : > { %v2640_v21 = vmul.f32 %v3422_v25, %v2635_v62 }
 0xe31   : > { %v3142_v23 = vpack.c.bf16 %v2640_v21, %v5071_v14  ;;  %v2648_v26 = vpack.c.bf16 %v2640_v21, %v2640_v21 }
 0xe33   : > { %3154 = vst [vmem:[%s3642_s14 + $0x30] sm:$0xff] %v3142_v23   ;;  %2682 = vmatmul.mubr.bf16.vlgmr.msra.gmra.mrb[88].mxu0 %v2648_v26  ;;  %2723 = vmatmul.mubr.bf16.vlgmr.msra.gmra.mrb[88].mxu1 %v2648_v26 }
 0xe34   : > { %2762 = vmatpush1.bf16.msra.mxu0 %v4882_v48  ;;  %2803 = vmatpush1.bf16.msra.mxu1 %v4888_v28  ;;  %v5320_v28 = vld [vmem:[#allocation55_spill] sm:$0xff] }
 0xe35   : > { %2763 = vmatprep.subr.bf16.mxu0 %v4894_v38  ;;  %2804 = vmatprep.subr.bf16.mxu1 %v4900_v39  ;;  %v5321_v39 = vld [vmem:[#allocation56_spill] sm:$0xff] }
 0xe36   : > { %2793 = vmatprep.mubr.bf16.mxu0 %v5276_v15  ;;  %2834 = vmatprep.mubr.bf16.mxu1 %v5276_v15 }
 0xe38   : > { %2764 = vmatpush1.bf16.msra.mxu0 %v4908_v29  ;;  %2805 = vmatpush1.bf16.msra.mxu1 %v4914_v5 }
 0xe39   : > { %2765 = vmatprep.subr.bf16.mxu0 %v4920_v18  ;;  %2806 = vmatprep.subr.bf16.mxu1 %v4926_v50  ;;  %v5322_v50 = vld [vmem:[#allocation57_spill] sm:$0xff] }
 0xe3c   : > { %2766 = vmatpush1.bf16.msra.mxu0 %v4932_v7  ;;  %2807 = vmatpush1.bf16.msra.mxu1 %v4938_v51  ;;  %v5323_v51 = vld [vmem:[#allocation58_spill] sm:$0xff] }
 0xe3d   : > { %2767 = vmatprep.subr.bf16.mxu0 %v4944_v52  ;;  %2808 = vmatprep.subr.bf16.mxu1 %v4950_v55 }
 0xe40   : > { %2768 = vmatpush1.bf16.msra.mxu0 %v4956_v2  ;;  %2809 = vmatpush1.bf16.msra.mxu1 %v4962_v56 }
 0xe41   : > { %2769 = vmatprep.subr.bf16.mxu0 %v4968_v58  ;;  %2810 = vmatprep.subr.bf16.mxu1 %v4974_v6 }
 0xe44   : > { %2770 = vmatpush1.bf16.msra.mxu0 %v4980_v59  ;;  %2811 = vmatpush1.bf16.msra.mxu1 %v4986_v19 }
 0xe45   : > { %2771 = vmatprep.subr.bf16.mxu0 %v4992_v16  ;;  %2812 = vmatprep.subr.bf16.mxu1 %v4998_v20 }
 0xe48   : > { %2772 = vmatpush1.bf16.msra.mxu0 %v5004_v4  ;;  %2813 = vmatpush1.bf16.msra.mxu1 %v5010_v9 }
 0xe49   : > { %2773 = vmatprep.subr.bf16.mxu0 %v5016_v13  ;;  %2814 = vmatprep.subr.bf16.mxu1 %v5022_v30 }
 0xe4c   : > { %2774 = vmatpush1.bf16.msra.mxu0 %v5028_v17  ;;  %2815 = vmatpush1.bf16.msra.mxu1 %v5034_v34 }
 0xe4d   : > { %2775 = vmatprep.subr.bf16.mxu0 %v5040_v8  ;;  %2816 = vmatprep.subr.bf16.mxu1 %v5046_v37 }
 0xe50   : > { %2776 = vmatpush1.bf16.msra.mxu0 %v5052_v10  ;;  %2817 = vmatpush1.bf16.msra.mxu1 %v5058_v63 }
 0xf06   : > { %v2683_v15 = vpop.f32.mrb[88].mxu0  ;;  %v2724_v48 = vpop.f32.mrb[88].mxu1 }
 0xf07   : > { %v2731_v38 = vadd.f32 %v2683_v15, %v5320_v28  ;;  %v2733_v29 = vadd.f32 %v2724_v48, %v5321_v39  ;;  %v2685_v5 = vpop.f32.mrb[89].mxu0  ;;  %v2726_v18 = vpop.f32.mrb[89].mxu1 }
 0xf08   : > { %v2732_v7 = vadd.f32 %v2685_v5, %v5322_v50  ;;  %v2734_v52 = vadd.f32 %v2726_v18, %v5323_v51  ;;  %v2687_v55 = vpop.f32.mrb[90].mxu0  ;;  %v2728_v2 = vpop.f32.mrb[90].mxu1 }
 0xf09   : > { %v2735_v56 = vmul.f32 0.5, %v2731_v38  ;;  %v2688_v58 = vpop.f32.mrb[91].mxu0  ;;  %v2729_v6 = vpop.f32.mrb[91].mxu1 }
 0xf0a   : > { %v2739_v59 = vmul.f32 0.5, %v2732_v7  ;;  %v2744_v19 = vmul.f32 0.5, %v2734_v52 }
 0xf0b   : > { %3423 = vtanh.f32 %v2735_v56 }
 0xf0c   : > { %3425 = vtanh.f32 %v2739_v59 }
 0xf0d   : > { %3427 = vtanh.f32 %v2733_v29 }
 0xf0e   : > { %3429 = vtanh.f32 %v2744_v19 }
 0xf15   : > { %v3424_v16 = vpop.eup %3423 }
 0xf16   : > { %v3426_v20 = vpop.eup %3425  ;;  %v2737_v4 = vmul.f32 0.5, %v3424_v16 }
 0xf17   : > { %v2741_v9 = vmul.f32 0.5, %v3426_v20  ;;  %v3428_v30 = vpop.eup %3427 }
 0xf18   : > { %v2738_v13 = vadd.f32 0.5, %v2737_v4  ;;  %v3430_v10 = vpop.eup %3429 }
 0xf19   : > { %v2742_v17 = vadd.f32 0.5, %v2741_v9  ;;  %v2746_v63 = vmul.f32 0.5, %v3430_v10 }
 0xf1a   : > { %v2749_v34 = vmul.f32 %v3428_v30, %v2738_v13 }
 0xf1b   : > { %v2748_v8 = vmul.f32 %v2742_v17, %v5114_v12  ;;  %v2747_v3 = vadd.f32 0.5, %v2746_v63 }
 0xf1d   : > { %v2750_v37 = vadd.f32 %v2749_v34, %v2748_v8 }
 0xf1f   : > { %3431 = vtanh.f32 %v2750_v37 }
 0xf29   : > { %v3432_v14 = vpop.eup %3431 }
 0xf2a   : > { %v5156_v24 = vmul.f32 %v3432_v14, %v2747_v3 }
 0xf2c   : > { %v2760_v27 = vpack.c.bf16 %v5156_v24, %v5156_v24 }
 0xf2e   : > { %2794 = vmatmul.mubr.bf16.vlgmr.msra.gmra.mrb[92].mxu0 %v2760_v27  ;;  %2835 = vmatmul.mubr.bf16.vlgmr.msra.gmra.mrb[92].mxu1 %v2760_v27 }
0x1001   : > { %v2795_v40 = vpop.f32.mrb[92].mxu0  ;;  %v2836_v41 = vpop.f32.mrb[92].mxu1 }
0x1002   : > { %v2843_v43 = vadd.f32 %v2795_v40, %v5324_v42  ;;  %v2845_v31 = vadd.f32 %v2836_v41, %v5325_v32  ;;  %v2797_v54 = vpop.f32.mrb[93].mxu0  ;;  %v2838_v33 = vpop.f32.mrb[93].mxu1 }
0x1003   : > { %v2844_v36 = vadd.f32 %v2797_v54, %v5326_v35  ;;  %v2846_v57 = vadd.f32 %v2838_v33, %v5327_v53  ;;  %v2799_v60 = vpop.f32.mrb[94].mxu0  ;;  %v2840_v61 = vpop.f32.mrb[94].mxu1 }
0x1004   : > { %v2847_v1 = vmul.f32 0.5, %v2843_v43  ;;  %v2800_v49 = vpop.f32.mrb[95].mxu0  ;;  %v2841_v44 = vpop.f32.mrb[95].mxu1 }
0x1005   : > { %v2851_v0 = vmul.f32 0.5, %v2844_v36  ;;  %v2856_v46 = vmul.f32 0.5, %v2846_v57 }
0x1006   : > { %3433 = vtanh.f32 %v2847_v1 }
0x1007   : > { %3435 = vtanh.f32 %v2851_v0 }
0x1008   : > { %3437 = vtanh.f32 %v2845_v31 }
0x1009   : > { %3439 = vtanh.f32 %v2856_v46 }
0x1010   : > { %v3434_v47 = vpop.eup %3433 }
0x1011   : > { %v3436_v45 = vpop.eup %3435  ;;  %v2849_v12 = vmul.f32 0.5, %v3434_v47 }
0x1012   : > { %v2853_v11 = vmul.f32 0.5, %v3436_v45  ;;  %v3438_v62 = vpop.eup %3437 }
0x1013   : > { %v2850_v22 = vadd.f32 0.5, %v2849_v12 }
0x1014   : > { %v2854_v25 = vadd.f32 0.5, %v2853_v11 }
0x1015   : > { %v2861_v21 = vmul.f32 %v3438_v62, %v2850_v22 }
0x1016   : > { %v2860_v23 = vmul.f32 %v2854_v25, %v2750_v37 }
0x1018   : > { %v2862_v26 = vadd.f32 %v2861_v21, %v2860_v23 }
0x101a   : > { %3441 = vtanh.f32 %v2862_v26  ;;  %2868 = vst [vmem:[#allocation5] sm:$0xff] %v2862_v26  ;;  %2918 = vst [vmem:[#allocation8] sm:$0xff] %v2862_v26 }
0x101b   : > { %3520 = shalt.err (!%p3517_p12)
}
0x101c   : > { %s3521_s22 = scalar_lea.hbm %s5222_s8, 128 }
0x101d   : > { %p3522_p13 = scmp.ne.s32.totalorder %s5222_s8, %s3521_s22  ;;  %p3527_p2 = scmp.lt.u32.totalorder %s3521_s22, %s5222_s8 }
0x101f   : > { %p3523_p0 = pnand %p3522_p13, %p3164_p5 }
0x1021   : > { %p3524_p1 = pneg %p3523_p0 }
0x1023   : > { %p3529_p3 = pnand %p3527_p2, %p3524_p1 }
0x1025   : > { %3532 = shalt.err (!%p3529_p3)
}
0x1026   : > { %3159 = dma.vmem_to_hbm [thread:$0]  (%p3164_p5), %s2947_s19, 128, %s5222_s8, [#allocation9]   ;;  %v3440_v15 = vpop.eup %3439 }
0x1027   : > { %v2858_v48 = vmul.f32 0.5, %v3440_v15  ;;  %s3577_s9 = smov [#allocation6]   ;;  %v3442_v38 = vpop.eup %3441 }
0x1028   : > { %s2935_s10 = sshll.u32 %s3577_s9, 4  ;;  %s2936_s10 = int_to_ptr.vmem [resolvable:$true] %s2935_s10 }
0x1029   : > { %v2859_v28 = vadd.f32 0.5, %v2858_v48  ;;  %s3533_s12 = scalar_lea.vmem %s2936_s10, 128  ;;  %p3540_p8 = scmp.lt.s32.totalorder %s2936_s10, %s2936_s10 }
0x102a   : > { %p3534_p4 = scmp.ne.s32.totalorder %s2936_s10, %s3533_s12  ;;  %p3541_p9 = scmp.lt.s32.totalorder %s3533_s12, %s3533_s12 }
0x102b   : > { %v2864_v39 = vmul.f32 %v3442_v38, %v2859_v28 }
0x102c   : > { %p3535_p6 = pnand %p3534_p4, %p3164_p5  ;;  %p3542_p10 = por %p3541_p9, %p3540_p8 }
0x102d   : > { %2867 = vst [vmem:[#allocation4] sm:$0xff] %v2864_v39  ;;  %v3147_v29 = vpack.c.bf16 %v2864_v39, %v5156_v24  ;;  %2917 = vst [vmem:[#allocation6] sm:$0xff] %v2864_v39 }
0x102e   : > { %p3536_p7 = pneg %p3535_p6 }
0x1030   : > { %p3543_p11 = pnand %p3542_p10, %p3536_p7 }
0x1032   : > { %3546 = shalt.err (!%p3543_p11)
}
0x1033   : > { %s3547_s16 = scalar_lea.hbm %s5221_s7, 128 }
0x1034   : > { %p3548_p12 = scmp.ne.s32.totalorder %s5221_s7, %s3547_s16  ;;  %p3553_p1 = scmp.lt.u32.totalorder %s3547_s16, %s5221_s7 }
0x1036   : > { %p3549_p13 = pnand %p3548_p12, %p3164_p5 }
0x1038   : > { %p3550_p0 = pneg %p3549_p13 }
0x103a   : > { %p3555_p2 = pnand %p3553_p1, %p3550_p0 }
0x103c   : > { %3558 = shalt.err (!%p3555_p2)
}
0x103d   : > { %3157 = dma.vmem_to_hbm [thread:$0]  (%p3164_p5), %s2936_s10, 128, %s5221_s7, [#allocation7]   ;;  %3155 = vst [vmem:[%s3642_s14 + $0x38] sm:$0xff] %v3147_v29  }
0x103e   : > { %3564 = dma.done.wait (%p3164_p5), [#allocation7], 128  }
0x103f   : > { %3566 = vsyncadd (%p3164_p5), [#allocation7], 4294967168 }
0x1040   : > { %3568 = dma.done.wait (%p3164_p5), [#allocation9], 128  }
0x1041   : > { %3570 = vsyncadd (%p3164_p5), [#allocation9], 4294967168 }
0x1042 PF: > { %s21_s27 = sadd.s32 1, %s3573_s27  }
0x1043   : > { %p18_p3 = scmp.ge.s32.totalorder %s21_s27, 4  }
0x1045   :  { %20 = sbr.rel (!%p18_p3) target bundleno = 2 (0x2), region = 125 }
0x104c   :  { %2971 = vsyncpa [#allocation7], 1 }
0x104d   :  { %2973 = vsyncpa [#allocation7 + $0x1], 1 }
0x104e   :  { %2974 = vsyncpa [#allocation9], 1 }

</bundles_post_ra>
